<compile_context>
chip_gen: v7x
topology: tpu7x:2x2x1
jax: 0.10.0
libtpu: 0.0.40
codegen_flags: <defaults>
</compile_context>

<pallas_src>
import functools
import math

import jax
import jax.numpy as jnp
from jax import lax
from jax.experimental import pallas as pl
from jax.experimental.pallas import tpu as pltpu

_NEG = -1e30  # "minus infinity" that stays finite under +/- arithmetic


def _unigat_kernel(x_ref, xt_ref, wt_ref, ma_ref, b_ref, bts_ref, dinv_ref,
                   out_ref, *, heads: int, ch: int, negative_slope: float,
                   use_norm: bool, skip_sum: bool):
    f32, bf16 = jnp.float32, jnp.bfloat16

    # ---- 0. linear layer: XW = X @ W^T (bf16 MXU inputs, f32 accumulation) --
    xw = jnp.dot(x_ref[...], wt_ref[...], preferred_element_type=f32)      # [N,D]

    # ---- 1. edge features: Xe = (deg^-1-scaled B)^T @ XW  (one MXU matmul) --
    xe = jnp.dot(bts_ref[...], xw.astype(bf16), preferred_element_type=f32)  # [E,D]
    xe_bf = xe.astype(bf16)

    # ---- 2. per-(edge, head) attention logits, directly in [H, E] layout ----
    # alpha^T = ((W @ A)^T @ X^T) @ B * deg^-1  (reassociation of
    # (Xe.view(E,H,C) * att_e).sum(-1); avoids any in-kernel transpose).
    gt = jnp.dot(ma_ref[...], xt_ref[...], preferred_element_type=f32)       # [H,N]
    alpha_t = jnp.dot(gt.astype(bf16), b_ref[...], preferred_element_type=f32)  # [H,E]
    alpha_t = alpha_t * dinv_ref[...]                                        # [1,E] bcast
    lal_t = jnp.where(alpha_t > 0, alpha_t, negative_slope * alpha_t)        # leaky relu

    # ---- 3. per-vertex segment softmax + weighted aggregation (vectorized) --
    b_cnt = b_ref[...].astype(f32)          # [N,E] incidence counts
    b_msk = b_cnt > 0.0
    head_cols = []
    for h in range(heads):                   # static unroll, heads is small
        a_row = lal_t[h:h + 1, :]                                    # [1,E]
        logits = jnp.where(b_msk, a_row, _NEG)                       # [N,E]
        m = jnp.max(logits, axis=1, keepdims=True)                   # [N,1] seg max
        p = b_cnt * jnp.exp(jnp.where(b_msk, a_row - m, _NEG))       # [N,E]
        den = jnp.sum(p, axis=1, keepdims=True)                      # [N,1]
        den_safe = jnp.where(den > 0, den, 1.0)
        inv = jnp.where(den > 0, pl.reciprocal(den_safe, approx=True), 0.0)
        vals = xe_bf[:, h * ch:(h + 1) * ch]                         # [E,C]
        xv_h = jnp.dot(p.astype(bf16), vals, preferred_element_type=f32)  # [N,C]
        head_cols.append(xv_h * inv)
    xv = jnp.concatenate(head_cols, axis=1)                          # [N,D]
    # TODO(synk): attention dropout not implemented (module config p=0.0);
    # pltpu.prng_seed / pltpu.stateful_bernoulli would supply the mask.

    # ---- 4. epilogue: row-L2 normalize (+ optional skip connection) ---------
    if use_norm:
        ss = jnp.sum(xv * xv, axis=1, keepdims=True)
        ss_safe = jnp.where(ss > 0, ss, 1.0)
        xv = xv * jnp.where(ss > 0, lax.rsqrt(ss_safe), 0.0)
    if skip_sum:
        xv = xv + xw
    out_ref[...] = xv.astype(out_ref.dtype)


def _vmem_limit_bytes():
    # Raise the scoped limit on 128-MiB chips (v5e/v6e); stay <= ~56 MiB on
    # v7x (64 MiB physical).  Falls back to a universally safe value.
    try:
        cap = int(pltpu.get_tpu_info().vmem_capacity_bytes)
    except Exception:
        cap = 64 * 1024 * 1024
    return int(min(cap * 7 // 8, 112 * 1024 * 1024))


def unigat_conv(X, vertex, edges, Wt, att_e, *, num_edges,
                first_aggregate="mean", negative_slope=0.2,
                use_norm=True, skip_sum=False):
    """UniGATConv forward.

    X      : [N, F_in] f32 node features
    vertex : [nnz] i32 node indices of the hypergraph incidence list
    edges  : [nnz] i32 edge indices of the hypergraph incidence list
    Wt     : [F_in, H*C] f32 (transposed nn.Linear weight, no bias)
    att_e  : [1, H, C]  f32 attention parameter
    """
    N, F_in = X.shape
    E = int(num_edges)
    D = int(Wt.shape[1])
    H = int(att_e.shape[1])
    C = int(att_e.shape[2])
    assert H * C == D

    # ---- incidence preprocessing (plain JAX glue) ----------------------------
    # Dense count incidence matrix: replaces serial per-incidence scatters with
    # MXU matmuls inside the kernel.  Counts are exact in bf16 (small ints).
    ones = jnp.ones(vertex.shape, jnp.float32)
    B = jnp.zeros((N, E), jnp.float32).at[vertex, edges].add(ones)       # [N,E]
    deg = jnp.sum(B, axis=0)                                             # [E]
    if first_aggregate == "mean":
        dinv = jnp.where(deg > 0, 1.0 / deg, 0.0)
    elif first_aggregate == "sum":
        dinv = jnp.ones((E,), jnp.float32)
    else:
        # TODO(synk): torch_scatter 'max'/'min' first_aggregate not implemented.
        raise ValueError(f"unsupported first_aggregate: {first_aggregate}")
    bts = (B * dinv[None, :]).T                                          # [E,N]

    # (Xe.view(E,H,C) * att_e).sum(-1) == Xe @ A with block-structured A [D,H];
    # fold W into it so the kernel gets the logits directly in [H, E] layout.
    att_flat = att_e.reshape(H, C).astype(jnp.float32)
    A = (att_flat[:, :, None] *
         jnp.eye(H, dtype=jnp.float32)[:, None, :]).reshape(D, H)        # [D,H]
    MA = (Wt.astype(jnp.float32) @ A).T                                  # [H,F_in]

    bf = jnp.bfloat16
    kernel = functools.partial(_unigat_kernel, heads=H, ch=C,
                               negative_slope=float(negative_slope),
                               use_norm=bool(use_norm),
                               skip_sum=bool(skip_sum))

    def full(shape):
        return pl.BlockSpec(shape, lambda i: (0,) * len(shape))

    grid_spec = pltpu.PrefetchScalarGridSpec(
        num_scalar_prefetch=0,
        grid=(1,),
        in_specs=[
            full((N, F_in)),   # X           (bf16)
            full((F_in, N)),   # X^T         (bf16)
            full((F_in, D)),   # W^T         (bf16)
            full((H, F_in)),   # (W @ A)^T   (bf16)
            full((N, E)),      # incidence counts B        (bf16)
            full((E, N)),      # deg^-1-scaled B^T         (bf16)
            full((1, E)),      # deg^-1 row                (f32)
        ],
        out_specs=full((N, D)),
    )

    cost = pl.CostEstimate(
        flops=int(2 * N * F_in * D        # X @ W^T
                  + 2 * E * N * D         # B^T @ XW
                  + 2 * H * F_in * N      # (W A)^T @ X^T
                  + 2 * H * N * E         # logits @ B
                  + 2 * N * E * D         # per-head weighted aggregation
                  + 8 * N * E * H         # softmax weights (VPU)
                  + 6 * N * D),           # epilogue
        transcendentals=int(H * N * E + H * N + N),
        bytes_accessed=int(2 * (2 * N * F_in + F_in * D + H * F_in + 2 * N * E)
                           + 4 * (E + N * D)),
    )

    return pl.pallas_call(
        kernel,
        out_shape=jax.ShapeDtypeStruct((N, D), jnp.float32),
        grid_spec=grid_spec,
        compiler_params=pltpu.CompilerParams(
            dimension_semantics=("arbitrary",),
            vmem_limit_bytes=_vmem_limit_bytes(),
        ),
        cost_estimate=cost,
    )(X.astype(bf), X.T.astype(bf), Wt.astype(bf), MA.astype(bf),
      B.astype(bf), bts.astype(bf), dinv[None, :].astype(jnp.float32))


def _reference(X, vertex, edges, Wt, att_e, *, num_edges, negative_slope=0.2,
               use_norm=True, skip_sum=False):
    """Pure-JAX f32 reference mirroring the PyTorch UniGATConv.forward."""
    N = X.shape[0]
    E = num_edges
    H, C = att_e.shape[1], att_e.shape[2]
    X0 = X @ Wt                                             # [N, H*C]
    Xhc = X0.reshape(N, H, C)
    Xve = Xhc[vertex]                                       # [nnz, H, C]
    sums = jnp.zeros((E, H, C), jnp.float32).at[edges].add(Xve)
    cnt = jnp.zeros((E,), jnp.float32).at[edges].add(1.0)
    Xe = sums * jnp.where(cnt > 0, 1.0 / cnt, 0.0)[:, None, None]
    alpha_e = (Xe * att_e).sum(-1)                          # [E, H]
    a_ev = alpha_e[edges]                                   # [nnz, H]
    alpha = jnp.where(a_ev > 0, a_ev, negative_slope * a_ev)
    # segment softmax grouped by vertex (torch_geometric softmax semantics)
    gmax = jnp.full((N, H), -jnp.inf, jnp.float32).at[vertex].max(alpha)
    ex = jnp.exp(alpha - gmax[vertex])
    den = jnp.zeros((N, H), jnp.float32).at[vertex].add(ex)
    w = ex / (den[vertex] + 1e-16)
    Xev = Xe[edges] * w[:, :, None]
    Xv = jnp.zeros((N, H, C), jnp.float32).at[vertex].add(Xev)
    out = Xv.reshape(N, H * C)
    if use_norm:
        rn = jnp.sqrt(jnp.sum(out * out, axis=1, keepdims=True))
        out = out * jnp.where(rn > 0, 1.0 / rn, 0.0)
    if skip_sum:
        out = out + X0
    return out


if __name__ == "__main__":
    # Small deterministic problem: N nodes, E hyperedges, nnz incidences.
    N, F_IN, HEADS, F_OUT = 64, 32, 8, 16
    D = HEADS * F_OUT                      # 128 (lane-dense output)
    E, NNZ = 32, 256

    key = jax.random.PRNGKey(0)
    kx, kw, ka, kv, ke = jax.random.split(key, 5)

    X = jax.random.normal(kx, (N, F_IN), dtype=jnp.float32)
    # nn.Linear(F_IN, HEADS*F_OUT, bias=False): weight [D, F_IN]; pass W.T
    Wt = (jax.random.normal(kw, (D, F_IN), dtype=jnp.float32)
          * (1.0 / jnp.sqrt(F_IN))).T
    s = float(math.sqrt(6.0 / (HEADS + F_OUT)))             # glorot bound
    att_e = jax.random.uniform(ka, (1, HEADS, F_OUT), jnp.float32, -s, s)
    vertex = jax.random.randint(kv, (NNZ,), 0, N, dtype=jnp.int32)
    edges = jax.random.randint(ke, (NNZ,), 0, E, dtype=jnp.int32)

    out = unigat_conv(X, vertex, edges, Wt, att_e, num_edges=E,
                      first_aggregate="mean", negative_slope=0.2,
                      use_norm=True, skip_sum=False)
    out = jax.block_until_ready(out)

    ref = _reference(X, vertex, edges, Wt, att_e, num_edges=E,
                     negative_slope=0.2, use_norm=True, skip_sum=False)
    assert out.shape == (N, D)
    # bf16 MXU inputs in the kernel vs a full-f32 reference -> relaxed tol.
    assert jnp.allclose(out, ref, atol=2e-2, rtol=2e-2), "mismatch vs reference"

    print("KERNEL_OK")
</pallas_src>

<mosaic_0001>
module attributes {stable_mosaic.version = 11 : i64} {
  func.func @_unigat_kernel(%arg0: i32, %arg1: memref<64x32xbf16, #tpu.memory_space<vmem>>, %arg2: memref<32x64xbf16, #tpu.memory_space<vmem>>, %arg3: memref<32x128xbf16, #tpu.memory_space<vmem>>, %arg4: memref<8x32xbf16, #tpu.memory_space<vmem>>, %arg5: memref<64x32xbf16, #tpu.memory_space<vmem>>, %arg6: memref<32x64xbf16, #tpu.memory_space<vmem>>, %arg7: memref<1x32xf32, #tpu.memory_space<vmem>>, %arg8: memref<64x128xf32, #tpu.memory_space<vmem>>) attributes {dimension_semantics = [#tpu.dimension_semantics<arbitrary>], iteration_bounds = array<i64: 1>, scalar_prefetch = 0 : i64, scratch_operands = 0 : i64, tpu.core_type = #tpu.core_type<tc>, window_params = [{pipeline_mode = #tpu.pipeline_mode<synchronous>, transform_indices = @transform_0, window_bounds = array<i64: 64, 32>}, {pipeline_mode = #tpu.pipeline_mode<synchronous>, transform_indices = @transform_1, window_bounds = array<i64: 32, 64>}, {pipeline_mode = #tpu.pipeline_mode<synchronous>, transform_indices = @transform_2, window_bounds = array<i64: 32, 128>}, {pipeline_mode = #tpu.pipeline_mode<synchronous>, transform_indices = @transform_3, window_bounds = array<i64: 8, 32>}, {pipeline_mode = #tpu.pipeline_mode<synchronous>, transform_indices = @transform_4, window_bounds = array<i64: 64, 32>}, {pipeline_mode = #tpu.pipeline_mode<synchronous>, transform_indices = @transform_5, window_bounds = array<i64: 32, 64>}, {pipeline_mode = #tpu.pipeline_mode<synchronous>, transform_indices = @transform_6, window_bounds = array<i64: 1, 32>}, {pipeline_mode = #tpu.pipeline_mode<synchronous>, transform_indices = @transform_7, window_bounds = array<i64: 64, 128>}]} {
    %c0 = arith.constant 0 : index
    %c0_0 = arith.constant 0 : index
    %0 = vector.load %arg1[%c0, %c0_0] : memref<64x32xbf16, #tpu.memory_space<vmem>>, vector<64x32xbf16>
    %c0_1 = arith.constant 0 : index
    %c0_2 = arith.constant 0 : index
    %1 = vector.load %arg3[%c0_1, %c0_2] : memref<32x128xbf16, #tpu.memory_space<vmem>>, vector<32x128xbf16>
    %cst = arith.constant dense<0.000000e+00> : vector<64x128xf32>
    %2 = tpu.matmul %0, %1, %cst {dimension_numbers = #tpu.dot_dimension_numbers<[1], [0], [0], [1], [0, 0, 1, 1], [], []>} : vector<64x32xbf16>, vector<32x128xbf16>, vector<64x128xf32> -> vector<64x128xf32>
    %c0_3 = arith.constant 0 : index
    %c0_4 = arith.constant 0 : index
    %3 = vector.load %arg6[%c0_3, %c0_4] : memref<32x64xbf16, #tpu.memory_space<vmem>>, vector<32x64xbf16>
    %4 = arith.truncf %2 : vector<64x128xf32> to vector<64x128xbf16>
    %cst_5 = arith.constant dense<0.000000e+00> : vector<32x128xf32>
    %5 = tpu.matmul %3, %4, %cst_5 {dimension_numbers = #tpu.dot_dimension_numbers<[1], [0], [0], [1], [0, 0, 1, 1], [], []>} : vector<32x64xbf16>, vector<64x128xbf16>, vector<32x128xf32> -> vector<32x128xf32>
    %6 = arith.truncf %5 : vector<32x128xf32> to vector<32x128xbf16>
    %c0_6 = arith.constant 0 : index
    %c0_7 = arith.constant 0 : index
    %7 = vector.load %arg4[%c0_6, %c0_7] : memref<8x32xbf16, #tpu.memory_space<vmem>>, vector<8x32xbf16>
    %c0_8 = arith.constant 0 : index
    %c0_9 = arith.constant 0 : index
    %8 = vector.load %arg2[%c0_8, %c0_9] : memref<32x64xbf16, #tpu.memory_space<vmem>>, vector<32x64xbf16>
    %cst_10 = arith.constant dense<0.000000e+00> : vector<8x64xf32>
    %9 = tpu.matmul %7, %8, %cst_10 {dimension_numbers = #tpu.dot_dimension_numbers<[1], [0], [0], [1], [0, 0, 1, 1], [], []>} : vector<8x32xbf16>, vector<32x64xbf16>, vector<8x64xf32> -> vector<8x64xf32>
    %10 = arith.truncf %9 : vector<8x64xf32> to vector<8x64xbf16>
    %c0_11 = arith.constant 0 : index
    %c0_12 = arith.constant 0 : index
    %11 = vector.load %arg5[%c0_11, %c0_12] : memref<64x32xbf16, #tpu.memory_space<vmem>>, vector<64x32xbf16>
    %cst_13 = arith.constant dense<0.000000e+00> : vector<8x32xf32>
    %12 = tpu.matmul %10, %11, %cst_13 {dimension_numbers = #tpu.dot_dimension_numbers<[1], [0], [0], [1], [0, 0, 1, 1], [], []>} : vector<8x64xbf16>, vector<64x32xbf16>, vector<8x32xf32> -> vector<8x32xf32>
    %c0_14 = arith.constant 0 : index
    %c0_15 = arith.constant 0 : index
    %13 = vector.load %arg7[%c0_14, %c0_15] : memref<1x32xf32, #tpu.memory_space<vmem>>, vector<1x32xf32>
    %14 = vector.broadcast %13 : vector<1x32xf32> to vector<8x32xf32>
    %15 = arith.mulf %12, %14 : vector<8x32xf32>
    %cst_16 = arith.constant 0.000000e+00 : f32
    %16 = vector.broadcast %cst_16 : f32 to vector<8x32xf32>
    %17 = arith.cmpf ogt, %15, %16 : vector<8x32xf32>
    %cst_17 = arith.constant 2.000000e-01 : f32
    %18 = vector.broadcast %cst_17 : f32 to vector<8x32xf32>
    %19 = arith.mulf %18, %15 : vector<8x32xf32>
    %20 = arith.select %17, %15, %19 : vector<8x32xi1>, vector<8x32xf32>
    %c0_18 = arith.constant 0 : index
    %c0_19 = arith.constant 0 : index
    %21 = vector.load %arg5[%c0_18, %c0_19] : memref<64x32xbf16, #tpu.memory_space<vmem>>, vector<64x32xbf16>
    %22 = arith.extf %21 : vector<64x32xbf16> to vector<64x32xf32>
    %cst_20 = arith.constant 0.000000e+00 : f32
    %23 = vector.broadcast %cst_20 : f32 to vector<64x32xf32>
    %24 = arith.cmpf ogt, %22, %23 : vector<64x32xf32>
    %25 = vector.extract_strided_slice %20 {offsets = [0, 0], sizes = [1, 32], strides = [1, 1]} : vector<8x32xf32> to vector<1x32xf32>
    %cst_21 = arith.constant -1.000000e+30 : f32
    %26 = vector.shape_cast %25 : vector<1x32xf32> to vector<1x32xf32>
    %27 = vector.broadcast %26 : vector<1x32xf32> to vector<64x32xf32>
    %28 = vector.broadcast %cst_21 : f32 to vector<64x32xf32>
    %29 = arith.select %24, %27, %28 : vector<64x32xi1>, vector<64x32xf32>
    %cst_22 = arith.constant dense<0xFF800000> : vector<64xf32>
    %30 = vector.multi_reduction <maximumf>, %29, %cst_22 [1] : vector<64x32xf32> to vector<64xf32>
    %31 = vector.shape_cast %30 : vector<64xf32> to vector<64x1xf32>
    %32 = vector.broadcast %25 : vector<1x32xf32> to vector<64x32xf32>
    %33 = vector.broadcast %31 : vector<64x1xf32> to vector<64x32xf32>
    %34 = arith.subf %32, %33 : vector<64x32xf32>
    %cst_23 = arith.constant -1.000000e+30 : f32
    %35 = vector.broadcast %cst_23 : f32 to vector<64x32xf32>
    %36 = arith.select %24, %34, %35 : vector<64x32xi1>, vector<64x32xf32>
    %37 = math.exp %36 : vector<64x32xf32>
    %38 = arith.mulf %22, %37 : vector<64x32xf32>
    %cst_24 = arith.constant dense<0.000000e+00> : vector<64xf32>
    %39 = vector.multi_reduction <add>, %38, %cst_24 [1] : vector<64x32xf32> to vector<64xf32>
    %40 = vector.shape_cast %39 : vector<64xf32> to vector<64x1xf32>
    %cst_25 = arith.constant 0.000000e+00 : f32
    %41 = vector.broadcast %cst_25 : f32 to vector<64x1xf32>
    %42 = arith.cmpf ogt, %40, %41 : vector<64x1xf32>
    %cst_26 = arith.constant 1.000000e+00 : f32
    %43 = vector.broadcast %cst_26 : f32 to vector<64x1xf32>
    %44 = arith.select %42, %40, %43 : vector<64x1xi1>, vector<64x1xf32>
    %cst_27 = arith.constant 0.000000e+00 : f32
    %45 = vector.broadcast %cst_27 : f32 to vector<64x1xf32>
    %46 = arith.cmpf ogt, %40, %45 : vector<64x1xf32>
    %47 = tpu.reciprocal %44 {approx = true} : vector<64x1xf32> -> vector<64x1xf32>
    %cst_28 = arith.constant 0.000000e+00 : f32
    %48 = vector.broadcast %cst_28 : f32 to vector<64x1xf32>
    %49 = arith.select %46, %47, %48 : vector<64x1xi1>, vector<64x1xf32>
    %50 = vector.extract_strided_slice %6 {offsets = [0, 0], sizes = [32, 16], strides = [1, 1]} : vector<32x128xbf16> to vector<32x16xbf16>
    %51 = arith.truncf %38 : vector<64x32xf32> to vector<64x32xbf16>
    %cst_29 = arith.constant dense<0.000000e+00> : vector<64x16xf32>
    %52 = tpu.matmul %51, %50, %cst_29 {dimension_numbers = #tpu.dot_dimension_numbers<[1], [0], [0], [1], [0, 0, 1, 1], [], []>} : vector<64x32xbf16>, vector<32x16xbf16>, vector<64x16xf32> -> vector<64x16xf32>
    %53 = vector.broadcast %49 : vector<64x1xf32> to vector<64x16xf32>
    %54 = arith.mulf %52, %53 : vector<64x16xf32>
    %55 = vector.extract_strided_slice %20 {offsets = [1, 0], sizes = [1, 32], strides = [1, 1]} : vector<8x32xf32> to vector<1x32xf32>
    %cst_30 = arith.constant -1.000000e+30 : f32
    %56 = vector.shape_cast %55 : vector<1x32xf32> to vector<1x32xf32>
    %57 = vector.broadcast %56 : vector<1x32xf32> to vector<64x32xf32>
    %58 = vector.broadcast %cst_30 : f32 to vector<64x32xf32>
    %59 = arith.select %24, %57, %58 : vector<64x32xi1>, vector<64x32xf32>
    %cst_31 = arith.constant dense<0xFF800000> : vector<64xf32>
    %60 = vector.multi_reduction <maximumf>, %59, %cst_31 [1] : vector<64x32xf32> to vector<64xf32>
    %61 = vector.shape_cast %60 : vector<64xf32> to vector<64x1xf32>
    %62 = vector.broadcast %55 : vector<1x32xf32> to vector<64x32xf32>
    %63 = vector.broadcast %61 : vector<64x1xf32> to vector<64x32xf32>
    %64 = arith.subf %62, %63 : vector<64x32xf32>
    %cst_32 = arith.constant -1.000000e+30 : f32
    %65 = vector.broadcast %cst_32 : f32 to vector<64x32xf32>
    %66 = arith.select %24, %64, %65 : vector<64x32xi1>, vector<64x32xf32>
    %67 = math.exp %66 : vector<64x32xf32>
    %68 = arith.mulf %22, %67 : vector<64x32xf32>
    %cst_33 = arith.constant dense<0.000000e+00> : vector<64xf32>
    %69 = vector.multi_reduction <add>, %68, %cst_33 [1] : vector<64x32xf32> to vector<64xf32>
    %70 = vector.shape_cast %69 : vector<64xf32> to vector<64x1xf32>
    %cst_34 = arith.constant 0.000000e+00 : f32
    %71 = vector.broadcast %cst_34 : f32 to vector<64x1xf32>
    %72 = arith.cmpf ogt, %70, %71 : vector<64x1xf32>
    %cst_35 = arith.constant 1.000000e+00 : f32
    %73 = vector.broadcast %cst_35 : f32 to vector<64x1xf32>
    %74 = arith.select %72, %70, %73 : vector<64x1xi1>, vector<64x1xf32>
    %cst_36 = arith.constant 0.000000e+00 : f32
    %75 = vector.broadcast %cst_36 : f32 to vector<64x1xf32>
    %76 = arith.cmpf ogt, %70, %75 : vector<64x1xf32>
    %77 = tpu.reciprocal %74 {approx = true} : vector<64x1xf32> -> vector<64x1xf32>
    %cst_37 = arith.constant 0.000000e+00 : f32
    %78 = vector.broadcast %cst_37 : f32 to vector<64x1xf32>
    %79 = arith.select %76, %77, %78 : vector<64x1xi1>, vector<64x1xf32>
    %80 = vector.extract_strided_slice %6 {offsets = [0, 16], sizes = [32, 16], strides = [1, 1]} : vector<32x128xbf16> to vector<32x16xbf16>
    %81 = arith.truncf %68 : vector<64x32xf32> to vector<64x32xbf16>
    %cst_38 = arith.constant dense<0.000000e+00> : vector<64x16xf32>
    %82 = tpu.matmul %81, %80, %cst_38 {dimension_numbers = #tpu.dot_dimension_numbers<[1], [0], [0], [1], [0, 0, 1, 1], [], []>} : vector<64x32xbf16>, vector<32x16xbf16>, vector<64x16xf32> -> vector<64x16xf32>
    %83 = vector.broadcast %79 : vector<64x1xf32> to vector<64x16xf32>
    %84 = arith.mulf %82, %83 : vector<64x16xf32>
    %85 = vector.extract_strided_slice %20 {offsets = [2, 0], sizes = [1, 32], strides = [1, 1]} : vector<8x32xf32> to vector<1x32xf32>
    %cst_39 = arith.constant -1.000000e+30 : f32
    %86 = vector.shape_cast %85 : vector<1x32xf32> to vector<1x32xf32>
    %87 = vector.broadcast %86 : vector<1x32xf32> to vector<64x32xf32>
    %88 = vector.broadcast %cst_39 : f32 to vector<64x32xf32>
    %89 = arith.select %24, %87, %88 : vector<64x32xi1>, vector<64x32xf32>
    %cst_40 = arith.constant dense<0xFF800000> : vector<64xf32>
    %90 = vector.multi_reduction <maximumf>, %89, %cst_40 [1] : vector<64x32xf32> to vector<64xf32>
    %91 = vector.shape_cast %90 : vector<64xf32> to vector<64x1xf32>
    %92 = vector.broadcast %85 : vector<1x32xf32> to vector<64x32xf32>
    %93 = vector.broadcast %91 : vector<64x1xf32> to vector<64x32xf32>
    %94 = arith.subf %92, %93 : vector<64x32xf32>
    %cst_41 = arith.constant -1.000000e+30 : f32
    %95 = vector.broadcast %cst_41 : f32 to vector<64x32xf32>
    %96 = arith.select %24, %94, %95 : vector<64x32xi1>, vector<64x32xf32>
    %97 = math.exp %96 : vector<64x32xf32>
    %98 = arith.mulf %22, %97 : vector<64x32xf32>
    %cst_42 = arith.constant dense<0.000000e+00> : vector<64xf32>
    %99 = vector.multi_reduction <add>, %98, %cst_42 [1] : vector<64x32xf32> to vector<64xf32>
    %100 = vector.shape_cast %99 : vector<64xf32> to vector<64x1xf32>
    %cst_43 = arith.constant 0.000000e+00 : f32
    %101 = vector.broadcast %cst_43 : f32 to vector<64x1xf32>
    %102 = arith.cmpf ogt, %100, %101 : vector<64x1xf32>
    %cst_44 = arith.constant 1.000000e+00 : f32
    %103 = vector.broadcast %cst_44 : f32 to vector<64x1xf32>
    %104 = arith.select %102, %100, %103 : vector<64x1xi1>, vector<64x1xf32>
    %cst_45 = arith.constant 0.000000e+00 : f32
    %105 = vector.broadcast %cst_45 : f32 to vector<64x1xf32>
    %106 = arith.cmpf ogt, %100, %105 : vector<64x1xf32>
    %107 = tpu.reciprocal %104 {approx = true} : vector<64x1xf32> -> vector<64x1xf32>
    %cst_46 = arith.constant 0.000000e+00 : f32
    %108 = vector.broadcast %cst_46 : f32 to vector<64x1xf32>
    %109 = arith.select %106, %107, %108 : vector<64x1xi1>, vector<64x1xf32>
    %110 = vector.extract_strided_slice %6 {offsets = [0, 32], sizes = [32, 16], strides = [1, 1]} : vector<32x128xbf16> to vector<32x16xbf16>
    %111 = arith.truncf %98 : vector<64x32xf32> to vector<64x32xbf16>
    %cst_47 = arith.constant dense<0.000000e+00> : vector<64x16xf32>
    %112 = tpu.matmul %111, %110, %cst_47 {dimension_numbers = #tpu.dot_dimension_numbers<[1], [0], [0], [1], [0, 0, 1, 1], [], []>} : vector<64x32xbf16>, vector<32x16xbf16>, vector<64x16xf32> -> vector<64x16xf32>
    %113 = vector.broadcast %109 : vector<64x1xf32> to vector<64x16xf32>
    %114 = arith.mulf %112, %113 : vector<64x16xf32>
    %115 = vector.extract_strided_slice %20 {offsets = [3, 0], sizes = [1, 32], strides = [1, 1]} : vector<8x32xf32> to vector<1x32xf32>
    %cst_48 = arith.constant -1.000000e+30 : f32
    %116 = vector.shape_cast %115 : vector<1x32xf32> to vector<1x32xf32>
    %117 = vector.broadcast %116 : vector<1x32xf32> to vector<64x32xf32>
    %118 = vector.broadcast %cst_48 : f32 to vector<64x32xf32>
    %119 = arith.select %24, %117, %118 : vector<64x32xi1>, vector<64x32xf32>
    %cst_49 = arith.constant dense<0xFF800000> : vector<64xf32>
    %120 = vector.multi_reduction <maximumf>, %119, %cst_49 [1] : vector<64x32xf32> to vector<64xf32>
    %121 = vector.shape_cast %120 : vector<64xf32> to vector<64x1xf32>
    %122 = vector.broadcast %115 : vector<1x32xf32> to vector<64x32xf32>
    %123 = vector.broadcast %121 : vector<64x1xf32> to vector<64x32xf32>
    %124 = arith.subf %122, %123 : vector<64x32xf32>
    %cst_50 = arith.constant -1.000000e+30 : f32
    %125 = vector.broadcast %cst_50 : f32 to vector<64x32xf32>
    %126 = arith.select %24, %124, %125 : vector<64x32xi1>, vector<64x32xf32>
    %127 = math.exp %126 : vector<64x32xf32>
    %128 = arith.mulf %22, %127 : vector<64x32xf32>
    %cst_51 = arith.constant dense<0.000000e+00> : vector<64xf32>
    %129 = vector.multi_reduction <add>, %128, %cst_51 [1] : vector<64x32xf32> to vector<64xf32>
    %130 = vector.shape_cast %129 : vector<64xf32> to vector<64x1xf32>
    %cst_52 = arith.constant 0.000000e+00 : f32
    %131 = vector.broadcast %cst_52 : f32 to vector<64x1xf32>
    %132 = arith.cmpf ogt, %130, %131 : vector<64x1xf32>
    %cst_53 = arith.constant 1.000000e+00 : f32
    %133 = vector.broadcast %cst_53 : f32 to vector<64x1xf32>
    %134 = arith.select %132, %130, %133 : vector<64x1xi1>, vector<64x1xf32>
    %cst_54 = arith.constant 0.000000e+00 : f32
    %135 = vector.broadcast %cst_54 : f32 to vector<64x1xf32>
    %136 = arith.cmpf ogt, %130, %135 : vector<64x1xf32>
    %137 = tpu.reciprocal %134 {approx = true} : vector<64x1xf32> -> vector<64x1xf32>
    %cst_55 = arith.constant 0.000000e+00 : f32
    %138 = vector.broadcast %cst_55 : f32 to vector<64x1xf32>
    %139 = arith.select %136, %137, %138 : vector<64x1xi1>, vector<64x1xf32>
    %140 = vector.extract_strided_slice %6 {offsets = [0, 48], sizes = [32, 16], strides = [1, 1]} : vector<32x128xbf16> to vector<32x16xbf16>
    %141 = arith.truncf %128 : vector<64x32xf32> to vector<64x32xbf16>
    %cst_56 = arith.constant dense<0.000000e+00> : vector<64x16xf32>
    %142 = tpu.matmul %141, %140, %cst_56 {dimension_numbers = #tpu.dot_dimension_numbers<[1], [0], [0], [1], [0, 0, 1, 1], [], []>} : vector<64x32xbf16>, vector<32x16xbf16>, vector<64x16xf32> -> vector<64x16xf32>
    %143 = vector.broadcast %139 : vector<64x1xf32> to vector<64x16xf32>
    %144 = arith.mulf %142, %143 : vector<64x16xf32>
    %145 = vector.extract_strided_slice %20 {offsets = [4, 0], sizes = [1, 32], strides = [1, 1]} : vector<8x32xf32> to vector<1x32xf32>
    %cst_57 = arith.constant -1.000000e+30 : f32
    %146 = vector.shape_cast %145 : vector<1x32xf32> to vector<1x32xf32>
    %147 = vector.broadcast %146 : vector<1x32xf32> to vector<64x32xf32>
    %148 = vector.broadcast %cst_57 : f32 to vector<64x32xf32>
    %149 = arith.select %24, %147, %148 : vector<64x32xi1>, vector<64x32xf32>
    %cst_58 = arith.constant dense<0xFF800000> : vector<64xf32>
    %150 = vector.multi_reduction <maximumf>, %149, %cst_58 [1] : vector<64x32xf32> to vector<64xf32>
    %151 = vector.shape_cast %150 : vector<64xf32> to vector<64x1xf32>
    %152 = vector.broadcast %145 : vector<1x32xf32> to vector<64x32xf32>
    %153 = vector.broadcast %151 : vector<64x1xf32> to vector<64x32xf32>
    %154 = arith.subf %152, %153 : vector<64x32xf32>
    %cst_59 = arith.constant -1.000000e+30 : f32
    %155 = vector.broadcast %cst_59 : f32 to vector<64x32xf32>
    %156 = arith.select %24, %154, %155 : vector<64x32xi1>, vector<64x32xf32>
    %157 = math.exp %156 : vector<64x32xf32>
    %158 = arith.mulf %22, %157 : vector<64x32xf32>
    %cst_60 = arith.constant dense<0.000000e+00> : vector<64xf32>
    %159 = vector.multi_reduction <add>, %158, %cst_60 [1] : vector<64x32xf32> to vector<64xf32>
    %160 = vector.shape_cast %159 : vector<64xf32> to vector<64x1xf32>
    %cst_61 = arith.constant 0.000000e+00 : f32
    %161 = vector.broadcast %cst_61 : f32 to vector<64x1xf32>
    %162 = arith.cmpf ogt, %160, %161 : vector<64x1xf32>
    %cst_62 = arith.constant 1.000000e+00 : f32
    %163 = vector.broadcast %cst_62 : f32 to vector<64x1xf32>
    %164 = arith.select %162, %160, %163 : vector<64x1xi1>, vector<64x1xf32>
    %cst_63 = arith.constant 0.000000e+00 : f32
    %165 = vector.broadcast %cst_63 : f32 to vector<64x1xf32>
    %166 = arith.cmpf ogt, %160, %165 : vector<64x1xf32>
    %167 = tpu.reciprocal %164 {approx = true} : vector<64x1xf32> -> vector<64x1xf32>
    %cst_64 = arith.constant 0.000000e+00 : f32
    %168 = vector.broadcast %cst_64 : f32 to vector<64x1xf32>
    %169 = arith.select %166, %167, %168 : vector<64x1xi1>, vector<64x1xf32>
    %170 = vector.extract_strided_slice %6 {offsets = [0, 64], sizes = [32, 16], strides = [1, 1]} : vector<32x128xbf16> to vector<32x16xbf16>
    %171 = arith.truncf %158 : vector<64x32xf32> to vector<64x32xbf16>
    %cst_65 = arith.constant dense<0.000000e+00> : vector<64x16xf32>
    %172 = tpu.matmul %171, %170, %cst_65 {dimension_numbers = #tpu.dot_dimension_numbers<[1], [0], [0], [1], [0, 0, 1, 1], [], []>} : vector<64x32xbf16>, vector<32x16xbf16>, vector<64x16xf32> -> vector<64x16xf32>
    %173 = vector.broadcast %169 : vector<64x1xf32> to vector<64x16xf32>
    %174 = arith.mulf %172, %173 : vector<64x16xf32>
    %175 = vector.extract_strided_slice %20 {offsets = [5, 0], sizes = [1, 32], strides = [1, 1]} : vector<8x32xf32> to vector<1x32xf32>
    %cst_66 = arith.constant -1.000000e+30 : f32
    %176 = vector.shape_cast %175 : vector<1x32xf32> to vector<1x32xf32>
    %177 = vector.broadcast %176 : vector<1x32xf32> to vector<64x32xf32>
    %178 = vector.broadcast %cst_66 : f32 to vector<64x32xf32>
    %179 = arith.select %24, %177, %178 : vector<64x32xi1>, vector<64x32xf32>
    %cst_67 = arith.constant dense<0xFF800000> : vector<64xf32>
    %180 = vector.multi_reduction <maximumf>, %179, %cst_67 [1] : vector<64x32xf32> to vector<64xf32>
    %181 = vector.shape_cast %180 : vector<64xf32> to vector<64x1xf32>
    %182 = vector.broadcast %175 : vector<1x32xf32> to vector<64x32xf32>
    %183 = vector.broadcast %181 : vector<64x1xf32> to vector<64x32xf32>
    %184 = arith.subf %182, %183 : vector<64x32xf32>
    %cst_68 = arith.constant -1.000000e+30 : f32
    %185 = vector.broadcast %cst_68 : f32 to vector<64x32xf32>
    %186 = arith.select %24, %184, %185 : vector<64x32xi1>, vector<64x32xf32>
    %187 = math.exp %186 : vector<64x32xf32>
    %188 = arith.mulf %22, %187 : vector<64x32xf32>
    %cst_69 = arith.constant dense<0.000000e+00> : vector<64xf32>
    %189 = vector.multi_reduction <add>, %188, %cst_69 [1] : vector<64x32xf32> to vector<64xf32>
    %190 = vector.shape_cast %189 : vector<64xf32> to vector<64x1xf32>
    %cst_70 = arith.constant 0.000000e+00 : f32
    %191 = vector.broadcast %cst_70 : f32 to vector<64x1xf32>
    %192 = arith.cmpf ogt, %190, %191 : vector<64x1xf32>
    %cst_71 = arith.constant 1.000000e+00 : f32
    %193 = vector.broadcast %cst_71 : f32 to vector<64x1xf32>
    %194 = arith.select %192, %190, %193 : vector<64x1xi1>, vector<64x1xf32>
    %cst_72 = arith.constant 0.000000e+00 : f32
    %195 = vector.broadcast %cst_72 : f32 to vector<64x1xf32>
    %196 = arith.cmpf ogt, %190, %195 : vector<64x1xf32>
    %197 = tpu.reciprocal %194 {approx = true} : vector<64x1xf32> -> vector<64x1xf32>
    %cst_73 = arith.constant 0.000000e+00 : f32
    %198 = vector.broadcast %cst_73 : f32 to vector<64x1xf32>
    %199 = arith.select %196, %197, %198 : vector<64x1xi1>, vector<64x1xf32>
    %200 = vector.extract_strided_slice %6 {offsets = [0, 80], sizes = [32, 16], strides = [1, 1]} : vector<32x128xbf16> to vector<32x16xbf16>
    %201 = arith.truncf %188 : vector<64x32xf32> to vector<64x32xbf16>
    %cst_74 = arith.constant dense<0.000000e+00> : vector<64x16xf32>
    %202 = tpu.matmul %201, %200, %cst_74 {dimension_numbers = #tpu.dot_dimension_numbers<[1], [0], [0], [1], [0, 0, 1, 1], [], []>} : vector<64x32xbf16>, vector<32x16xbf16>, vector<64x16xf32> -> vector<64x16xf32>
    %203 = vector.broadcast %199 : vector<64x1xf32> to vector<64x16xf32>
    %204 = arith.mulf %202, %203 : vector<64x16xf32>
    %205 = vector.extract_strided_slice %20 {offsets = [6, 0], sizes = [1, 32], strides = [1, 1]} : vector<8x32xf32> to vector<1x32xf32>
    %cst_75 = arith.constant -1.000000e+30 : f32
    %206 = vector.shape_cast %205 : vector<1x32xf32> to vector<1x32xf32>
    %207 = vector.broadcast %206 : vector<1x32xf32> to vector<64x32xf32>
    %208 = vector.broadcast %cst_75 : f32 to vector<64x32xf32>
    %209 = arith.select %24, %207, %208 : vector<64x32xi1>, vector<64x32xf32>
    %cst_76 = arith.constant dense<0xFF800000> : vector<64xf32>
    %210 = vector.multi_reduction <maximumf>, %209, %cst_76 [1] : vector<64x32xf32> to vector<64xf32>
    %211 = vector.shape_cast %210 : vector<64xf32> to vector<64x1xf32>
    %212 = vector.broadcast %205 : vector<1x32xf32> to vector<64x32xf32>
    %213 = vector.broadcast %211 : vector<64x1xf32> to vector<64x32xf32>
    %214 = arith.subf %212, %213 : vector<64x32xf32>
    %cst_77 = arith.constant -1.000000e+30 : f32
    %215 = vector.broadcast %cst_77 : f32 to vector<64x32xf32>
    %216 = arith.select %24, %214, %215 : vector<64x32xi1>, vector<64x32xf32>
    %217 = math.exp %216 : vector<64x32xf32>
    %218 = arith.mulf %22, %217 : vector<64x32xf32>
    %cst_78 = arith.constant dense<0.000000e+00> : vector<64xf32>
    %219 = vector.multi_reduction <add>, %218, %cst_78 [1] : vector<64x32xf32> to vector<64xf32>
    %220 = vector.shape_cast %219 : vector<64xf32> to vector<64x1xf32>
    %cst_79 = arith.constant 0.000000e+00 : f32
    %221 = vector.broadcast %cst_79 : f32 to vector<64x1xf32>
    %222 = arith.cmpf ogt, %220, %221 : vector<64x1xf32>
    %cst_80 = arith.constant 1.000000e+00 : f32
    %223 = vector.broadcast %cst_80 : f32 to vector<64x1xf32>
    %224 = arith.select %222, %220, %223 : vector<64x1xi1>, vector<64x1xf32>
    %cst_81 = arith.constant 0.000000e+00 : f32
    %225 = vector.broadcast %cst_81 : f32 to vector<64x1xf32>
    %226 = arith.cmpf ogt, %220, %225 : vector<64x1xf32>
    %227 = tpu.reciprocal %224 {approx = true} : vector<64x1xf32> -> vector<64x1xf32>
    %cst_82 = arith.constant 0.000000e+00 : f32
    %228 = vector.broadcast %cst_82 : f32 to vector<64x1xf32>
    %229 = arith.select %226, %227, %228 : vector<64x1xi1>, vector<64x1xf32>
    %230 = vector.extract_strided_slice %6 {offsets = [0, 96], sizes = [32, 16], strides = [1, 1]} : vector<32x128xbf16> to vector<32x16xbf16>
    %231 = arith.truncf %218 : vector<64x32xf32> to vector<64x32xbf16>
    %cst_83 = arith.constant dense<0.000000e+00> : vector<64x16xf32>
    %232 = tpu.matmul %231, %230, %cst_83 {dimension_numbers = #tpu.dot_dimension_numbers<[1], [0], [0], [1], [0, 0, 1, 1], [], []>} : vector<64x32xbf16>, vector<32x16xbf16>, vector<64x16xf32> -> vector<64x16xf32>
    %233 = vector.broadcast %229 : vector<64x1xf32> to vector<64x16xf32>
    %234 = arith.mulf %232, %233 : vector<64x16xf32>
    %235 = vector.extract_strided_slice %20 {offsets = [7, 0], sizes = [1, 32], strides = [1, 1]} : vector<8x32xf32> to vector<1x32xf32>
    %cst_84 = arith.constant -1.000000e+30 : f32
    %236 = vector.shape_cast %235 : vector<1x32xf32> to vector<1x32xf32>
    %237 = vector.broadcast %236 : vector<1x32xf32> to vector<64x32xf32>
    %238 = vector.broadcast %cst_84 : f32 to vector<64x32xf32>
    %239 = arith.select %24, %237, %238 : vector<64x32xi1>, vector<64x32xf32>
    %cst_85 = arith.constant dense<0xFF800000> : vector<64xf32>
    %240 = vector.multi_reduction <maximumf>, %239, %cst_85 [1] : vector<64x32xf32> to vector<64xf32>
    %241 = vector.shape_cast %240 : vector<64xf32> to vector<64x1xf32>
    %242 = vector.broadcast %235 : vector<1x32xf32> to vector<64x32xf32>
    %243 = vector.broadcast %241 : vector<64x1xf32> to vector<64x32xf32>
    %244 = arith.subf %242, %243 : vector<64x32xf32>
    %cst_86 = arith.constant -1.000000e+30 : f32
    %245 = vector.broadcast %cst_86 : f32 to vector<64x32xf32>
    %246 = arith.select %24, %244, %245 : vector<64x32xi1>, vector<64x32xf32>
    %247 = math.exp %246 : vector<64x32xf32>
    %248 = arith.mulf %22, %247 : vector<64x32xf32>
    %cst_87 = arith.constant dense<0.000000e+00> : vector<64xf32>
    %249 = vector.multi_reduction <add>, %248, %cst_87 [1] : vector<64x32xf32> to vector<64xf32>
    %250 = vector.shape_cast %249 : vector<64xf32> to vector<64x1xf32>
    %cst_88 = arith.constant 0.000000e+00 : f32
    %251 = vector.broadcast %cst_88 : f32 to vector<64x1xf32>
    %252 = arith.cmpf ogt, %250, %251 : vector<64x1xf32>
    %cst_89 = arith.constant 1.000000e+00 : f32
    %253 = vector.broadcast %cst_89 : f32 to vector<64x1xf32>
    %254 = arith.select %252, %250, %253 : vector<64x1xi1>, vector<64x1xf32>
    %cst_90 = arith.constant 0.000000e+00 : f32
    %255 = vector.broadcast %cst_90 : f32 to vector<64x1xf32>
    %256 = arith.cmpf ogt, %250, %255 : vector<64x1xf32>
    %257 = tpu.reciprocal %254 {approx = true} : vector<64x1xf32> -> vector<64x1xf32>
    %cst_91 = arith.constant 0.000000e+00 : f32
    %258 = vector.broadcast %cst_91 : f32 to vector<64x1xf32>
    %259 = arith.select %256, %257, %258 : vector<64x1xi1>, vector<64x1xf32>
    %260 = vector.extract_strided_slice %6 {offsets = [0, 112], sizes = [32, 16], strides = [1, 1]} : vector<32x128xbf16> to vector<32x16xbf16>
    %261 = arith.truncf %248 : vector<64x32xf32> to vector<64x32xbf16>
    %cst_92 = arith.constant dense<0.000000e+00> : vector<64x16xf32>
    %262 = tpu.matmul %261, %260, %cst_92 {dimension_numbers = #tpu.dot_dimension_numbers<[1], [0], [0], [1], [0, 0, 1, 1], [], []>} : vector<64x32xbf16>, vector<32x16xbf16>, vector<64x16xf32> -> vector<64x16xf32>
    %263 = vector.broadcast %259 : vector<64x1xf32> to vector<64x16xf32>
    %264 = arith.mulf %262, %263 : vector<64x16xf32>
    %265 = tpu.concatenate %54, %84, %114, %144, %174, %204, %234, %264 in 1 : vector<64x16xf32>, vector<64x16xf32>, vector<64x16xf32>, vector<64x16xf32>, vector<64x16xf32>, vector<64x16xf32>, vector<64x16xf32>, vector<64x16xf32> -> vector<64x128xf32>
    %266 = arith.mulf %265, %265 : vector<64x128xf32>
    %cst_93 = arith.constant dense<0.000000e+00> : vector<64xf32>
    %267 = vector.multi_reduction <add>, %266, %cst_93 [1] : vector<64x128xf32> to vector<64xf32>
    %268 = vector.shape_cast %267 : vector<64xf32> to vector<64x1xf32>
    %cst_94 = arith.constant 0.000000e+00 : f32
    %269 = vector.broadcast %cst_94 : f32 to vector<64x1xf32>
    %270 = arith.cmpf ogt, %268, %269 : vector<64x1xf32>
    %cst_95 = arith.constant 1.000000e+00 : f32
    %271 = vector.broadcast %cst_95 : f32 to vector<64x1xf32>
    %272 = arith.select %270, %268, %271 : vector<64x1xi1>, vector<64x1xf32>
    %cst_96 = arith.constant 0.000000e+00 : f32
    %273 = vector.broadcast %cst_96 : f32 to vector<64x1xf32>
    %274 = arith.cmpf ogt, %268, %273 : vector<64x1xf32>
    %275 = math.rsqrt %272 : vector<64x1xf32>
    %cst_97 = arith.constant 0.000000e+00 : f32
    %276 = vector.broadcast %cst_97 : f32 to vector<64x1xf32>
    %277 = arith.select %274, %275, %276 : vector<64x1xi1>, vector<64x1xf32>
    %278 = vector.broadcast %277 : vector<64x1xf32> to vector<64x128xf32>
    %279 = arith.mulf %265, %278 : vector<64x128xf32>
    %c0_98 = arith.constant 0 : index
    %c0_99 = arith.constant 0 : index
    %280 = vector.load %arg8[%c0_98, %c0_99] : memref<64x128xf32, #tpu.memory_space<vmem>>, vector<64x128xf32>
    tpu.vector_store %arg8[%c0_98, %c0_99], %279 {strides = array<i32>} : memref<64x128xf32, #tpu.memory_space<vmem>>, vector<64x128xf32>,
    return
  }
  func.func @transform_0(%arg0: i32) -> (i32, i32) {
    %c0_i32 = arith.constant 0 : i32
    %c0_i32_0 = arith.constant 0 : i32
    %c0_i32_1 = arith.constant 0 : i32
    return %c0_i32, %c0_i32_0 : i32, i32
  }
  func.func @transform_1(%arg0: i32) -> (i32, i32) {
    %c0_i32 = arith.constant 0 : i32
    %c0_i32_0 = arith.constant 0 : i32
    %c0_i32_1 = arith.constant 0 : i32
    return %c0_i32, %c0_i32_0 : i32, i32
  }
  func.func @transform_2(%arg0: i32) -> (i32, i32) {
    %c0_i32 = arith.constant 0 : i32
    %c0_i32_0 = arith.constant 0 : i32
    %c0_i32_1 = arith.constant 0 : i32
    return %c0_i32, %c0_i32_0 : i32, i32
  }
  func.func @transform_3(%arg0: i32) -> (i32, i32) {
    %c0_i32 = arith.constant 0 : i32
    %c0_i32_0 = arith.constant 0 : i32
    %c0_i32_1 = arith.constant 0 : i32
    return %c0_i32, %c0_i32_0 : i32, i32
  }
  func.func @transform_4(%arg0: i32) -> (i32, i32) {
    %c0_i32 = arith.constant 0 : i32
    %c0_i32_0 = arith.constant 0 : i32
    %c0_i32_1 = arith.constant 0 : i32
    return %c0_i32, %c0_i32_0 : i32, i32
  }
  func.func @transform_5(%arg0: i32) -> (i32, i32) {
    %c0_i32 = arith.constant 0 : i32
    %c0_i32_0 = arith.constant 0 : i32
    %c0_i32_1 = arith.constant 0 : i32
    return %c0_i32, %c0_i32_0 : i32, i32
  }
  func.func @transform_6(%arg0: i32) -> (i32, i32) {
    %c0_i32 = arith.constant 0 : i32
    %c0_i32_0 = arith.constant 0 : i32
    %c0_i32_1 = arith.constant 0 : i32
    return %c0_i32, %c0_i32_0 : i32, i32
  }
  func.func @transform_7(%arg0: i32) -> (i32, i32) {
    %c0_i32 = arith.constant 0 : i32
    %c0_i32_0 = arith.constant 0 : i32
    %c0_i32_1 = arith.constant 0 : i32
    return %c0_i32, %c0_i32_0 : i32, i32
  }
}

</mosaic_0001>

<bundles_post_ra>
// kernel: tpu_custom_call.1
= control target key start
LH: loop header
LB: loop body
LE: loop exit
PB: predicated region body
PF: predicated region fallthrough
CT: control target
= control target key end

     0   :  { %vm5064_vm0 = vcmask 261120   ;;  %v3163_v6 = vmov 0.0   ;;  %s5055_s0 = inlined_call_operand.vmem [shape: bf16[64,32], index: 0, kind: input, shape index: {}]   ;;  %s5056_s1 = inlined_call_operand.vmem [shape: bf16[32,64], index: 1, kind: input, shape index: {}]   ;;  %s5057_s2 = inlined_call_operand.vmem [shape: bf16[32,128], index: 2, kind: input, shape index: {}]   ;;  %s5058_s3 = inlined_call_operand.vmem [shape: bf16[8,32], index: 3, kind: input, shape index: {}]   ;;  %s5059_s4 = inlined_call_operand.vmem [shape: bf16[64,32], index: 4, kind: input, shape index: {}]   ;;  %s5060_s5 = inlined_call_operand.vmem [shape: bf16[32,64], index: 5, kind: input, shape index: {}]   ;;  %s5061_s6 = inlined_call_operand.vmem [shape: f32[1,32], index: 6, kind: input, shape index: {}]   ;;  %s5062_s7 = inlined_call_operand.hbm [shape: f32[64,128], index: 7, kind: output, shape index: {}]  }
   0x1   :  { %v2849_v0 = vld [vmem:[%s5057_s2] sm:$0xff]   ;;  %v2850_v1 = vld [vmem:[%s5057_s2 + $0x8] sm:$0xff]   ;;  %v2853_v4 = vld [vmem:[%s5055_s0 + $0x10] sm:$0xff]  }
   0x2   :  { %2697 = vmatprep.subr.bf16.mxu0 %v2849_v0  ;;  %v2851_v2 = vld [vmem:[%s5055_s0] sm:$0xff]   ;;  %v2852_v3 = vld [vmem:[%s5055_s0 + $0x8] sm:$0xff]  }
   0x3   :  { %2698 = vmatpush3.bf16.msra.mxu0 %v2849_v0  ;;  %2701 = vmatprep.mubr.msk.bf16.mxu0 %vm5064_vm0, %v2851_v2  ;;  %v2855_v5 = vld [vmem:[%s5056_s1] sm:$0xff]  }
   0x4   :  { %2699 = vmatprep.subr.bf16.mxu0 %v2850_v1 }
   0x7   :  { %2700 = vmatpush3.bf16.msra.mxu0 %v2850_v1 }
   0x8   :  { %2721 = vmatprep.subr.bf16.mxu0 %v3163_v6 }
   0x9   :  { %12 = vsyncpa [#allocation3], 0  ;;  %v2856_v7 = vld [vmem:[%s5056_s1 + $0x8] sm:$0xff]   ;;  %v2854_v8 = vld [vmem:[%s5055_s0 + $0x18] sm:$0xff]   ;;  %vm3164_vm1 = vmmov 0   ;;  %vm5063_vm2 = vcmask 523264   ;;  %v389_v39 = vlaneseq }
   0xa   :  { %2702 = vmatmul.mubr.msk.bf16.vlgmr.msra.gmra.mrb[0].mxu0 %vm5064_vm0, %v2852_v3  ;;  %v226_v9 = vld [vmem:[%s5058_s3] sm:$0xf]  ;;  %v2858_v26 = vld [vmem:[%s5060_s5 + $0x8] sm:$0xff]   ;;  %v3271_v30 = vld [vmem:[%s5059_s4 + $0x10] sm:$0xff]   ;;  %s3165_s26 = smov 112   ;;  %s3167_s27 = smov 80  }
   0xb   :  { %2705 = vmatprep.mubr.msk.bf16.mxu0 %vm5064_vm0, %v2853_v4  ;;  %2722 = vmatpush3.bf16.msra.mxu0 %v2855_v5  ;;  %v2857_v10 = vld [vmem:[%s5060_s5] sm:$0xff]   ;;  %v3263_v29 = vld [vmem:[%s5059_s4 + $0x8] sm:$0xff]   ;;  %v3277_v31 = vld [vmem:[%s5059_s4 + $0x18] sm:$0xff]   ;;  %s3168_s28 = smov 64   ;;  %v3300_v43 = vshrl.u32 %v389_v39, 7  ;;  %s3169_s8 = smov 32   ;;  %v3334_v58 = vunpack.c.l.bf16 %v3271_v30 }
   0xc   :  { %2723 = vmatprep.subr.bf16.mxu0 %v3163_v6  ;;  %2717 = vmatprep.mubr.msk.bf16.mxu1 %vm5063_vm2, %v2857_v10  ;;  %v3255_v23 = vld [vmem:[%s5059_s4] sm:$0xff]   ;;  %s3166_s4 = smov 96   ;;  %s3171_s9 = smov 16   ;;  %v3342_v61 = vunpack.c.l.bf16 %v3277_v31  ;;  %v3358_v4 = vunpack.c.l.bf16 %v3263_v29 }
   0xd   :  { %v2596_v40 = vld [vmem:[%s5061_s6] ss:$0 sm:$0xff]  ;;  %v1749_v47 = vsub.s32 6, %v3300_v43  ;;  %v1976_v48 = vsub.s32 7, %v3300_v43  ;;  %s3170_s6 = smov 48   ;;  %v391_v53 = vsub.s32 0, %v3300_v43  ;;  %v3320_v54 = vunpack.c.l.bf16 %v3255_v23 }
   0xe   :  { %v3326_v56 = vunpack.c.h.bf16 %v3255_v23  ;;  %vm385_vm6 = vcmp.gt.f32.partialorder %v3334_v58, 0.0  ;;  %v612_v63 = vsub.s32 1, %v3300_v43  ;;  %vm387_vm7 = vcmp.gt.f32.partialorder %v3342_v61, 0.0  ;;  %s3172_s10 = smov [#allocation2]  }
   0xf   :  { %2724 = vmatpush3.bf16.msra.mxu0 %v2856_v7  ;;  %vm381_vm4 = vcmp.gt.f32.partialorder %v3320_v54, 0.0  ;;  %v3365_v7 = vunpack.c.h.bf16 %v3263_v29  ;;  %vm383_vm8 = vcmp.gt.f32.partialorder %v3358_v4, 0.0  ;;  %s2563_s2 = sshll.u32 %s3172_s10, 4  ;;  %s2564_s2 = int_to_ptr.vmem [resolvable:$true] %s2563_s2 }
  0x10   :  { %vm382_vm5 = vcmp.gt.f32.partialorder %v3326_v56, 0.0  ;;  %s3139_s11 = scalar_lea.vmem %s2564_s2, 1024  ;;  %p3144_p1 = scmp.lt.s32.totalorder %s2564_s2, %s2564_s2 }
  0x11   :  { %vm384_vm9 = vcmp.gt.f32.partialorder %v3365_v7, 0.0  ;;  %p3140_p0 = scmp.ne.s32.totalorder %s2564_s2, %s3139_s11  ;;  %p3145_p2 = scmp.lt.s32.totalorder %s3139_s11, %s3139_s11 }
  0x12   :  { %2706 = vmatmul.mubr.msk.bf16.gmra.mrb[4].mxu0 %vm5064_vm0, %v2854_v8 }
  0x13   :  { %2725 = vmatprep.mubr.msk.bf16.mxu0 %vm3164_vm1, %v3163_v6  ;;  %p3146_p3 = por %p3145_p2, %p3144_p1 }
  0x15   :  { %p3147_p4 = pnand %p3146_p3, %p3140_p0 }
  0x1a   :  { %2726 = vmatmul.mubr.msk.bf16.vlgmr.msra.gmra.mrb[8].mxu0 %vm5064_vm0, %v226_v9 }
  0xdd   :  { %v2703_v11 = vpop.f32.mrb[0].mxu0 }
  0xde   :  { %v119_v12 = vpop.f32.mrb[1].mxu0 }
  0xdf   :  { %v2704_v13 = vpop.f32.mrb[2].mxu0 }
  0xe0   :  { %v155_v14 = vpack.c.bf16 %v2704_v13, %v2703_v11  ;;  %v122_v15 = vpop.f32.mrb[3].mxu0  ;;  %v3377_v11 = vunpack.c.h.bf16 %v3271_v30 }
  0xe1   :  { %v154_v16 = vpack.c.bf16 %v122_v15, %v119_v12 }
  0xe2   :  { %vm386_vm10 = vcmp.gt.f32.partialorder %v3377_v11, 0.0 }
  0xe3   :  { %2709 = vmatprep.subr.bf16.mxu1 %v154_v16 }
  0xe4   :  { %2710 = vmatpush3.bf16.msra.mxu1 %v154_v16 }
  0xe5   :  { %v2707_v17 = vpop.f32.mrb[4].mxu0  ;;  %2711 = vmatprep.subr.bf16.mxu1 %v155_v14 }
  0xe6   :  { %v135_v18 = vpop.f32.mrb[5].mxu0 }
  0xe7   :  { %v2708_v19 = vpop.f32.mrb[6].mxu0 }
  0xe8   :  { %v157_v20 = vpack.c.bf16 %v2708_v19, %v2707_v17  ;;  %v138_v21 = vpop.f32.mrb[7].mxu0  ;;  %2712 = vmatpush3.bf16.msra.mxu1 %v155_v14  ;;  %v1068_v14 = vsub.s32 3, %v3300_v43  ;;  %v3390_v17 = vunpack.c.h.bf16 %v3277_v31 }
  0xe9   :  { %v156_v22 = vpack.c.bf16 %v138_v21, %v135_v18 }
  0xea   :  { %vm388_vm11 = vcmp.gt.f32.partialorder %v3390_v17, 0.0 }
  0xeb   :  { %2713 = vmatprep.subr.bf16.mxu1 %v156_v22 }
  0xec   :  { %2714 = vmatpush3.bf16.msra.mxu1 %v156_v22 }
  0xed   :  { %2715 = vmatprep.subr.bf16.mxu1 %v157_v20  ;;  %v280_v24 = vpop.f32.mrb[8].mxu0 }
  0xee   :  { %v2727_v25 = vpop.f32.mrb[9].mxu0  ;;  %v286_v32 = vpack.c.bf16 %v280_v24, %v280_v24 }
  0xef   :  { %v283_v27 = vpop.f32.mrb[10].mxu0  ;;  %v1295_v25 = vsub.s32 4, %v3300_v43 }
  0xf0   :  { %2716 = vmatpush3.bf16.msra.mxu1 %v157_v20  ;;  %v2728_v28 = vpop.f32.mrb[11].mxu0 }
  0xf1   :  { %2729 = vmatprep.subr.bf16.mxu1 %v3163_v6 }
  0xf3   :  { %2718 = vmatmul.mubr.msk.bf16.vlgmr.msra.gmra.mrb[0].mxu1 %vm5063_vm2, %v2858_v26 }
  0xf4   :  { %2730 = vmatpush3.bf16.msra.mxu1 %v3255_v23  ;;  %2737 = vmatprep.mubr.msk.bf16.mxu1 %vm3164_vm1, %v3163_v6 }
  0xf5   :  { %2731 = vmatprep.subr.bf16.mxu1 %v3163_v6 }
  0xf8   :  { %2732 = vmatpush3.bf16.msra.mxu1 %v3263_v29 }
  0xf9   :  { %2733 = vmatprep.subr.bf16.mxu1 %v3163_v6 }
  0xfc   :  { %2734 = vmatpush3.bf16.msra.mxu1 %v3271_v30 }
  0xfd   :  { %2735 = vmatprep.subr.bf16.mxu1 %v3163_v6 }
 0x100   :  { %2736 = vmatpush3.bf16.msra.mxu1 %v3277_v31 }
 0x103   :  { %2738 = vmatmul.mubr.msk.bf16.vlgmr.msra.gmra.mrb[4].mxu1 %vm5063_vm2, %v286_v32 }
 0x1c6   :  { %v2719_v33 = vpop.f32.mrb[0].mxu1 }
 0x1c7   :  { %v209_v34 = vpop.f32.mrb[1].mxu1 }
 0x1c8   :  { %v2720_v35 = vpop.f32.mrb[2].mxu1 }
 0x1c9   :  { %v3282_v36 = vpack.c.bf16 %v2720_v35, %v2719_v33  ;;  %v212_v37 = vpop.f32.mrb[3].mxu1 }
 0x1ca   :  { %v224_v38 = vpack.c.bf16 %v212_v37, %v209_v34 }
 0x1cb   :  { %750 = vrot.lane.b32.xlu1 %v3282_v36, %s3165_s26 }
 0x1cc   :  { %748 = vrot.lane.b32.xlu0 %v224_v38, %s3165_s26  ;;  %2741 = vmatprep.subr.bf16.mxu0 %v224_v38 }
 0x1cd   :  { %2742 = vmatpush3.bf16.msra.mxu0 %v224_v38 }
 0x1ce   :  { %2743 = vmatprep.subr.bf16.mxu0 %v3282_v36 }
 0x1cf   :  { %977 = vrot.lane.b32.xlu1 %v3282_v36, %s3166_s4 }
 0x1d0   :  { %975 = vrot.lane.b32.xlu0 %v224_v38, %s3166_s4 }
 0x1d1   :  { %2744 = vmatpush3.bf16.msra.mxu0 %v3282_v36 }
 0x1d3   :  { %1204 = vrot.lane.b32.xlu1 %v3282_v36, %s3167_s27 }
 0x1d4   :  { %1429 = vrot.lane.b32.xlu0 %v224_v38, %s3168_s28 }
 0x1d6   :  { %v356_v41 = vpop.f32.mrb[4].mxu1 }
 0x1d7   :  { %1431 = vrot.lane.b32.xlu1 %v3282_v36, %s3168_s28  ;;  %v369_v42 = vmul.f32 %v2596_v40, %v356_v41  ;;  %v2739_v44 = vpop.f32.mrb[5].mxu1  ;;  %v841_v40 = vsub.s32 2, %v3300_v43 }
 0x1d8   :  { %1883 = vrot.lane.b32.xlu0 %v224_v38, %s3169_s8  ;;  %v359_v45 = vpop.f32.mrb[6].mxu1 }
 0x1d9   :  { %vm370_vm3 = vcmp.gt.f32.partialorder %v369_v42, 0.0  ;;  %v371_v46 = vmul.f32 0.2, %v369_v42  ;;  %v2740_v49 = vpop.f32.mrb[7].mxu1 }
 0x1db   :  { %1658 = vrot.lane.b32.xlu1 %v3282_v36, %s3170_s6  ;;  %v3307_v50 = vsel %vm370_vm3, %v369_v42, %v371_v46 }
 0x1dc   :  { %v3310_v51 = vrot.slane %v3307_v50, %v1749_v47  ;;  %v3313_v52 = vrot.slane %v3307_v50, %v1976_v48  ;;  %v3323_v55 = vrot.slane %v3307_v50, %v391_v53  ;;  %v3352_v2 = vrot.slane %v3307_v50, %v612_v63 }
 0x1dd   :  { %v3395_v20 = vrot.slane %v3307_v50, %v1068_v14  ;;  %v3416_v30 = vrot.slane %v3307_v50, %v1295_v25  ;;  %v3444_v46 = vrot.slane %v3307_v50, %v841_v40  ;;  %v1522_v47 = vsub.s32 5, %v3300_v43 }
 0x1de   :  { %v393_v57 = vsel %vm381_vm4, %v3323_v55, -1e+30  ;;  %v394_v60 = vsel %vm382_vm5, %v3323_v55, -1e+30  ;;  %v397_v0 = vsel %vm385_vm6, %v3323_v55, -1e+30 }
 0x1df   :  { %1202 = vrot.lane.b32.xlu1 %v224_v38, %s3167_s27  ;;  %v401_v59 = vsel %vm5064_vm0, %v393_v57, -inf  ;;  %v404_v62 = vsel %vm5064_vm0, %v394_v60, -inf  ;;  %v413_v1 = vsel %vm5064_vm0, %v397_v0, -inf  ;;  %v399_v3 = vsel %vm387_vm7, %v3323_v55, -1e+30 }
 0x1e0   :  { %v419_v5 = vsel %vm5064_vm0, %v399_v3, -inf  ;;  %v614_v6 = vsel %vm381_vm4, %v3352_v2, -1e+30  ;;  %v395_v9 = vsel %vm383_vm8, %v3323_v55, -1e+30 }
 0x1e1   :  { %v622_v8 = vsel %vm5064_vm0, %v614_v6, -inf  ;;  %v616_v10 = vsel %vm383_vm8, %v3352_v2, -1e+30  ;;  %v407_v12 = vsel %vm5064_vm0, %v395_v9, -inf  ;;  %v396_v15 = vsel %vm384_vm9, %v3323_v55, -1e+30 }
 0x1e2   :  { %v628_v13 = vsel %vm5064_vm0, %v616_v10, -inf  ;;  %v618_v16 = vsel %vm385_vm6, %v3352_v2, -1e+30  ;;  %v410_v18 = vsel %vm5064_vm0, %v396_v15, -inf  ;;  %v398_v21 = vsel %vm386_vm10, %v3323_v55, -1e+30 }
 0x1e3   :  { %1656 = vrot.lane.b32.xlu1 %v224_v38, %s3170_s6  ;;  %v634_v19 = vsel %vm5064_vm0, %v618_v16, -inf  ;;  %v620_v22 = vsel %vm387_vm7, %v3352_v2, -1e+30  ;;  %v416_v23 = vsel %vm5064_vm0, %v398_v21, -inf  ;;  %v400_v26 = vsel %vm388_vm11, %v3323_v55, -1e+30 }
 0x1e4   :  { %v640_v24 = vsel %vm5064_vm0, %v620_v22, -inf  ;;  %v1072_v27 = vsel %vm383_vm8, %v3395_v20, -1e+30  ;;  %v422_v28 = vsel %vm5064_vm0, %v400_v26, -inf  ;;  %v615_v31 = vsel %vm382_vm5, %v3352_v2, -1e+30 }
 0x1e5   :  { %v1084_v29 = vsel %vm5064_vm0, %v1072_v27, -inf  ;;  %v1077_v32 = vsel %vm388_vm11, %v3395_v20, -1e+30  ;;  %v625_v33 = vsel %vm5064_vm0, %v615_v31, -inf  ;;  %v617_v35 = vsel %vm384_vm9, %v3352_v2, -1e+30 }
 0x1e6   :  { %v1099_v34 = vsel %vm5064_vm0, %v1077_v32, -inf  ;;  %v1297_v37 = vsel %vm381_vm4, %v3416_v30, -1e+30  ;;  %v619_v41 = vsel %vm386_vm10, %v3352_v2, -1e+30 }
 0x1e7   :  { %2110 = vrot.lane.b32.xlu1 %v224_v38, %s3171_s9  ;;  %v631_v38 = vsel %vm5064_vm0, %v617_v35, -inf  ;;  %v1305_v39 = vsel %vm5064_vm0, %v1297_v37, -inf  ;;  %v1298_v42 = vsel %vm382_vm5, %v3416_v30, -1e+30  ;;  %v637_v44 = vsel %vm5064_vm0, %v619_v41, -inf }
 0x1e8   :  { %v1308_v45 = vsel %vm5064_vm0, %v1298_v42, -inf  ;;  %v621_v48 = vsel %vm388_vm11, %v3352_v2, -1e+30  ;;  %v1299_v49 = vsel %vm383_vm8, %v3416_v30, -1e+30 }
 0x1e9   :  { %v643_v53 = vsel %vm5064_vm0, %v621_v48, -inf  ;;  %v1311_v57 = vsel %vm5064_vm0, %v1299_v49, -inf  ;;  %v843_v43 = vsel %vm381_vm4, %v3444_v46, -1e+30  ;;  %v1300_v60 = vsel %vm384_vm9, %v3416_v30, -1e+30 }
 0x1ea   :  { %v1314_v63 = vsel %vm5064_vm0, %v1300_v60, -inf  ;;  %v846_v10 = vsel %vm384_vm9, %v3444_v46, -1e+30  ;;  %v1070_v15 = vsel %vm381_vm4, %v3395_v20, -1e+30 }
 0x1eb   :  { %v1301_v16 = vsel %vm385_vm6, %v3416_v30, -1e+30  ;;  %v1071_v21 = vsel %vm382_vm5, %v3395_v20, -1e+30  ;;  %v1302_v22 = vsel %vm386_vm10, %v3416_v30, -1e+30 }
 0x1ec   :  { %v1081_v25 = vsel %vm5064_vm0, %v1071_v21, -inf  ;;  %v1320_v26 = vsel %vm5064_vm0, %v1302_v22, -inf  ;;  %v1073_v27 = vsel %vm384_vm9, %v3395_v20, -1e+30  ;;  %v1304_v35 = vsel %vm388_vm11, %v3416_v30, -1e+30 }
 0x1ed   :  { %v1087_v32 = vsel %vm5064_vm0, %v1073_v27, -inf  ;;  %v848_v40 = vsel %vm386_vm10, %v3444_v46, -1e+30  ;;  %v1755_v27 = vsel %vm385_vm6, %v3310_v51, -1e+30 }
 0x1f7   :  { %402 = vmax.xlane.f32.xlu0 %v401_v59  ;;  %v3456_v59 = vrot.slane %v3307_v50, %v1522_v47  ;;  %v844_v50 = vsel %vm382_vm5, %v3444_v46, -1e+30  ;;  %v849_v47 = vsel %vm387_vm7, %v3444_v46, -1e+30 }
 0x1f9   :  { %v1524_v0 = vsel %vm381_vm4, %v3456_v59, -1e+30  ;;  %v1526_v6 = vsel %vm383_vm8, %v3456_v59, -1e+30  ;;  %v1528_v41 = vsel %vm385_vm6, %v3456_v59, -1e+30 }
 0x1fa   :  { %v1532_v3 = vsel %vm5064_vm0, %v1524_v0, -inf  ;;  %v1538_v9 = vsel %vm5064_vm0, %v1526_v6, -inf  ;;  %v1529_v48 = vsel %vm386_vm10, %v3456_v59, -1e+30  ;;  %v1530_v60 = vsel %vm387_vm7, %v3456_v59, -1e+30 }
 0x1fb   :  { %405 = vmax.xlane.f32.xlu0 %v404_v62  ;;  %v851_v62 = vsel %vm5064_vm0, %v843_v43, -inf  ;;  %v850_v43 = vsel %vm388_vm11, %v3444_v46, -1e+30  ;;  %v1074_v0 = vsel %vm385_vm6, %v3395_v20, -1e+30 }
 0x1fc   :  { %v1075_v6 = vsel %vm386_vm10, %v3395_v20, -1e+30  ;;  %v1531_v22 = vsel %vm388_vm11, %v3456_v59, -1e+30 }
 0x1ff   :  { %414 = vmax.xlane.f32.xlu0 %v413_v1  ;;  %v854_v1 = vsel %vm5064_vm0, %v844_v50, -inf  ;;  %v1550_v50 = vsel %vm5064_vm0, %v1530_v60, -inf }
 0x203   :  { %420 = vmax.xlane.f32.xlu0 %v419_v5  ;;  %v845_v5 = vsel %vm383_vm8, %v3444_v46, -1e+30 }
 0x207   :  { %623 = vmax.xlane.f32.xlu0 %v622_v8  ;;  %v857_v8 = vsel %vm5064_vm0, %v845_v5, -inf }
 0x20b   :  { %408 = vmax.xlane.f32.xlu1 %v407_v12  ;;  %629 = vmax.xlane.f32.xlu0 %v628_v13  ;;  %v1527_v12 = vsel %vm384_vm9, %v3456_v59, -1e+30  ;;  %v860_v13 = vsel %vm5064_vm0, %v846_v10, -inf }
 0x20c   :  { %v1541_v14 = vsel %vm5064_vm0, %v1527_v12, -inf  ;;  %v1076_v12 = vsel %vm387_vm7, %v3395_v20, -1e+30 }
 0x20f   :  { %411 = vmax.xlane.f32.xlu1 %v410_v18  ;;  %635 = vmax.xlane.f32.xlu0 %v634_v19  ;;  %v1078_v18 = vsel %vm5064_vm0, %v1070_v15, -inf  ;;  %v1317_v19 = vsel %vm5064_vm0, %v1301_v16, -inf  ;;  %v1525_v16 = vsel %vm382_vm5, %v3456_v59, -1e+30 }
 0x213   :  { %417 = vmax.xlane.f32.xlu1 %v416_v23  ;;  %641 = vmax.xlane.f32.xlu0 %v640_v24 }
 0x217   :  { %423 = vmax.xlane.f32.xlu1 %v422_v28  ;;  %1085 = vmax.xlane.f32.xlu0 %v1084_v29  ;;  %v1303_v28 = vsel %vm387_vm7, %v3416_v30, -1e+30 }
 0x21b   :  { %626 = vmax.xlane.f32.xlu1 %v625_v33  ;;  %1100 = vmax.xlane.f32.xlu0 %v1099_v34  ;;  %v1323_v33 = vsel %vm5064_vm0, %v1303_v28, -inf  ;;  %v847_v34 = vsel %vm385_vm6, %v3444_v46, -1e+30 }
 0x21f   :  { %632 = vmax.xlane.f32.xlu1 %v631_v38  ;;  %1306 = vmax.xlane.f32.xlu0 %v1305_v39  ;;  %v863_v38 = vsel %vm5064_vm0, %v847_v34, -inf  ;;  %v1326_v39 = vsel %vm5064_vm0, %v1304_v35, -inf  ;;  %v1757_v34 = vsel %vm387_vm7, %v3310_v51, -1e+30 }
 0x223   :  { %638 = vmax.xlane.f32.xlu1 %v637_v44  ;;  %1309 = vmax.xlane.f32.xlu0 %v1308_v45  ;;  %v866_v44 = vsel %vm5064_vm0, %v848_v40, -inf  ;;  %v1544_v45 = vsel %vm5064_vm0, %v1528_v41, -inf  ;;  %v1982_v40 = vsel %vm385_vm6, %v3313_v52, -1e+30 }
 0x227   :  { %644 = vmax.xlane.f32.xlu1 %v643_v53  ;;  %1312 = vmax.xlane.f32.xlu0 %v1311_v57  ;;  %v869_v53 = vsel %vm5064_vm0, %v849_v47, -inf  ;;  %v1547_v57 = vsel %vm5064_vm0, %v1529_v48, -inf  ;;  %v1984_v47 = vsel %vm387_vm7, %v3313_v52, -1e+30 }
 0x22b   :  { %852 = vmax.xlane.f32.xlu1 %v851_v62  ;;  %1315 = vmax.xlane.f32.xlu0 %v1314_v63  ;;  %v872_v63 = vsel %vm5064_vm0, %v850_v43, -inf }
 0x22f   :  { %855 = vmax.xlane.f32.xlu1 %v854_v1  ;;  %1533 = vmax.xlane.f32.xlu0 %v1532_v3  ;;  %v1751_v1 = vsel %vm381_vm4, %v3310_v51, -1e+30  ;;  %v1090_v3 = vsel %vm5064_vm0, %v1074_v0, -inf  ;;  %v1985_v0 = vsel %vm388_vm11, %v3313_v52, -1e+30 }
 0x230   :  { %v1759_v5 = vsel %vm5064_vm0, %v1751_v1, -inf }
 0x233   :  { %858 = vmax.xlane.f32.xlu1 %v857_v8  ;;  %1539 = vmax.xlane.f32.xlu0 %v1538_v9  ;;  %v1753_v8 = vsel %vm383_vm8, %v3310_v51, -1e+30  ;;  %v1093_v9 = vsel %vm5064_vm0, %v1075_v6, -inf }
 0x234   :  { %v1765_v10 = vsel %vm5064_vm0, %v1753_v8, -inf }
 0x237   :  { %861 = vmax.xlane.f32.xlu1 %v860_v13  ;;  %1542 = vmax.xlane.f32.xlu0 %v1541_v14  ;;  %v1754_v13 = vsel %vm384_vm9, %v3310_v51, -1e+30  ;;  %v1096_v14 = vsel %vm5064_vm0, %v1076_v12, -inf }
 0x238   :  { %v1768_v15 = vsel %vm5064_vm0, %v1754_v13, -inf }
 0x23b   :  { %1079 = vmax.xlane.f32.xlu1 %v1078_v18  ;;  %1318 = vmax.xlane.f32.xlu0 %v1317_v19  ;;  %v1978_v18 = vsel %vm381_vm4, %v3313_v52, -1e+30  ;;  %v1535_v19 = vsel %vm5064_vm0, %v1525_v16, -inf }
 0x23c   :  { %v1986_v21 = vsel %vm5064_vm0, %v1978_v18, -inf }
 0x23d   :  { %v751_v23 = vpop.permute.xlu1 %750 }
 0x23e   :  { %v749_v24 = vpop.permute.xlu0 %748 }
 0x23f   :  { %1082 = vmax.xlane.f32.xlu1 %v1081_v25  ;;  %1321 = vmax.xlane.f32.xlu0 %v1320_v26  ;;  %v1752_v26 = vsel %vm382_vm5, %v3310_v51, -1e+30 }
 0x240   :  { %2753 = vmatprep.subr.bf16.mxu1 %v749_v24  ;;  %v1762_v28 = vsel %vm5064_vm0, %v1752_v26, -inf }
 0x241   :  { %2754 = vmatpush3.bf16.msra.mxu1 %v749_v24  ;;  %v3512_v29 = vpop.permute.xlu1 %977  ;;  %v1553_v24 = vsel %vm5064_vm0, %v1531_v22, -inf }
 0x242   :  { %2755 = vmatprep.subr.bf16.mxu1 %v751_v23  ;;  %v3514_v31 = vpop.permute.xlu0 %975 }
 0x243   :  { %1088 = vmax.xlane.f32.xlu1 %v1087_v32  ;;  %1324 = vmax.xlane.f32.xlu0 %v1323_v33  ;;  %v1771_v32 = vsel %vm5064_vm0, %v1755_v27, -inf  ;;  %v1979_v33 = vsel %vm382_vm5, %v3313_v52, -1e+30 }
 0x244   :  { %2765 = vmatprep.subr.bf16.mxu0 %v3514_v31  ;;  %v1989_v35 = vsel %vm5064_vm0, %v1979_v33, -inf }
 0x245   :  { %2756 = vmatpush3.bf16.msra.mxu1 %v751_v23  ;;  %v3525_v37 = vpop.permute.xlu1 %1204  ;;  %v1980_v23 = vsel %vm383_vm8, %v3313_v52, -1e+30 }
 0x246   :  { %v1992_v25 = vsel %vm5064_vm0, %v1980_v23, -inf  ;;  %v3635_v43 = vpop.permute.xlu0 %1429 }
 0x247   :  { %864 = vmax.xlane.f32.xlu1 %v863_v38  ;;  %1327 = vmax.xlane.f32.xlu0 %v1326_v39  ;;  %v1777_v38 = vsel %vm5064_vm0, %v1757_v34, -inf  ;;  %v1981_v39 = vsel %vm384_vm9, %v3313_v52, -1e+30 }
 0x248   :  { %v1995_v41 = vsel %vm5064_vm0, %v1981_v39, -inf }
 0x249   :  { %v3535_v42 = vpop.permute.xlu1 %1431 }
 0x24a   :  { %v3645_v1 = vpop.permute.xlu0 %1883 }
 0x24b   :  { %867 = vmax.xlane.f32.xlu1 %v866_v44  ;;  %1545 = vmax.xlane.f32.xlu0 %v1544_v45  ;;  %v1998_v44 = vsel %vm5064_vm0, %v1982_v40, -inf  ;;  %v1756_v45 = vsel %vm386_vm10, %v3310_v51, -1e+30 }
 0x24c   :  { %v1774_v48 = vsel %vm5064_vm0, %v1756_v45, -inf }
 0x24d   :  { %v3545_v49 = vpop.permute.xlu1 %1658 }
 0x24f   :  { %870 = vmax.xlane.f32.xlu1 %v869_v53  ;;  %1548 = vmax.xlane.f32.xlu0 %v1547_v57  ;;  %v2004_v53 = vsel %vm5064_vm0, %v1984_v47, -inf  ;;  %v1758_v57 = vsel %vm388_vm11, %v3310_v51, -1e+30 }
 0x250   :  { %v1780_v60 = vsel %vm5064_vm0, %v1758_v57, -inf }
 0x251   :  { %v3555_v62 = vpop.permute.xlu1 %1202 }
 0x252   :  { %2777 = vmatprep.subr.bf16.mxu1 %v3555_v62 }
 0x253   :  { %873 = vmax.xlane.f32.xlu1 %v872_v63  ;;  %1551 = vmax.xlane.f32.xlu0 %v1550_v50  ;;  %v1983_v63 = vsel %vm386_vm10, %v3313_v52, -1e+30 }
 0x254   :  { %v2001_v50 = vsel %vm5064_vm0, %v1983_v63, -inf }
 0x255   :  { %v3656_v16 = vpop.permute.xlu1 %1656 }
 0x257   :  { %1091 = vmax.xlane.f32.xlu1 %v1090_v3  ;;  %1760 = vmax.xlane.f32.xlu0 %v1759_v5  ;;  %v2007_v3 = vsel %vm5064_vm0, %v1985_v0, -inf }
 0x25b   :  { %1094 = vmax.xlane.f32.xlu1 %v1093_v9  ;;  %1766 = vmax.xlane.f32.xlu0 %v1765_v10 }
 0x25f   :  { %1097 = vmax.xlane.f32.xlu1 %v1096_v14  ;;  %1769 = vmax.xlane.f32.xlu0 %v1768_v15 }
 0x263   :  { %1536 = vmax.xlane.f32.xlu1 %v1535_v19  ;;  %1987 = vmax.xlane.f32.xlu0 %v1986_v21  ;;  %v3658_v19 = vpop.permute.xlu1 %2110 }
 0x267   :  { %1554 = vmax.xlane.f32.xlu1 %v1553_v24  ;;  %1993 = vmax.xlane.f32.xlu0 %v1992_v25 }
 0x26b   :  { %1763 = vmax.xlane.f32.xlu1 %v1762_v28  ;;  %1772 = vmax.xlane.f32.xlu0 %v1771_v32 }
 0x26f   :  { %1990 = vmax.xlane.f32.xlu1 %v1989_v35  ;;  %1778 = vmax.xlane.f32.xlu0 %v1777_v38 }
 0x273   :  { %1996 = vmax.xlane.f32.xlu1 %v1995_v41  ;;  %1999 = vmax.xlane.f32.xlu0 %v1998_v44 }
 0x277   :  { %1775 = vmax.xlane.f32.xlu1 %v1774_v48  ;;  %2005 = vmax.xlane.f32.xlu0 %v2004_v53 }
 0x27b   :  { %1781 = vmax.xlane.f32.xlu1 %v1780_v60 }
 0x27f   :  { %2002 = vmax.xlane.f32.xlu1 %v2001_v50 }
 0x283   :  { %2008 = vmax.xlane.f32.xlu1 %v2007_v3 }
 0x284   :  { %v403_v5 = vpop.xlane.xlu0 %402 }
 0x285   :  { %v425_v6 = vsub.f32 %v3323_v55, %v403_v5 }
 0x287   :  { %v433_v8 = vsel %vm381_vm4, %v425_v6, -1e+30 }
 0x288   :  { %v441_v9 = vmul.f32 1.442695, %v433_v8  ;;  %v406_v10 = vpop.xlane.xlu0 %405 }
 0x289   :  { %v426_v12 = vsub.f32 %v3323_v55, %v406_v10 }
 0x28a   :  { %2867 = vpow2.f32 %v441_v9 }
 0x28b   :  { %v434_v13 = vsel %vm382_vm5, %v426_v12, -1e+30 }
 0x28c   :  { %v443_v14 = vmul.f32 1.442695, %v434_v13  ;;  %v415_v15 = vpop.xlane.xlu0 %414 }
 0x28d   :  { %1885 = vrot.lane.b32.xlu0 %v3282_v36, %s3169_s8  ;;  %v429_v23 = vsub.f32 %v3323_v55, %v415_v15 }
 0x28e   :  { %2869 = vpow2.f32 %v443_v14 }
 0x28f   :  { %v437_v33 = vsel %vm385_vm6, %v429_v23, -1e+30 }
 0x290   :  { %v421_v18 = vpop.xlane.xlu0 %420  ;;  %v449_v41 = vmul.f32 1.442695, %v437_v33 }
 0x291   :  { %v431_v34 = vsub.f32 %v3323_v55, %v421_v18 }
 0x293   :  { %v439_v45 = vsel %vm387_vm7, %v431_v34, -1e+30 }
 0x294   :  { %2112 = vrot.lane.b32.xlu1 %v3282_v36, %s3171_s9  ;;  %v624_v21 = vpop.xlane.xlu0 %623  ;;  %v2868_v22 = vpop.eup %2867  ;;  %v453_v63 = vmul.f32 1.442695, %v439_v45 }
 0x295   :  { %v457_v28 = vmul.f32 %v2868_v22, %v3320_v54  ;;  %v646_v47 = vsub.f32 %v3352_v2, %v624_v21 }
 0x297   :  { %v654_v0 = vsel %vm381_vm4, %v646_v47, -1e+30  ;;  %v465_v34 = vsel %vm5064_vm0, %v457_v28, 0.0 }
 0x298   :  { %v2870_v24 = vpop.eup %2869  ;;  %v409_v25 = vpop.xlane.xlu1 %408  ;;  %v662_v10 = vmul.f32 1.442695, %v654_v0 }
 0x299   :  { %v630_v26 = vpop.xlane.xlu0 %629  ;;  %v427_v27 = vsub.f32 %v3323_v55, %v409_v25  ;;  %v3666_v32 = vmul.f32 %v2870_v24, %v3326_v56 }
 0x29a   :  { %v648_v3 = vsub.f32 %v3352_v2, %v630_v26 }
 0x29b   :  { %v435_v36 = vsel %vm383_vm8, %v427_v27, -1e+30  ;;  %v521_v35 = vpack.c.bf16 %v3666_v32, %v457_v28 }
 0x29c   :  { %v445_v38 = vmul.f32 1.442695, %v435_v36  ;;  %v412_v39 = vpop.xlane.xlu1 %411  ;;  %v656_v13 = vsel %vm383_vm8, %v648_v3, -1e+30 }
 0x29d   :  { %v636_v40 = vpop.xlane.xlu0 %635  ;;  %v428_v44 = vsub.f32 %v3323_v55, %v412_v39  ;;  %2745 = vmatprep.mubr.msk.bf16.mxu0 %vm5064_vm0, %v521_v35  ;;  %v666_v24 = vmul.f32 1.442695, %v656_v13 }
 0x29e   :  { %2871 = vpow2.f32 %v445_v38  ;;  %v650_v14 = vsub.f32 %v3352_v2, %v636_v40 }
 0x29f   :  { %v436_v48 = vsel %vm384_vm9, %v428_v44, -1e+30  ;;  %2873 = vpow2.f32 %v449_v41 }
 0x2a0   :  { %v447_v53 = vmul.f32 1.442695, %v436_v48  ;;  %v418_v57 = vpop.xlane.xlu1 %417 }
 0x2a1   :  { %v642_v60 = vpop.xlane.xlu0 %641  ;;  %v430_v50 = vsub.f32 %v3323_v55, %v418_v57 }
 0x2a2   :  { %2875 = vpow2.f32 %v447_v53  ;;  %v652_v26 = vsub.f32 %v3352_v2, %v642_v60 }
 0x2a3   :  { %v438_v5 = vsel %vm386_vm10, %v430_v50, -1e+30  ;;  %2877 = vpow2.f32 %v453_v63 }
 0x2a4   :  { %v451_v6 = vmul.f32 1.442695, %v438_v5  ;;  %v424_v8 = vpop.xlane.xlu1 %423  ;;  %v660_v47 = vsel %vm387_vm7, %v652_v26, -1e+30 }
 0x2a5   :  { %v3687_v9 = vpop.xlane.xlu0 %1085  ;;  %v432_v12 = vsub.f32 %v3323_v55, %v424_v8  ;;  %v658_v55 = vsel %vm385_vm6, %v650_v14, -1e+30  ;;  %v674_v5 = vmul.f32 1.442695, %v660_v47 }
 0x2a6   :  { %2879 = vpow2.f32 %v451_v6  ;;  %v670_v41 = vmul.f32 1.442695, %v658_v55 }
 0x2a7   :  { %v440_v15 = vsel %vm388_vm11, %v432_v12, -1e+30  ;;  %2881 = vpow2.f32 %v662_v10 }
 0x2a8   :  { %v2872_v18 = vpop.eup %2871  ;;  %v455_v21 = vmul.f32 1.442695, %v440_v15  ;;  %v627_v22 = vpop.xlane.xlu1 %626 }
 0x2a9   :  { %v3695_v23 = vpop.xlane.xlu0 %1100  ;;  %v647_v25 = vsub.f32 %v3352_v2, %v627_v22  ;;  %v2874_v27 = vpop.eup %2873  ;;  %v459_v36 = vmul.f32 %v2872_v18, %v3358_v4 }
 0x2aa   :  { %2883 = vpow2.f32 %v455_v21  ;;  %v461_v60 = vmul.f32 %v2874_v27, %v3334_v58 }
 0x2ab   :  { %v655_v33 = vsel %vm382_vm5, %v647_v25, -1e+30  ;;  %2885 = vpow2.f32 %v666_v24  ;;  %v471_v53 = vsel %vm5064_vm0, %v459_v36, 0.0 }
 0x2ac   :  { %v2876_v35 = vpop.eup %2875  ;;  %v664_v38 = vmul.f32 1.442695, %v655_v33  ;;  %v633_v39 = vpop.xlane.xlu1 %632  ;;  %466 = vadd.xlane.f32.xlu0 %v465_v34  ;;  %v477_v13 = vsel %vm5064_vm0, %v461_v60, 0.0  ;;  %v468_v33 = vsel %vm5064_vm0, %v3666_v32, 0.0 }
 0x2ad   :  { %v3705_v40 = vpop.xlane.xlu0 %1306  ;;  %v649_v44 = vsub.f32 %v3352_v2, %v633_v39  ;;  %v460_v45 = vmul.f32 %v2876_v35, %v3365_v7  ;;  %v2878_v48 = vpop.eup %2877 }
 0x2ae   :  { %2887 = vpow2.f32 %v664_v38  ;;  %v463_v15 = vmul.f32 %v2878_v48, %v3342_v61 }
 0x2af   :  { %v657_v28 = vsel %vm384_vm9, %v649_v44, -1e+30  ;;  %v522_v57 = vpack.c.bf16 %v460_v45, %v459_v36  ;;  %2889 = vpow2.f32 %v670_v41  ;;  %v474_v48 = vsel %vm5064_vm0, %v460_v45, 0.0 }
 0x2b0   :  { %v2880_v63 = vpop.eup %2879  ;;  %v668_v50 = vmul.f32 1.442695, %v657_v28  ;;  %v639_v0 = vpop.xlane.xlu1 %638  ;;  %472 = vadd.xlane.f32.xlu0 %v471_v53 }
 0x2b1   :  { %v3715_v3 = vpop.xlane.xlu0 %1309  ;;  %v651_v6 = vsub.f32 %v3352_v2, %v639_v0  ;;  %2746 = vmatmul.mubr.msk.bf16.vlgmr.msra.gmra.mrb[12].mxu0 %vm5064_vm0, %v522_v57  ;;  %v462_v8 = vmul.f32 %v2880_v63, %v3377_v11  ;;  %v2882_v10 = vpop.eup %2881 }
 0x2b2   :  { %2891 = vpow2.f32 %v668_v50  ;;  %2766 = vmatpush3.bf16.msra.mxu0 %v3514_v31  ;;  %v678_v55 = vmul.f32 %v2882_v10, %v3320_v54 }
 0x2b3   :  { %v659_v12 = vsel %vm386_vm10, %v651_v6, -1e+30  ;;  %2767 = vmatprep.subr.bf16.mxu0 %v3512_v29  ;;  %v523_v14 = vpack.c.bf16 %v462_v8, %v461_v60  ;;  %2893 = vpow2.f32 %v674_v5 }
 0x2b4   :  { %v2884_v18 = vpop.eup %2883  ;;  %v672_v21 = vmul.f32 1.442695, %v659_v12  ;;  %v645_v22 = vpop.xlane.xlu1 %644  ;;  %478 = vadd.xlane.f32.xlu0 %v477_v13  ;;  %v686_v44 = vsel %vm5064_vm0, %v678_v55, 0.0  ;;  %v480_v12 = vsel %vm5064_vm0, %v462_v8, 0.0 }
 0x2b5   :  { %v3726_v24 = vpop.xlane.xlu0 %1312  ;;  %v653_v31 = vsub.f32 %v3352_v2, %v645_v22  ;;  %2749 = vmatprep.mubr.msk.bf16.mxu0 %vm5064_vm0, %v523_v14  ;;  %v464_v25 = vmul.f32 %v2884_v18, %v3390_v17  ;;  %v2886_v26 = vpop.eup %2885  ;;  %v483_v2 = vsel %vm5064_vm0, %v463_v15, 0.0 }
 0x2b6   :  { %2895 = vpow2.f32 %v672_v21  ;;  %2768 = vmatpush3.bf16.msra.mxu0 %v3512_v29  ;;  %v680_v53 = vmul.f32 %v2886_v26, %v3358_v4 }
 0x2b7   :  { %v661_v27 = vsel %vm388_vm11, %v653_v31, -1e+30  ;;  %2789 = vmatprep.subr.bf16.mxu0 %v3635_v43  ;;  %v524_v34 = vpack.c.bf16 %v464_v25, %v463_v15 }
 0x2b8   :  { %v2888_v36 = vpop.eup %2887  ;;  %v676_v35 = vmul.f32 1.442695, %v661_v27  ;;  %v853_v38 = vpop.xlane.xlu1 %852  ;;  %469 = vadd.xlane.f32.xlu1 %v468_v33  ;;  %484 = vadd.xlane.f32.xlu0 %v483_v2  ;;  %v692_v13 = vsel %vm5064_vm0, %v680_v53, 0.0  ;;  %v486_v27 = vsel %vm5064_vm0, %v464_v25, 0.0 }
 0x2b9   :  { %v3739_v29 = vpop.xlane.xlu0 %1315  ;;  %v875_v39 = vsub.f32 %v3444_v46, %v853_v38  ;;  %2750 = vmatmul.mubr.msk.bf16.gmra.mrb[16].mxu0 %vm5064_vm0, %v524_v34  ;;  %v679_v41 = vmul.f32 %v2888_v36, %v3326_v56  ;;  %v2890_v32 = vpop.eup %2889 }
 0x2ba   :  { %2897 = vpow2.f32 %v676_v35  ;;  %v682_v6 = vmul.f32 %v2890_v32, %v3334_v58 }
 0x2bb   :  { %v883_v47 = vsel %vm381_vm4, %v875_v39, -1e+30  ;;  %v742_v28 = vpack.c.bf16 %v679_v41, %v678_v55  ;;  %v689_v32 = vsel %vm5064_vm0, %v679_v41, 0.0 }
 0x2bc   :  { %v2892_v57 = vpop.eup %2891  ;;  %v891_v60 = vmul.f32 1.442695, %v883_v47  ;;  %v856_v63 = vpop.xlane.xlu1 %855  ;;  %475 = vadd.xlane.f32.xlu1 %v474_v48  ;;  %687 = vadd.xlane.f32.xlu0 %v686_v44  ;;  %v698_v8 = vsel %vm5064_vm0, %v682_v6, 0.0  ;;  %v1104_v44 = vsub.f32 %v3395_v20, %v3687_v9 }
 0x2bd   :  { %v3749_v50 = vpop.xlane.xlu0 %1533  ;;  %v876_v0 = vsub.f32 %v3444_v46, %v856_v63  ;;  %2757 = vmatprep.mubr.msk.bf16.mxu1 %vm5064_vm0, %v742_v28  ;;  %v681_v5 = vmul.f32 %v2892_v57, %v3365_v7  ;;  %v2894_v45 = vpop.eup %2893 }
 0x2be   :  { %2899 = vpow2.f32 %v891_v60  ;;  %v684_v2 = vmul.f32 %v2894_v45, %v3342_v61  ;;  %v1112_v41 = vsel %vm383_vm8, %v1104_v44, -1e+30 }
 0x2bf   :  { %v884_v10 = vsel %vm382_vm5, %v876_v0, -1e+30  ;;  %v743_v14 = vpack.c.bf16 %v681_v5, %v680_v53  ;;  %v1329_v0 = vsub.f32 %v3416_v30, %v3705_v40  ;;  %v695_v45 = vsel %vm5064_vm0, %v681_v5, 0.0 }
 0x2c0   :  { %v2896_v15 = vpop.eup %2895  ;;  %v893_v18 = vmul.f32 1.442695, %v884_v10  ;;  %v859_v21 = vpop.xlane.xlu1 %858  ;;  %481 = vadd.xlane.f32.xlu1 %v480_v12  ;;  %693 = vadd.xlane.f32.xlu0 %v692_v13  ;;  %v704_v47 = vsel %vm5064_vm0, %v684_v2, 0.0 }
 0x2c1   :  { %v3759_v22 = vpop.xlane.xlu0 %1539  ;;  %v877_v31 = vsub.f32 %v3444_v46, %v859_v21  ;;  %2758 = vmatmul.mubr.msk.bf16.vlgmr.msra.gmra.mrb[8].mxu1 %vm5064_vm0, %v743_v14  ;;  %v683_v55 = vmul.f32 %v2896_v15, %v3377_v11  ;;  %v1122_v15 = vmul.f32 1.442695, %v1112_v41  ;;  %v1337_v5 = vsel %vm381_vm4, %v1329_v0, -1e+30 }
 0x2c2   :  { %2901 = vpow2.f32 %v893_v18  ;;  %2778 = vmatpush3.bf16.msra.mxu1 %v3555_v62  ;;  %v1345_v44 = vmul.f32 1.442695, %v1337_v5 }
 0x2c3   :  { %v885_v26 = vsel %vm383_vm8, %v877_v31, -1e+30  ;;  %2779 = vmatprep.subr.bf16.mxu1 %v3525_v37  ;;  %v744_v33 = vpack.c.bf16 %v683_v55, %v682_v6  ;;  %v1330_v31 = vsub.f32 %v3416_v30, %v3715_v3 }
 0x2c4   :  { %v2898_v34 = vpop.eup %2897  ;;  %v895_v36 = vmul.f32 1.442695, %v885_v26  ;;  %v862_v35 = vpop.xlane.xlu1 %861  ;;  %487 = vadd.xlane.f32.xlu1 %v486_v27  ;;  %699 = vadd.xlane.f32.xlu0 %v698_v8  ;;  %v1331_v8 = vsub.f32 %v3416_v30, %v3726_v24 }
 0x2c5   :  { %v3771_v38 = vpop.xlane.xlu0 %1542  ;;  %v878_v62 = vsub.f32 %v3444_v46, %v862_v35  ;;  %2761 = vmatprep.mubr.msk.bf16.mxu1 %vm5064_vm0, %v744_v33  ;;  %v685_v39 = vmul.f32 %v2898_v34, %v3390_v17  ;;  %v701_v33 = vsel %vm5064_vm0, %v683_v55, 0.0 }
 0x2c6   :  { %2903 = vpow2.f32 %v895_v36  ;;  %2780 = vmatpush3.bf16.msra.mxu1 %v3525_v37  ;;  %v1109_v37 = vsub.f32 %v3395_v20, %v3695_v23  ;;  %v1339_v55 = vsel %vm383_vm8, %v1331_v8, -1e+30 }
 0x2c7   :  { %v886_v25 = vsel %vm384_vm9, %v878_v62, -1e+30  ;;  %2801 = vmatprep.subr.bf16.mxu1 %v3656_v16  ;;  %v745_v48 = vpack.c.bf16 %v685_v39, %v684_v2  ;;  %v1349_v0 = vmul.f32 1.442695, %v1339_v55 }
 0x2c8   :  { %v2900_v28 = vpop.eup %2899  ;;  %v897_v53 = vmul.f32 1.442695, %v886_v25  ;;  %v1080_v57 = vpop.xlane.xlu1 %1079  ;;  %690 = vadd.xlane.f32.xlu1 %v689_v32  ;;  %705 = vadd.xlane.f32.xlu0 %v704_v47  ;;  %v1117_v18 = vsel %vm388_vm11, %v1109_v37, -1e+30  ;;  %v1338_v25 = vsel %vm382_vm5, %v1330_v31, -1e+30  ;;  %v1332_v32 = vsub.f32 %v3416_v30, %v3739_v29 }
 0x2c9   :  { %v3784_v60 = vpop.xlane.xlu0 %1318  ;;  %v1102_v9 = vsub.f32 %v3395_v20, %v1080_v57  ;;  %2762 = vmatmul.mubr.msk.bf16.gmra.mrb[12].mxu1 %vm5064_vm0, %v745_v48  ;;  %v907_v63 = vmul.f32 %v2900_v28, %v3320_v54  ;;  %v1132_v34 = vmul.f32 1.442695, %v1117_v18  ;;  %v707_v48 = vsel %vm5064_vm0, %v685_v39, 0.0 }
 0x2ca   :  { %2905 = vpow2.f32 %v897_v53  ;;  %v1340_v39 = vsel %vm384_vm9, %v1332_v32, -1e+30 }
 0x2cb   :  { %v1110_v6 = vsel %vm381_vm4, %v1102_v9, -1e+30  ;;  %v915_v23 = vsel %vm5064_vm0, %v907_v63, 0.0 }
 0x2cc   :  { %v2902_v10 = vpop.eup %2901  ;;  %v1118_v12 = vmul.f32 1.442695, %v1110_v6  ;;  %v1083_v13 = vpop.xlane.xlu1 %1082  ;;  %696 = vadd.xlane.f32.xlu1 %v695_v45  ;;  %916 = vadd.xlane.f32.xlu0 %v915_v23 }
 0x2cd   :  { %v3799_v14 = vpop.xlane.xlu0 %1321  ;;  %v1103_v40 = vsub.f32 %v3395_v20, %v1083_v13  ;;  %v908_v21 = vmul.f32 %v2902_v10, %v3326_v56  ;;  %v1556_v10 = vsub.f32 %v3456_v59, %v3749_v50  ;;  %v1351_v50 = vmul.f32 1.442695, %v1340_v39 }
 0x2ce   :  { %2907 = vpow2.f32 %v1118_v12  ;;  %v1558_v12 = vsub.f32 %v3456_v59, %v3759_v22 }
 0x2cf   :  { %v1111_v26 = vsel %vm382_vm5, %v1103_v40, -1e+30  ;;  %v971_v27 = vpack.c.bf16 %v908_v21, %v907_v63  ;;  %2909 = vpow2.f32 %v1122_v15  ;;  %v1347_v63 = vmul.f32 1.442695, %v1338_v25 }
 0x2d0   :  { %v2904_v2 = vpop.eup %2903  ;;  %v1120_v36 = vmul.f32 1.442695, %v1111_v26  ;;  %v1089_v35 = vpop.xlane.xlu1 %1088  ;;  %702 = vadd.xlane.f32.xlu1 %v701_v33  ;;  %v918_v45 = vsel %vm5064_vm0, %v908_v21, 0.0  ;;  %v1564_v26 = vsel %vm381_vm4, %v1556_v10, -1e+30  ;;  %v1559_v33 = vsub.f32 %v3456_v59, %v3771_v38 }
 0x2d1   :  { %v3814_v62 = vpop.xlane.xlu0 %1324  ;;  %v1105_v3 = vsub.f32 %v3395_v20, %v1089_v35  ;;  %2769 = vmatprep.mubr.msk.bf16.mxu0 %vm5064_vm0, %v971_v27  ;;  %v909_v24 = vmul.f32 %v2904_v2, %v3358_v4  ;;  %v1566_v27 = vsel %vm383_vm8, %v1558_v12, -1e+30  ;;  %v1333_v35 = vsub.f32 %v3416_v30, %v3784_v60 }
 0x2d2   :  { %2911 = vpow2.f32 %v1120_v36  ;;  %v1572_v55 = vmul.f32 1.442695, %v1564_v26 }
 0x2d3   :  { %v1113_v47 = vsel %vm384_vm9, %v1105_v3, -1e+30  ;;  %v921_v28 = vsel %vm5064_vm0, %v909_v24, 0.0  ;;  %2913 = vpow2.f32 %v1132_v34 }
 0x2d4   :  { %v2906_v53 = vpop.eup %2905  ;;  %v1124_v57 = vmul.f32 1.442695, %v1113_v47  ;;  %v865_v37 = vpop.xlane.xlu1 %864  ;;  %708 = vadd.xlane.f32.xlu1 %v707_v48  ;;  %922 = vadd.xlane.f32.xlu0 %v921_v28  ;;  %2915 = vpow2.f32 %v1345_v44  ;;  %v1576_v48 = vmul.f32 1.442695, %v1566_v27  ;;  %v1567_v28 = vsel %vm384_vm9, %v1559_v33, -1e+30 }
 0x2d5   :  { %v3829_v9 = vpop.xlane.xlu0 %1327  ;;  %v879_v41 = vsub.f32 %v3444_v46, %v865_v37  ;;  %v910_v29 = vmul.f32 %v2906_v53, %v3365_v7  ;;  %v1334_v53 = vsub.f32 %v3416_v30, %v3799_v14  ;;  %v1578_v39 = vmul.f32 1.442695, %v1567_v28 }
 0x2d6   :  { %2917 = vpow2.f32 %v1124_v57 }
 0x2d7   :  { %v887_v6 = vsel %vm385_vm6, %v879_v41, -1e+30  ;;  %v924_v23 = vsel %vm5064_vm0, %v910_v29, 0.0  ;;  %v972_v18 = vpack.c.bf16 %v910_v29, %v909_v24  ;;  %2919 = vpow2.f32 %v1347_v63 }
 0x2d8   :  { %v899_v13 = vmul.f32 1.442695, %v887_v6  ;;  %v868_v15 = vpop.xlane.xlu1 %867  ;;  %919 = vadd.xlane.f32.xlu1 %v918_v45  ;;  %925 = vadd.xlane.f32.xlu0 %v924_v23  ;;  %v2908_v31 = vpop.eup %2907  ;;  %v1335_v29 = vsub.f32 %v3416_v30, %v3814_v62  ;;  %v1342_v12 = vsel %vm386_vm10, %v1334_v53, -1e+30 }
 0x2d9   :  { %v3843_v40 = vpop.xlane.xlu0 %1545  ;;  %v880_v5 = vsub.f32 %v3444_v46, %v868_v15  ;;  %2770 = vmatmul.mubr.msk.bf16.vlgmr.msra.gmra.mrb[20].mxu0 %vm5064_vm0, %v972_v18  ;;  %v2910_v21 = vpop.eup %2909  ;;  %v3863_v44 = vmul.f32 %v2908_v31, %v3320_v54 }
 0x2da   :  { %2921 = vpow2.f32 %v899_v13  ;;  %2790 = vmatpush3.bf16.msra.mxu0 %v3635_v43  ;;  %v1136_v38 = vmul.f32 %v2910_v21, %v3358_v4  ;;  %v1343_v18 = vsel %vm387_vm7, %v1335_v29, -1e+30 }
 0x2db   :  { %2923 = vpow2.f32 %v1349_v0  ;;  %v888_v22 = vsel %vm386_vm10, %v880_v5, -1e+30  ;;  %2791 = vmatprep.subr.bf16.mxu0 %v3535_v42  ;;  %v1336_v5 = vsub.f32 %v3416_v30, %v3829_v9  ;;  %v1357_v30 = vmul.f32 1.442695, %v1343_v18 }
 0x2dc   :  { %v2912_v8 = vpop.eup %2911  ;;  %v901_v2 = vmul.f32 1.442695, %v888_v22  ;;  %v871_v34 = vpop.xlane.xlu1 %870 }
 0x2dd   :  { %v3857_v36 = vpop.xlane.xlu0 %1548  ;;  %v881_v43 = vsub.f32 %v3444_v46, %v871_v34  ;;  %v3866_v3 = vmul.f32 %v2912_v8, %v3326_v56  ;;  %v3868_v24 = vpop.eup %2913 }
 0x2de   :  { %2925 = vpow2.f32 %v901_v2  ;;  %v3871_v25 = vpop.eup %2915  ;;  %2792 = vmatpush3.bf16.msra.mxu0 %v3535_v42  ;;  %v1341_v42 = vsel %vm385_vm6, %v1333_v35, -1e+30  ;;  %v1561_v34 = vsub.f32 %v3456_v59, %v3857_v36 }
 0x2df   :  { %2927 = vpow2.f32 %v1351_v50  ;;  %v889_v60 = vsel %vm387_vm7, %v881_v43, -1e+30  ;;  %v1198_v32 = vpack.c.bf16 %v3866_v3, %v3863_v44  ;;  %2813 = vmatprep.subr.bf16.mxu0 %v3645_v1  ;;  %v1353_v10 = vmul.f32 1.442695, %v1341_v42 }
 0x2e0   :  { %v2918_v47 = vpop.eup %2917  ;;  %v903_v57 = vmul.f32 1.442695, %v889_v60  ;;  %v874_v37 = vpop.xlane.xlu1 %873  ;;  %v1355_v50 = vmul.f32 1.442695, %v1342_v12  ;;  %v1560_v60 = vsub.f32 %v3456_v59, %v3843_v40  ;;  %v1569_v40 = vsel %vm386_vm10, %v1561_v34, -1e+30 }
 0x2e1   :  { %v3883_v63 = vpop.xlane.xlu0 %1551  ;;  %v3888_v41 = vmul.f32 %v2918_v47, %v3365_v7  ;;  %v882_v0 = vsub.f32 %v3444_v46, %v874_v37  ;;  %2781 = vmatprep.mubr.msk.bf16.mxu1 %vm5064_vm0, %v1198_v32  ;;  %v2920_v14 = vpop.eup %2919 }
 0x2e2   :  { %2929 = vpow2.f32 %v903_v57 }
 0x2e3   :  { %2931 = vpow2.f32 %v1572_v55  ;;  %v890_v6 = vsel %vm388_vm11, %v882_v0, -1e+30  ;;  %v1199_v45 = vpack.c.bf16 %v3888_v41, %v1136_v38  ;;  %v3925_v55 = vsel %vm5064_vm0, %v1136_v38, 0.0 }
 0x2e4   :  { %v2922_v23 = vpop.eup %2921  ;;  %2933 = vpow2.f32 %v1576_v48  ;;  %v905_v62 = vmul.f32 1.442695, %v890_v6  ;;  %v1092_v13 = vpop.xlane.xlu1 %1091  ;;  %v3946_v6 = vmul.f32 %v2920_v14, %v3326_v56 }
 0x2e5   :  { %v3899_v46 = vpop.xlane.xlu0 %1760  ;;  %v3901_v15 = vpop.eup %2923  ;;  %v1106_v31 = vsub.f32 %v3395_v20, %v1092_v13  ;;  %2782 = vmatmul.mubr.msk.bf16.vlgmr.msra.gmra.mrb[16].mxu1 %vm5064_vm0, %v1199_v45  ;;  %v911_v21 = vmul.f32 %v2922_v23, %v3334_v58  ;;  %v3950_v45 = vmul.f32 %v3868_v24, %v3390_v17  ;;  %v1568_v23 = vsel %vm385_vm6, %v1560_v60, -1e+30 }
 0x2e6   :  { %2935 = vpow2.f32 %v905_v62  ;;  %2802 = vmatpush3.bf16.msra.mxu1 %v3656_v16  ;;  %v1344_v16 = vsel %vm388_vm11, %v1336_v5, -1e+30  ;;  %v1783_v37 = vsub.f32 %v3310_v51, %v3899_v46  ;;  %v1582_v13 = vmul.f32 1.442695, %v1569_v40 }
 0x2e7   :  { %2937 = vpow2.f32 %v1578_v39  ;;  %v1114_v22 = vsel %vm385_vm6, %v1106_v31, -1e+30  ;;  %2803 = vmatprep.subr.bf16.mxu1 %v3545_v49  ;;  %v927_v8 = vsel %vm5064_vm0, %v911_v21, 0.0  ;;  %v1359_v48 = vmul.f32 1.442695, %v1344_v16 }
 0x2e8   :  { %v2926_v26 = vpop.eup %2925  ;;  %2939 = vpow2.f32 %v1353_v10  ;;  %v1126_v9 = vmul.f32 1.442695, %v1114_v22  ;;  %v1095_v27 = vpop.xlane.xlu1 %1094  ;;  %928 = vadd.xlane.f32.xlu0 %v927_v8  ;;  %v3960_v24 = vmul.f32 %v3871_v25, %v3320_v54  ;;  %v1562_v31 = vsub.f32 %v3456_v59, %v3883_v63 }
 0x2e9   :  { %v1767_v33 = vpop.xlane.xlu0 %1766  ;;  %v3915_v2 = vpop.eup %2927  ;;  %v1107_v35 = vsub.f32 %v3395_v20, %v1095_v27  ;;  %v912_v43 = vmul.f32 %v2926_v26, %v3377_v11  ;;  %v1580_v26 = vmul.f32 1.442695, %v1568_v23  ;;  %v3994_v40 = vsel %vm5064_vm0, %v3950_v45, 0.0 }
 0x2ea   :  { %2941 = vpow2.f32 %v1126_v9  ;;  %2804 = vmatpush3.bf16.msra.mxu1 %v3545_v49  ;;  %v1785_v39 = vsub.f32 %v3310_v51, %v1767_v33  ;;  %v1425_v25 = vpack.c.bf16 %v3946_v6, %v3960_v24  ;;  %v1142_v33 = vsel %vm5064_vm0, %v3863_v44, 0.0 }
 0x2eb   :  { %2943 = vpow2.f32 %v1355_v50  ;;  %v1115_v32 = vsel %vm386_vm10, %v1107_v35, -1e+30  ;;  %2825 = vmatprep.subr.bf16.mxu1 %v3658_v19  ;;  %v930_v36 = vsel %vm5064_vm0, %v912_v43, 0.0  ;;  %v973_v49 = vpack.c.bf16 %v912_v43, %v911_v21 }
 0x2ec   :  { %v2930_v47 = vpop.eup %2929  ;;  %2945 = vpow2.f32 %v1357_v30  ;;  %v1128_v28 = vmul.f32 1.442695, %v1115_v32  ;;  %v1098_v53 = vpop.xlane.xlu1 %1097  ;;  %931 = vadd.xlane.f32.xlu1 %v930_v36  ;;  %v1791_v21 = vsel %vm381_vm4, %v1783_v37, -1e+30  ;;  %v1793_v30 = vsel %vm383_vm8, %v1785_v39, -1e+30 }
 0x2ed   :  { %v1770_v38 = vpop.xlane.xlu0 %1769  ;;  %v3933_v57 = vpop.eup %2931  ;;  %v1108_v42 = vsub.f32 %v3395_v20, %v1098_v53  ;;  %v913_v29 = vmul.f32 %v2930_v47, %v3342_v61  ;;  %2773 = vmatprep.mubr.msk.bf16.mxu0 %vm5064_vm0, %v973_v49  ;;  %v1799_v34 = vmul.f32 1.442695, %v1791_v21  ;;  %v1570_v47 = vsel %vm387_vm7, %v1562_v31, -1e+30 }
 0x2ee   :  { %v3941_v0 = vpop.eup %2933  ;;  %2947 = vpow2.f32 %v1128_v28  ;;  %v1786_v10 = vsub.f32 %v3310_v51, %v1770_v38  ;;  %v3989_v44 = vmul.f32 %v3901_v15, %v3358_v4  ;;  %v3998_v37 = vmul.f32 %v3915_v2, %v3365_v7 }
 0x2ef   :  { %v1116_v20 = vsel %vm387_vm7, %v1108_v42, -1e+30  ;;  %v933_v12 = vsel %vm5064_vm0, %v913_v29, 0.0  ;;  %2949 = vpow2.f32 %v1359_v48  ;;  %v1803_v48 = vmul.f32 1.442695, %v1793_v30 }
 0x2f0   :  { %v2936_v62 = vpop.eup %2935  ;;  %v1130_v46 = vmul.f32 1.442695, %v1116_v20  ;;  %v1537_v14 = vpop.xlane.xlu1 %1536  ;;  %934 = vadd.xlane.f32.xlu0 %v933_v12  ;;  %v1794_v9 = vsel %vm384_vm9, %v1786_v10, -1e+30 }
 0x2f1   :  { %v1988_v18 = vpop.xlane.xlu0 %1987  ;;  %v3962_v5 = vpop.eup %2937  ;;  %v1557_v50 = vsub.f32 %v3456_v59, %v1537_v14  ;;  %v914_v22 = vmul.f32 %v2936_v62, %v3390_v17  ;;  %v1805_v38 = vmul.f32 1.442695, %v1794_v9 }
 0x2f2   :  { %v2940_v8 = vpop.eup %2939  ;;  %2951 = vpow2.f32 %v1130_v46  ;;  %v2010_v28 = vsub.f32 %v3313_v52, %v1988_v18  ;;  %v1151_v46 = vsel %vm5064_vm0, %v3888_v41, 0.0  ;;  %v1426_v41 = vpack.c.bf16 %v3998_v37, %v3989_v44 }
 0x2f3   :  { %v1565_v63 = vsel %vm382_vm5, %v1557_v50, -1e+30  ;;  %v936_v27 = vsel %vm5064_vm0, %v914_v22, 0.0  ;;  %2953 = vpow2.f32 %v1582_v13  ;;  %v974_v60 = vpack.c.bf16 %v914_v22, %v913_v29 }
 0x2f4   :  { %v2942_v16 = vpop.eup %2941  ;;  %v1574_v35 = vmul.f32 1.442695, %v1565_v63  ;;  %v1555_v43 = vpop.xlane.xlu1 %1554  ;;  %937 = vadd.xlane.f32.xlu1 %v936_v27  ;;  %1143 = vadd.xlane.f32.xlu0 %v1142_v33  ;;  %v1584_v29 = vmul.f32 1.442695, %v1570_v47 }
 0x2f5   :  { %v1994_v32 = vpop.xlane.xlu0 %1993  ;;  %v2944_v36 = vpop.eup %2943  ;;  %v1563_v53 = vsub.f32 %v3456_v59, %v1555_v43  ;;  %2774 = vmatmul.mubr.msk.bf16.gmra.mrb[24].mxu0 %vm5064_vm0, %v974_v60  ;;  %v1145_v59 = vsel %vm5064_vm0, %v3866_v3, 0.0  ;;  %v1138_v15 = vmul.f32 %v2942_v16, %v3334_v58  ;;  %v2018_v3 = vsel %vm381_vm4, %v2010_v28, -1e+30 }
 0x2f6   :  { %v3985_v49 = vpop.eup %2945  ;;  %2955 = vpow2.f32 %v1574_v35  ;;  %2793 = vmatprep.mubr.msk.bf16.mxu0 %vm5064_vm0, %v1425_v25  ;;  %v4008_v20 = vmul.f32 %v2944_v36, %v3377_v11  ;;  %v2012_v13 = vsub.f32 %v3313_v52, %v1994_v32  ;;  %v2026_v22 = vmul.f32 1.442695, %v2018_v3 }
 0x2f7   :  { %2957 = vpow2.f32 %v1580_v26  ;;  %v1571_v39 = vsel %vm388_vm11, %v1563_v53, -1e+30  ;;  %v1154_v31 = vsel %vm5064_vm0, %v1138_v15, 0.0  ;;  %v4033_v16 = vmul.f32 %v3962_v5, %v3365_v7 }
 0x2f8   :  { %v2948_v42 = vpop.eup %2947  ;;  %2959 = vpow2.f32 %v1799_v34  ;;  %v1764_v23 = vpop.xlane.xlu1 %1763  ;;  %1146 = vadd.xlane.f32.xlu1 %v1145_v59  ;;  %1149 = vadd.xlane.f32.xlu0 %v3925_v55  ;;  %v4018_v55 = vmul.f32 %v2940_v8, %v3334_v58  ;;  %v1586_v14 = vmul.f32 1.442695, %v1571_v39  ;;  %v2020_v34 = vsel %vm383_vm8, %v2012_v13, -1e+30 }
 0x2f9   :  { %v1773_v2 = vpop.xlane.xlu0 %1772  ;;  %2961 = vpow2.f32 %v1803_v48  ;;  %v1784_v10 = vsub.f32 %v3310_v51, %v1764_v23  ;;  %v1139_v12 = vmul.f32 %v2948_v42, %v3377_v11  ;;  %v2950_v62 = vpop.eup %2949  ;;  %v4040_v35 = vmul.f32 %v3933_v57, %v3320_v54 }
 0x2fa   :  { %2963 = vpow2.f32 %v1805_v38  ;;  %v1427_v8 = vpack.c.bf16 %v4008_v20, %v4018_v55  ;;  %v1787_v9 = vsub.f32 %v3310_v51, %v1773_v2  ;;  %v4050_v28 = vmul.f32 %v2950_v62, %v3390_v17 }
 0x2fb   :  { %v1792_v18 = vsel %vm382_vm5, %v1784_v10, -1e+30  ;;  %v1200_v21 = vpack.c.bf16 %v1139_v12, %v1138_v15  ;;  %2965 = vpow2.f32 %v1584_v29  ;;  %v1157_v5 = vsel %vm5064_vm0, %v1139_v12, 0.0 }
 0x2fc   :  { %v2952_v50 = vpop.eup %2951  ;;  %v1801_v26 = vmul.f32 1.442695, %v1792_v18  ;;  %v1991_v30 = vpop.xlane.xlu1 %1990  ;;  %1152 = vadd.xlane.f32.xlu1 %v1151_v46  ;;  %1155 = vadd.xlane.f32.xlu0 %v1154_v31  ;;  %v2030_v29 = vmul.f32 1.442695, %v2020_v34  ;;  %v4069_v2 = vmul.f32 %v3941_v0, %v3358_v4  ;;  %v1369_v10 = vsel %vm5064_vm0, %v3960_v24, 0.0 }
 0x2fd   :  { %v1779_v25 = vpop.xlane.xlu0 %1778  ;;  %v2011_v63 = vsub.f32 %v3313_v52, %v1991_v30  ;;  %2785 = vmatprep.mubr.msk.bf16.mxu1 %vm5064_vm0, %v1200_v21  ;;  %v1140_v27 = vmul.f32 %v2952_v50, %v3342_v61  ;;  %v2954_v33 = vpop.eup %2953  ;;  %2794 = vmatmul.mubr.msk.bf16.vlgmr.msra.gmra.mrb[28].mxu0 %vm5064_vm0, %v1426_v41  ;;  %v1375_v50 = vsel %vm5064_vm0, %v3989_v44, 0.0 }
 0x2fe   :  { %2967 = vpow2.f32 %v1801_v26  ;;  %2814 = vmatpush3.bf16.msra.mxu0 %v3645_v1  ;;  %2797 = vmatprep.mubr.msk.bf16.mxu0 %vm5064_vm0, %v1427_v8  ;;  %v1795_v1 = vsel %vm385_vm6, %v1787_v9, -1e+30  ;;  %v1789_v38 = vsub.f32 %v3310_v51, %v1779_v25  ;;  %v4065_v39 = vmul.f32 %v2954_v33, %v3377_v11 }
 0x2ff   :  { %2969 = vpow2.f32 %v1586_v14  ;;  %v2019_v43 = vsel %vm382_vm5, %v2011_v63, -1e+30  ;;  %v1160_v60 = vsel %vm5064_vm0, %v1140_v27, 0.0  ;;  %v1201_v57 = vpack.c.bf16 %v3950_v45, %v1140_v27 }
 0x300   :  { %v2956_v32 = vpop.eup %2955  ;;  %2971 = vpow2.f32 %v2026_v22  ;;  %v2028_v36 = vmul.f32 1.442695, %v2019_v43  ;;  %v1997_v47 = vpop.xlane.xlu1 %1996  ;;  %1158 = vadd.xlane.f32.xlu1 %v1157_v5  ;;  %1161 = vadd.xlane.f32.xlu0 %v1160_v60  ;;  %v4062_v45 = vmul.f32 %v3985_v49, %v3342_v61  ;;  %v1807_v49 = vmul.f32 1.442695, %v1795_v1 }
 0x301   :  { %v2000_v48 = vpop.xlane.xlu0 %1999  ;;  %v2958_v53 = vpop.eup %2957  ;;  %v2013_v59 = vsub.f32 %v3313_v52, %v1997_v47  ;;  %v4057_v15 = vmul.f32 %v2956_v32, %v3326_v56  ;;  %2786 = vmatmul.mubr.msk.bf16.gmra.mrb[20].mxu1 %vm5064_vm0, %v1201_v57  ;;  %v1797_v24 = vsel %vm387_vm7, %v1789_v38, -1e+30  ;;  %v1653_v22 = vpack.c.bf16 %v4033_v16, %v4069_v2 }
 0x302   :  { %v2960_v42 = vpop.eup %2959  ;;  %2973 = vpow2.f32 %v2028_v36  ;;  %v1428_v0 = vpack.c.bf16 %v4050_v28, %v4062_v45  ;;  %v4081_v18 = vmul.f32 %v2958_v53, %v3334_v58  ;;  %v2014_v31 = vsub.f32 %v3313_v52, %v2000_v48 }
 0x303   :  { %v2962_v23 = vpop.eup %2961  ;;  %v2021_v3 = vsel %vm384_vm9, %v2013_v59, -1e+30  ;;  %v1652_v12 = vpack.c.bf16 %v4057_v15, %v4040_v35  ;;  %2975 = vpow2.f32 %v2030_v29  ;;  %v4103_v41 = vmul.f32 %v2960_v42, %v3320_v54 }
 0x304   :  { %v2964_v62 = vpop.eup %2963  ;;  %v2032_v13 = vmul.f32 1.442695, %v2021_v3  ;;  %v1776_v46 = vpop.xlane.xlu1 %1775  ;;  %1164 = vadd.xlane.f32.xlu1 %v3994_v40  ;;  %1370 = vadd.xlane.f32.xlu0 %v1369_v10  ;;  %v1372_v40 = vsel %vm5064_vm0, %v3946_v6, 0.0  ;;  %v1654_v26 = vpack.c.bf16 %v4065_v39, %v4081_v18  ;;  %v4106_v44 = vmul.f32 %v2962_v23, %v3358_v4 }
 0x305   :  { %v2006_v14 = vpop.xlane.xlu0 %2005  ;;  %v1788_v21 = vsub.f32 %v3310_v51, %v1776_v46  ;;  %2805 = vmatprep.mubr.msk.bf16.mxu1 %vm5064_vm0, %v1652_v12  ;;  %2798 = vmatmul.mubr.msk.bf16.gmra.mrb[32].mxu0 %vm5064_vm0, %v1428_v0  ;;  %v2966_v30 = vpop.eup %2965  ;;  %v4098_v25 = vmul.f32 %v2964_v62, %v3365_v7  ;;  %v1811_v9 = vmul.f32 1.442695, %v1797_v24  ;;  %v2022_v43 = vsel %vm385_vm6, %v2014_v31, -1e+30 }
 0x306   :  { %2977 = vpow2.f32 %v2032_v13  ;;  %v2016_v5 = vsub.f32 %v3313_v52, %v2006_v14  ;;  %v1378_v47 = vsel %vm5064_vm0, %v3998_v37, 0.0  ;;  %v2034_v38 = vmul.f32 1.442695, %v2022_v43 }
 0x307   :  { %v1796_v6 = vsel %vm386_vm10, %v1788_v21, -1e+30  ;;  %2979 = vpow2.f32 %v1807_v49  ;;  %v1880_v53 = vpack.c.bf16 %v4098_v25, %v4106_v44  ;;  %v1594_v3 = vmul.f32 %v2966_v30, %v3342_v61 }
 0x308   :  { %v2968_v8 = vpop.eup %2967  ;;  %v1809_v63 = vmul.f32 1.442695, %v1796_v6  ;;  %v1782_v27 = vpop.xlane.xlu1 %1781  ;;  %1373 = vadd.xlane.f32.xlu1 %v1372_v40  ;;  %1376 = vadd.xlane.f32.xlu0 %v1375_v50  ;;  %v2024_v42 = vsel %vm387_vm7, %v2016_v5, -1e+30  ;;  %v1384_v12 = vsel %vm5064_vm0, %v4008_v20, 0.0  ;;  %v1387_v62 = vsel %vm5064_vm0, %v4062_v45, 0.0 }
 0x309   :  { %v1886_v33 = vpop.permute.xlu0 %1885  ;;  %v2970_v34 = vpop.eup %2969  ;;  %v1790_v60 = vsub.f32 %v3310_v51, %v1782_v27  ;;  %v4113_v32 = vmul.f32 %v2968_v8, %v3326_v56  ;;  %2806 = vmatmul.mubr.msk.bf16.vlgmr.msra.gmra.mrb[24].mxu1 %vm5064_vm0, %v1653_v22  ;;  %v1381_v51 = vsel %vm5064_vm0, %v4018_v55, 0.0  ;;  %v1596_v45 = vsel %vm5064_vm0, %v4040_v35, 0.0 }
 0x30a   :  { %2815 = vmatprep.subr.bf16.mxu0 %v1886_v33  ;;  %v2972_v36 = vpop.eup %2971  ;;  %2981 = vpow2.f32 %v1809_v63  ;;  %2826 = vmatpush3.bf16.msra.mxu1 %v3658_v19  ;;  %v4129_v19 = vmul.f32 %v2970_v34, %v3390_v17  ;;  %v1390_v21 = vsel %vm5064_vm0, %v4050_v28, 0.0  ;;  %v1602_v28 = vsel %vm5064_vm0, %v4069_v2, 0.0 }
 0x30b   :  { %2816 = vmatpush3.bf16.msra.mxu0 %v1886_v33  ;;  %v1798_v57 = vsel %vm388_vm11, %v1790_v60, -1e+30  ;;  %2809 = vmatprep.mubr.msk.bf16.mxu1 %vm5064_vm0, %v1654_v26  ;;  %v1879_v48 = vpack.c.bf16 %v4113_v32, %v4103_v41  ;;  %2983 = vpow2.f32 %v1811_v9  ;;  %v4136_v29 = vmul.f32 %v2972_v36, %v3320_v54 }
 0x30c   :  { %v2974_v1 = vpop.eup %2973  ;;  %v1813_v37 = vmul.f32 1.442695, %v1798_v57  ;;  %v2003_v59 = vpop.xlane.xlu1 %2002  ;;  %1379 = vadd.xlane.f32.xlu1 %v1378_v47  ;;  %1382 = vadd.xlane.f32.xlu0 %v1381_v51  ;;  %v1655_v14 = vpack.c.bf16 %v4129_v19, %v1594_v3  ;;  %v1605_v2 = vsel %vm5064_vm0, %v4033_v16, 0.0  ;;  %v1611_v47 = vsel %vm5064_vm0, %v4065_v39, 0.0 }
 0x30d   :  { %v2015_v55 = vsub.f32 %v3313_v52, %v2003_v59  ;;  %2817 = vmatprep.mubr.msk.bf16.mxu0 %vm5064_vm0, %v1879_v48  ;;  %v4139_v23 = vmul.f32 %v2974_v1, %v3326_v56  ;;  %v2976_v49 = vpop.eup %2975  ;;  %v2038_v56 = vmul.f32 1.442695, %v2024_v42  ;;  %v1614_v57 = vsel %vm5064_vm0, %v1594_v3, 0.0 }
 0x30e   :  { %2985 = vpow2.f32 %v1813_v37  ;;  %2818 = vmatmul.mubr.msk.bf16.vlgmr.msra.gmra.mrb[36].mxu0 %vm5064_vm0, %v1880_v53  ;;  %v2044_v35 = vmul.f32 %v2976_v49, %v3358_v4  ;;  %v1826_v39 = vsel %vm5064_vm0, %v4113_v32, 0.0  ;;  %v1829_v1 = vsel %vm5064_vm0, %v4106_v44, 0.0 }
 0x30f   :  { %v2023_v10 = vsel %vm386_vm10, %v2015_v55, -1e+30  ;;  %v2106_v54 = vpack.c.bf16 %v4139_v23, %v4136_v29  ;;  %2987 = vpow2.f32 %v2034_v38  ;;  %v2050_v44 = vsel %vm5064_vm0, %v4136_v29, 0.0 }
 0x310   :  { %v2036_v13 = vmul.f32 1.442695, %v2023_v10  ;;  %v2009_v46 = vpop.xlane.xlu1 %2008  ;;  %1385 = vadd.xlane.f32.xlu1 %v1384_v12  ;;  %1388 = vadd.xlane.f32.xlu0 %v1387_v62  ;;  %v2978_v0 = vpop.eup %2977  ;;  %v2056_v37 = vsel %vm5064_vm0, %v2044_v35, 0.0 }
 0x311   :  { %v2017_v24 = vsub.f32 %v3313_v52, %v2009_v46  ;;  %v2980_v31 = vpop.eup %2979  ;;  %2810 = vmatmul.mubr.msk.bf16.gmra.mrb[28].mxu1 %vm5064_vm0, %v1655_v14  ;;  %v4162_v50 = vmul.f32 %v2978_v0, %v3365_v7  ;;  %v1599_v7 = vsel %vm5064_vm0, %v4057_v15, 0.0  ;;  %v1608_v15 = vsel %vm5064_vm0, %v4081_v18, 0.0 }
 0x312   :  { %2989 = vpow2.f32 %v2036_v13  ;;  %2829 = vmatprep.mubr.msk.bf16.mxu1 %vm5064_vm0, %v2106_v54  ;;  %v1819_v26 = vmul.f32 %v2980_v31, %v3334_v58 }
 0x313   :  { %v2025_v20 = vsel %vm388_vm11, %v2017_v24, -1e+30  ;;  %2991 = vpow2.f32 %v2038_v56  ;;  %v2107_v63 = vpack.c.bf16 %v4162_v50, %v2044_v35  ;;  %v2059_v59 = vsel %vm5064_vm0, %v4162_v50, 0.0 }
 0x314   :  { %v2982_v40 = vpop.eup %2981  ;;  %v2040_v52 = vmul.f32 1.442695, %v2025_v20  ;;  %v2113_v22 = vpop.permute.xlu1 %2112  ;;  %1597 = vadd.xlane.f32.xlu0 %v1596_v45  ;;  %1391 = vadd.xlane.f32.xlu1 %v1390_v21 }
 0x315   :  { %2827 = vmatprep.subr.bf16.mxu1 %v2113_v22  ;;  %v1820_v30 = vmul.f32 %v2982_v40, %v3377_v11  ;;  %v2984_v6 = vpop.eup %2983 }
 0x316   :  { %2993 = vpow2.f32 %v2040_v52  ;;  %2828 = vmatpush3.bf16.msra.mxu1 %v2113_v22  ;;  %v1821_v27 = vmul.f32 %v2984_v6, %v3342_v61 }
 0x317   :  { %v1881_v8 = vpack.c.bf16 %v1820_v30, %v1819_v26 }
 0x318   :  { %v2986_v9 = vpop.eup %2985  ;;  %1603 = vadd.xlane.f32.xlu0 %v1602_v28  ;;  %1600 = vadd.xlane.f32.xlu1 %v1599_v7  ;;  %v1841_v38 = vsel %vm5064_vm0, %v1821_v27, 0.0 }
 0x319   :  { %2821 = vmatprep.mubr.msk.bf16.mxu0 %vm5064_vm0, %v1881_v8  ;;  %v1822_v4 = vmul.f32 %v2986_v9, %v3390_v17  ;;  %v2988_v33 = vpop.eup %2987  ;;  %2830 = vmatmul.mubr.msk.bf16.vlgmr.msra.gmra.mrb[32].mxu1 %vm5064_vm0, %v2107_v63 }
 0x31a   :  { %v2046_v5 = vmul.f32 %v2988_v33, %v3334_v58  ;;  %v1617_v58 = vsel %vm5064_vm0, %v4129_v19, 0.0 }
 0x31b   :  { %v1882_v34 = vpack.c.bf16 %v1822_v4, %v1821_v27  ;;  %v1844_v32 = vsel %vm5064_vm0, %v1822_v4, 0.0 }
 0x31c   :  { %v2990_v43 = vpop.eup %2989  ;;  %1606 = vadd.xlane.f32.xlu1 %v1605_v2  ;;  %1609 = vadd.xlane.f32.xlu0 %v1608_v15  ;;  %v2062_v19 = vsel %vm5064_vm0, %v2046_v5, 0.0 }
 0x31d   :  { %2822 = vmatmul.mubr.msk.bf16.gmra.mrb[40].mxu0 %vm5064_vm0, %v1882_v34  ;;  %v2047_v60 = vmul.f32 %v2990_v43, %v3377_v11  ;;  %v2992_v36 = vpop.eup %2991  ;;  %v1823_v11 = vsel %vm5064_vm0, %v4103_v41, 0.0  ;;  %v1838_v41 = vsel %vm5064_vm0, %v1820_v30, 0.0 }
 0x31e   :  { %v2048_v18 = vmul.f32 %v2992_v36, %v3342_v61  ;;  %v1832_v61 = vsel %vm5064_vm0, %v4098_v25, 0.0  ;;  %v2053_v25 = vsel %vm5064_vm0, %v4139_v23, 0.0 }
 0x31f   :  { %v2108_v16 = vpack.c.bf16 %v2047_v60, %v2046_v5  ;;  %v2065_v42 = vsel %vm5064_vm0, %v2047_v60, 0.0 }
 0x320   :  { %v2994_v51 = vpop.eup %2993  ;;  %1612 = vadd.xlane.f32.xlu1 %v1611_v47  ;;  %1615 = vadd.xlane.f32.xlu0 %v1614_v57  ;;  %v2068_v55 = vsel %vm5064_vm0, %v2048_v18, 0.0 }
 0x321   :  { %2833 = vmatprep.mubr.msk.bf16.mxu1 %vm5064_vm0, %v2108_v16  ;;  %v2049_v48 = vmul.f32 %v2994_v51, %v3390_v17  ;;  %v1835_v17 = vsel %vm5064_vm0, %v1819_v26, 0.0 }
 0x323   :  { %v2109_v53 = vpack.c.bf16 %v2049_v48, %v2048_v18  ;;  %v2071_v23 = vsel %vm5064_vm0, %v2049_v48, 0.0 }
 0x324   :  { %1618 = vadd.xlane.f32.xlu1 %v1617_v58  ;;  %1824 = vadd.xlane.f32.xlu0 %v1823_v11 }
 0x325   :  { %2834 = vmatmul.mubr.msk.bf16.gmra.mrb[36].mxu1 %vm5064_vm0, %v2109_v53 }
 0x328   :  { %1827 = vadd.xlane.f32.xlu1 %v1826_v39  ;;  %1830 = vadd.xlane.f32.xlu0 %v1829_v1 }
 0x32c   :  { %1833 = vadd.xlane.f32.xlu1 %v1832_v61  ;;  %1836 = vadd.xlane.f32.xlu0 %v1835_v17 }
 0x330   :  { %1839 = vadd.xlane.f32.xlu1 %v1838_v41  ;;  %1842 = vadd.xlane.f32.xlu0 %v1841_v38 }
 0x334   :  { %1845 = vadd.xlane.f32.xlu1 %v1844_v32  ;;  %2051 = vadd.xlane.f32.xlu0 %v2050_v44 }
 0x338   :  { %2054 = vadd.xlane.f32.xlu1 %v2053_v25  ;;  %2057 = vadd.xlane.f32.xlu0 %v2056_v37 }
 0x339   :  { %v4214_v29 = vpop.xlane.xlu0 %466 }
 0x33c   :  { %2060 = vadd.xlane.f32.xlu1 %v2059_v59  ;;  %2063 = vadd.xlane.f32.xlu0 %v2062_v19 }
 0x33d   :  { %v4217_v3 = vpop.xlane.xlu0 %472 }
 0x340   :  { %2066 = vadd.xlane.f32.xlu1 %v2065_v42  ;;  %2069 = vadd.xlane.f32.xlu0 %v2068_v55 }
 0x341   :  { %v4219_v10 = vpop.xlane.xlu0 %478 }
 0x344   :  { %2072 = vadd.xlane.f32.xlu1 %v2071_v23 }
 0x345   :  { %v4221_v12 = vpop.xlane.xlu1 %469  ;;  %v4223_v62 = vpop.xlane.xlu0 %484 }
 0x346   :  { %vm5066_vm2 = vcmp.gt.f32.partialorder %v4221_v12, 0.0  ;;  %vm495_vm0 = vcmp.gt.f32.partialorder %v4223_v62, 0.0 }
 0x349   :  { %v4225_v54 = vpop.xlane.xlu1 %475  ;;  %v688_v49 = vpop.xlane.xlu0 %687 }
 0x34a   :  { %vm710_vm13 = vcmp.gt.f32.partialorder %v688_v49, 0.0 }
 0x34b   :  { %v718_v7 = vsel %vm710_vm13, %v688_v49, 1.0 }
 0x34d   :  { %v4227_v56 = vpop.xlane.xlu1 %481  ;;  %v694_v13 = vpop.xlane.xlu0 %693 }
 0x34e   :  { %vm712_vm12 = vcmp.gt.f32.partialorder %v694_v13, 0.0 }
 0x34f   :  { %v720_v35 = vsel %vm712_vm12, %v694_v13, 1.0 }
 0x350   :  { %2995 = vrcp.f32 %v720_v35 }
 0x351   :  { %v4229_v46 = vpop.xlane.xlu1 %487  ;;  %v4231_v14 = vpop.xlane.xlu0 %699  ;;  %2997 = vrcp.f32 %v718_v7 }
 0x352   :  { %vm714_vm3 = vcmp.gt.f32.partialorder %v4231_v14, 0.0 }
 0x353   :  { %v722_v36 = vsel %vm714_vm3, %v4231_v14, 1.0 }
 0x355   :  { %v4233_v0 = vpop.xlane.xlu1 %690  ;;  %v4235_v24 = vpop.xlane.xlu0 %705 }
 0x356   :  { %vm711_vm15 = vcmp.gt.f32.partialorder %v4233_v0, 0.0  ;;  %vm716_vm1 = vcmp.gt.f32.partialorder %v4235_v24, 0.0 }
 0x357   :  { %v719_v2 = vsel %vm711_vm15, %v4233_v0, 1.0  ;;  %v724_v34 = vsel %vm716_vm1, %v4235_v24, 1.0 }
 0x359   :  { %v4237_v31 = vpop.xlane.xlu1 %696  ;;  %v4239_v20 = vpop.xlane.xlu0 %916 }
 0x35a   :  { %vm713_vm14 = vcmp.gt.f32.partialorder %v4237_v31, 0.0  ;;  %v2996_v16 = vpop.eup %2995  ;;  %vm939_vm10 = vcmp.gt.f32.partialorder %v4239_v20, 0.0 }
 0x35b   :  { %v721_v27 = vsel %vm713_vm14, %v4237_v31, 1.0  ;;  %v2998_v18 = vpop.eup %2997  ;;  %v736_v48 = vsel %vm712_vm12, %v2996_v16, 0.0 }
 0x35c   :  { %2999 = vrcp.f32 %v721_v27  ;;  %v734_v61 = vsel %vm710_vm13, %v2998_v18, 0.0 }
 0x35d   :  { %v4241_v45 = vpop.xlane.xlu1 %702  ;;  %3001 = vrcp.f32 %v719_v2 }
 0x35e   :  { %3003 = vrcp.f32 %v724_v34  ;;  %vm715_vm5 = vcmp.gt.f32.partialorder %v4241_v45, 0.0 }
 0x35f   :  { %3005 = vrcp.f32 %v722_v36  ;;  %v723_v11 = vsel %vm715_vm5, %v4241_v45, 1.0 }
 0x361   :  { %v4243_v21 = vpop.xlane.xlu0 %922  ;;  %v4245_v40 = vpop.xlane.xlu1 %708 }
 0x362   :  { %vm717_vm4 = vcmp.gt.f32.partialorder %v4245_v40, 0.0  ;;  %vm941_vm6 = vcmp.gt.f32.partialorder %v4243_v21, 0.0 }
 0x363   :  { %v725_v57 = vsel %vm717_vm4, %v4245_v40, 1.0  ;;  %v949_v34 = vsel %vm941_vm6, %v4243_v21, 1.0 }
 0x364   :  { %3007 = vrcp.f32 %v725_v57 }
 0x365   :  { %v4247_v50 = vpop.xlane.xlu0 %925  ;;  %v4249_v52 = vpop.xlane.xlu1 %919  ;;  %3009 = vrcp.f32 %v723_v11 }
 0x366   :  { %v3000_v53 = vpop.eup %2999  ;;  %vm942_vm7 = vcmp.gt.f32.partialorder %v4247_v50, 0.0  ;;  %3011 = vrcp.f32 %v949_v34  ;;  %vm940_vm11 = vcmp.gt.f32.partialorder %v4249_v52, 0.0 }
 0x367   :  { %v3002_v25 = vpop.eup %3001  ;;  %v737_v37 = vsel %vm713_vm14, %v3000_v53, 0.0  ;;  %v950_v0 = vsel %vm942_vm7, %v4247_v50, 1.0 }
 0x368   :  { %v3004_v59 = vpop.eup %3003  ;;  %v735_v23 = vsel %vm711_vm15, %v3002_v25, 0.0  ;;  %3013 = vrcp.f32 %v950_v0 }
 0x369   :  { %v3006_v55 = vpop.eup %3005  ;;  %v740_v49 = vsel %vm716_vm1, %v3004_v59, 0.0 }
 0x36a   :  { %v738_v24 = vsel %vm714_vm3, %v3006_v55, 0.0 }
 0x36e   :  { %v3008_v31 = vpop.eup %3007 }
 0x36f   :  { %v741_v16 = vsel %vm717_vm4, %v3008_v31, 0.0  ;;  %v3010_v18 = vpop.eup %3009 }
 0x370   :  { %v739_v14 = vsel %vm715_vm5, %v3010_v18, 0.0 }
 0x375   :  { %v4251_v22 = vpop.xlane.xlu0 %928 }
 0x376   :  { %vm943_vm4 = vcmp.gt.f32.partialorder %v4251_v22, 0.0 }
 0x379   :  { %v4253_v26 = vpop.xlane.xlu1 %931 }
 0x37a   :  { %vm944_vm5 = vcmp.gt.f32.partialorder %v4253_v26, 0.0 }
 0x37d   :  { %v4255_v30 = vpop.xlane.xlu0 %934 }
 0x37e   :  { %vm945_vm14 = vcmp.gt.f32.partialorder %v4255_v30, 0.0 }
 0x381   :  { %v4260_v28 = vpop.xlane.xlu1 %937  ;;  %v4274_v4 = vpop.xlane.xlu0 %1143 }
 0x382   :  { %vm1166_vm12 = vcmp.gt.f32.partialorder %v4274_v4, 0.0  ;;  %vm946_vm15 = vcmp.gt.f32.partialorder %v4260_v28, 0.0 }
 0x384   :  { %v4257_v6 = vpop.f32.mrb[12].mxu0 }
 0x385   :  { %v4264_v8 = vpop.f32.mrb[13].mxu0  ;;  %v4277_v33 = vpop.xlane.xlu1 %1146 }
 0x386   :  { %v4266_v9 = vpop.f32.mrb[14].mxu0  ;;  %v4291_v5 = vpop.xlane.xlu0 %1149  ;;  %vm1167_vm13 = vcmp.gt.f32.partialorder %v4277_v33, 0.0 }
 0x387   :  { %v4268_v63 = vpop.f32.mrb[15].mxu0  ;;  %vm1168_vm8 = vcmp.gt.f32.partialorder %v4291_v5, 0.0 }
 0x389   :  { %v4303_v51 = vpop.xlane.xlu1 %1152 }
 0x38a   :  { %v4310_v39 = vpop.xlane.xlu0 %1155  ;;  %vm1169_vm9 = vcmp.gt.f32.partialorder %v4303_v51, 0.0 }
 0x38b   :  { %v1177_v45 = vsel %vm1169_vm9, %v4303_v51, 1.0 }
 0x38c   :  { %v4282_v15 = vpop.f32.mrb[16].mxu0 }
 0x38d   :  { %v4289_v43 = vpop.f32.mrb[17].mxu0  ;;  %v4313_v32 = vpop.xlane.xlu1 %1158 }
 0x38e   :  { %v4293_v60 = vpop.f32.mrb[18].mxu0  ;;  %v4320_v42 = vpop.xlane.xlu0 %1161 }
 0x38f   :  { %v4298_v47 = vpop.f32.mrb[19].mxu0  ;;  %vm1172_vm1 = vcmp.gt.f32.partialorder %v4320_v42, 0.0 }
 0x390   :  { %5068 = vst [vmem:[#allocation5_spill] sm:$0xff] %v4298_v47 }
 0x391   :  { %v4328_v35 = vpop.xlane.xlu1 %1164 }
 0x392   :  { %vm1173_vm3 = vcmp.gt.f32.partialorder %v4328_v35, 0.0 }
 0x394   :  { %v2759_v58 = vpop.f32.mrb[8].mxu1 }
 0x395   :  { %v833_v1 = vmul.f32 %v2759_v58, %v736_v48  ;;  %v800_v17 = vpop.f32.mrb[9].mxu1  ;;  %v4342_v48 = vpop.xlane.xlu0 %1370 }
 0x396   :  { %v831_v41 = vmul.f32 %v800_v17, %v734_v61  ;;  %v2760_v38 = vpop.f32.mrb[10].mxu1  ;;  %v4344_v53 = vpop.xlane.xlu1 %1373  ;;  %v1176_v61 = vsel %vm1168_vm8, %v4291_v5, 1.0 }
 0x397   :  { %v803_v44 = vpop.f32.mrb[11].mxu1  ;;  %2213 = vrot.lane.b32.xlu1 %v833_v1, %s3171_s9  ;;  %v834_v19 = vmul.f32 %v2760_v38, %v737_v37  ;;  %3015 = vrcp.f32 %v1176_v61 }
 0x398   :  { %2209 = vrot.lane.b32.xlu0 %v831_v41, %s3171_s9  ;;  %v832_v7 = vmul.f32 %v803_v44, %v735_v23  ;;  %v3012_v41 = vpop.eup %3011  ;;  %v947_v44 = vsel %vm939_vm10, %v4239_v20, 1.0  ;;  %3017 = vrcp.f32 %v1177_v45  ;;  %v948_v23 = vsel %vm940_vm11, %v4249_v52, 1.0 }
 0x399   :  { %v4351_v40 = vpop.xlane.xlu0 %1376  ;;  %v3014_v38 = vpop.eup %3013  ;;  %v965_v37 = vsel %vm941_vm6, %v3012_v41, 0.0  ;;  %3019 = vrcp.f32 %v947_v44  ;;  %v954_v44 = vsel %vm946_vm15, %v4260_v28, 1.0  ;;  %vm1170_vm6 = vcmp.gt.f32.partialorder %v4310_v39, 0.0 }
 0x39a   :  { %v4358_v17 = vpop.xlane.xlu1 %1379  ;;  %3021 = vrcp.f32 %v948_v23 }
 0x39b   :  { %2215 = vrot.lane.b32.xlu1 %v834_v19, %s3171_s9 }
 0x39c   :  { %v2763_v13 = vpop.f32.mrb[12].mxu1 }
 0x39d   :  { %v837_v27 = vmul.f32 %v2763_v13, %v740_v49  ;;  %v816_v2 = vpop.f32.mrb[13].mxu1  ;;  %v4368_v25 = vpop.xlane.xlu0 %1382  ;;  %v966_v13 = vsel %vm942_vm7, %v3014_v38, 0.0  ;;  %vm1171_vm7 = vcmp.gt.f32.partialorder %v4313_v32, 0.0 }
 0x39e   :  { %v2764_v36 = vpop.f32.mrb[14].mxu1  ;;  %v835_v58 = vmul.f32 %v816_v2, %v738_v24  ;;  %v4376_v49 = vpop.xlane.xlu1 %1385  ;;  %v1175_v2 = vsel %vm1167_vm13, %v4277_v33, 1.0  ;;  %v1181_v33 = vsel %vm1173_vm3, %v4328_v35, 1.0  ;;  %v1179_v28 = vsel %vm1171_vm7, %v4313_v32, 1.0 }
 0x39f   :  { %v819_v57 = vpop.f32.mrb[15].mxu1  ;;  %2211 = vrot.lane.b32.xlu1 %v832_v7, %s3171_s9  ;;  %2221 = vrot.lane.b32.xlu0 %v837_v27, %s3171_s9  ;;  %v838_v11 = vmul.f32 %v2764_v36, %v741_v16  ;;  %v1174_v27 = vsel %vm1166_vm12, %v4274_v4, 1.0  ;;  %v1180_v4 = vsel %vm1172_vm1, %v4320_v42, 1.0 }
 0x3a0   :  { %v836_v1 = vmul.f32 %v819_v57, %v739_v14  ;;  %3023 = vrcp.f32 %v1174_v27  ;;  %v953_v14 = vsel %vm945_vm14, %v4255_v30, 1.0  ;;  %v952_v30 = vsel %vm944_vm5, %v4253_v26, 1.0 }
 0x3a1   :  { %v4389_v50 = vpop.xlane.xlu0 %1388  ;;  %v3016_v34 = vpop.eup %3015  ;;  %3025 = vrcp.f32 %v1175_v2 }
 0x3a2   :  { %v4391_v36 = vpop.xlane.xlu1 %1391  ;;  %v3018_v57 = vpop.eup %3017  ;;  %v1192_v0 = vsel %vm1168_vm8, %v3016_v34, 0.0  ;;  %3027 = vrcp.f32 %v953_v14  ;;  %vm1395_vm8 = vcmp.gt.f32.partialorder %v4351_v40, 0.0 }
 0x3a3   :  { %2223 = vrot.lane.b32.xlu1 %v838_v11, %s3171_s9  ;;  %2217 = vrot.lane.b32.xlu0 %v835_v58, %s3171_s9  ;;  %v3020_v16 = vpop.eup %3019  ;;  %3029 = vrcp.f32 %v954_v44  ;;  %v1178_v44 = vsel %vm1170_vm6, %v4310_v39, 1.0 }
 0x3a4   :  { %v3022_v41 = vpop.eup %3021  ;;  %3031 = vrcp.f32 %v1180_v4 }
 0x3a5   :  { %v4397_v18 = vpop.xlane.xlu0 %1597  ;;  %v964_v51 = vsel %vm940_vm11, %v3022_v41, 0.0  ;;  %3033 = vrcp.f32 %v1181_v33 }
 0x3a6   :  { %v4404_v45 = vpop.xlane.xlu1 %1600 }
 0x3a7   :  { %2219 = vrot.lane.b32.xlu1 %v836_v1, %s3171_s9  ;;  %v1193_v1 = vsel %vm1169_vm9, %v3018_v57, 0.0  ;;  %vm1396_vm9 = vcmp.gt.f32.partialorder %v4358_v17, 0.0 }
 0x3aa   :  { %v4420_v20 = vpop.xlane.xlu1 %1606 }
 0x3ab   :  { %vm1623_vm11 = vcmp.gt.f32.partialorder %v4420_v20, 0.0 }
 0x3ac   :  { %v2771_v59 = vpop.f32.mrb[20].mxu0 }
 0x3ad   :  { %v1060_v19 = vmul.f32 %v2771_v59, %v965_v37  ;;  %v1027_v55 = vpop.f32.mrb[21].mxu0  ;;  %v963_v37 = vsel %vm939_vm10, %v3020_v16, 0.0  ;;  %v3024_v59 = vpop.eup %3023  ;;  %v951_v16 = vsel %vm943_vm4, %v4251_v22, 1.0 }
 0x3ae   :  { %v2772_v31 = vpop.f32.mrb[22].mxu0  ;;  %v3026_v23 = vpop.eup %3025  ;;  %3035 = vrcp.f32 %v951_v16  ;;  %v1631_v16 = vsel %vm1623_vm11, %v4420_v20, 1.0 }
 0x3af   :  { %v1061_v21 = vmul.f32 %v2772_v31, %v966_v13  ;;  %2245 = vrot.lane.b32.xlu0 %v1060_v19, %s3169_s8  ;;  %v1030_v7 = vpop.f32.mrb[23].mxu0  ;;  %v1058_v19 = vmul.f32 %v1027_v55, %v963_v37  ;;  %v4415_v13 = vpop.xlane.xlu0 %1603  ;;  %v1191_v52 = vsel %vm1167_vm13, %v3026_v23, 0.0  ;;  %3037 = vrcp.f32 %v952_v30 }
 0x3b0   :  { %v1059_v31 = vmul.f32 %v1030_v7, %v964_v51  ;;  %v3028_v2 = vpop.eup %3027  ;;  %v4438_v34 = vpop.xlane.xlu1 %1612  ;;  %3039 = vrcp.f32 %v1178_v44  ;;  %v1403_v37 = vsel %vm1395_vm8, %v4351_v40, 1.0  ;;  %vm1622_vm10 = vcmp.gt.f32.partialorder %v4415_v13, 0.0 }
 0x3b1   :  { %2247 = vrot.lane.b32.xlu1 %v1061_v21, %s3169_s8  ;;  %v1190_v21 = vsel %vm1166_vm12, %v3024_v59, 0.0  ;;  %v3030_v57 = vpop.eup %3029  ;;  %3041 = vrcp.f32 %v1179_v28  ;;  %v1630_v4 = vsel %vm1622_vm10, %v4415_v13, 1.0  ;;  %vm1393_vm12 = vcmp.gt.f32.partialorder %v4342_v48, 0.0 }
 0x3b2   :  { %v3032_v51 = vpop.eup %3031  ;;  %3043 = vrcp.f32 %v1403_v37  ;;  %vm1394_vm13 = vcmp.gt.f32.partialorder %v4344_v53, 0.0  ;;  %v1401_v44 = vsel %vm1393_vm12, %v4342_v48, 1.0 }
 0x3b3   :  { %v4431_v7 = vpop.xlane.xlu0 %1609 }
 0x3b7   :  { %v4447_v14 = vpop.xlane.xlu0 %1615 }
 0x3b8   :  { %v2783_v24 = vpop.f32.mrb[16].mxu1 }
 0x3b9   :  { %v1287_v58 = vmul.f32 %v2783_v24, %v1192_v0  ;;  %v1254_v11 = vpop.f32.mrb[17].mxu1  ;;  %v969_v0 = vsel %vm945_vm14, %v3028_v2, 0.0  ;;  %v1196_v2 = vsel %vm1172_vm1, %v3032_v51, 0.0  ;;  %vm1620_vm14 = vcmp.gt.f32.partialorder %v4397_v18, 0.0 }
 0x3ba   :  { %v2784_v61 = vpop.f32.mrb[18].mxu1  ;;  %v1285_v27 = vmul.f32 %v1254_v11, %v1190_v21  ;;  %vm1399_vm1 = vcmp.gt.f32.partialorder %v4389_v50, 0.0 }
 0x3bb   :  { %v1288_v5 = vmul.f32 %v2784_v61, %v1193_v1  ;;  %v1257_v38 = vpop.f32.mrb[19].mxu1  ;;  %2277 = vrot.lane.b32.xlu0 %v1287_v58, %s3170_s6  ;;  %v970_v1 = vsel %vm946_vm15, %v3030_v57, 0.0  ;;  %v4470_v59 = vpop.xlane.xlu0 %1824  ;;  %vm1621_vm15 = vcmp.gt.f32.partialorder %v4404_v45, 0.0 }
 0x3bc   :  { %v1286_v55 = vmul.f32 %v1257_v38, %v1191_v52  ;;  %v4456_v38 = vpop.xlane.xlu1 %1618  ;;  %v3034_v52 = vpop.eup %3033 }
 0x3bd   :  { %2279 = vrot.lane.b32.xlu1 %v1288_v5, %s3170_s6  ;;  %v3036_v57 = vpop.eup %3035 }
 0x3be   :  { %v3038_v30 = vpop.eup %3037  ;;  %v967_v37 = vsel %vm943_vm4, %v3036_v57, 0.0  ;;  %vm1626_vm4 = vcmp.gt.f32.partialorder %v4447_v14, 0.0 }
 0x3bf   :  { %2241 = vrot.lane.b32.xlu0 %v1058_v19, %s3169_s8  ;;  %v3040_v51 = vpop.eup %3039 }
 0x3c0   :  { %v4480_v21 = vpop.xlane.xlu1 %1827  ;;  %v1194_v26 = vsel %vm1170_vm6, %v3040_v51, 0.0  ;;  %vm1397_vm6 = vcmp.gt.f32.partialorder %v4368_v25, 0.0 }
 0x3c1   :  { %2243 = vrot.lane.b32.xlu1 %v1059_v31, %s3169_s8  ;;  %v1404_v31 = vsel %vm1396_vm9, %v4358_v17, 1.0 }
 0x3c2   :  { %3045 = vrcp.f32 %v1404_v31 }
 0x3c3   :  { %2273 = vrot.lane.b32.xlu0 %v1285_v27, %s3170_s6  ;;  %3047 = vrcp.f32 %v1630_v4  ;;  %v1402_v4 = vsel %vm1394_vm13, %v4344_v53, 1.0 }
 0x3c4   :  { %v4505_v28 = vpop.xlane.xlu1 %1833  ;;  %3049 = vrcp.f32 %v1631_v16 }
 0x3c5   :  { %2275 = vrot.lane.b32.xlu1 %v1286_v55, %s3170_s6  ;;  %3051 = vrcp.f32 %v1401_v44 }
 0x3c6   :  { %3053 = vrcp.f32 %v1402_v4  ;;  %v1407_v4 = vsel %vm1399_vm1, %v4389_v50, 1.0 }
 0x3c8   :  { %v2775_v24 = vpop.f32.mrb[24].mxu0  ;;  %v4540_v44 = vpop.xlane.xlu1 %1839 }
 0x3c9   :  { %v1064_v58 = vmul.f32 %v2775_v24, %v969_v0  ;;  %v1043_v11 = vpop.f32.mrb[25].mxu0 }
 0x3ca   :  { %v2776_v61 = vpop.f32.mrb[26].mxu0  ;;  %v1062_v31 = vmul.f32 %v1043_v11, %v967_v37 }
 0x3cb   :  { %v1065_v41 = vmul.f32 %v2776_v61, %v970_v1  ;;  %2253 = vrot.lane.b32.xlu0 %v1064_v58, %s3169_s8  ;;  %v1046_v5 = vpop.f32.mrb[27].mxu0  ;;  %v4496_v58 = vpop.xlane.xlu0 %1830  ;;  %v1197_v1 = vsel %vm1173_vm3, %v3034_v52, 0.0  ;;  %vm1400_vm3 = vcmp.gt.f32.partialorder %v4391_v36, 0.0 }
 0x3cd   :  { %2255 = vrot.lane.b32.xlu1 %v1065_v41, %s3169_s8 }
 0x3cf   :  { %v4529_v16 = vpop.xlane.xlu0 %1836 }
 0x3d0   :  { %v4472_v19 = vpop.f32.mrb[28].mxu0 }
 0x3d1   :  { %v4475_v23 = vpop.f32.mrb[29].mxu0 }
 0x3d2   :  { %v4482_v27 = vpop.f32.mrb[30].mxu0 }
 0x3d3   :  { %v4485_v55 = vpop.f32.mrb[31].mxu0 }
 0x3d4   :  { %v2787_v33 = vpop.f32.mrb[20].mxu1 }
 0x3d5   :  { %v1291_v0 = vmul.f32 %v2787_v33, %v1196_v2  ;;  %v1270_v24 = vpop.f32.mrb[21].mxu1  ;;  %v968_v2 = vsel %vm944_vm5, %v3038_v30, 0.0  ;;  %v3042_v33 = vpop.eup %3041  ;;  %vm1627_vm5 = vcmp.gt.f32.partialorder %v4456_v38, 0.0 }
 0x3d6   :  { %v2788_v61 = vpop.f32.mrb[22].mxu1  ;;  %v1063_v57 = vmul.f32 %v1046_v5, %v968_v2  ;;  %v1289_v30 = vmul.f32 %v1270_v24, %v1194_v26  ;;  %v1195_v39 = vsel %vm1171_vm7, %v3042_v33, 0.0  ;;  %v4563_v26 = vpop.xlane.xlu0 %1842  ;;  %vm1398_vm7 = vcmp.gt.f32.partialorder %v4376_v49, 0.0 }
 0x3d7   :  { %v1292_v42 = vmul.f32 %v2788_v61, %v1197_v1  ;;  %v1273_v41 = vpop.f32.mrb[23].mxu1  ;;  %2285 = vrot.lane.b32.xlu0 %v1291_v0, %s3170_s6  ;;  %v1628_v0 = vsel %vm1620_vm14, %v4397_v18, 1.0  ;;  %v3044_v61 = vpop.eup %3043 }
 0x3d8   :  { %v4509_v35 = vpop.f32.mrb[32].mxu0  ;;  %v3046_v51 = vpop.eup %3045  ;;  %3055 = vrcp.f32 %v1628_v0  ;;  %v1419_v2 = vsel %vm1395_vm8, %v3044_v61, 0.0  ;;  %v1408_v0 = vsel %vm1400_vm3, %v4391_v36, 1.0  ;;  %vm1624_vm8 = vcmp.gt.f32.partialorder %v4431_v7, 0.0 }
 0x3d9   :  { %2287 = vrot.lane.b32.xlu1 %v1292_v42, %s3170_s6  ;;  %v4513_v52 = vpop.f32.mrb[33].mxu0  ;;  %v1629_v42 = vsel %vm1621_vm15, %v4404_v45, 1.0  ;;  %v3048_v32 = vpop.eup %3047  ;;  %v1514_v33 = vmul.f32 %v4472_v19, %v1419_v2  ;;  %v1420_v40 = vsel %vm1396_vm9, %v3046_v51, 0.0  ;;  %vm1625_vm9 = vcmp.gt.f32.partialorder %v4438_v34, 0.0 }
 0x3da   :  { %v4520_v22 = vpop.f32.mrb[34].mxu0  ;;  %3057 = vrcp.f32 %v1629_v42  ;;  %v1515_v19 = vmul.f32 %v4482_v27, %v1420_v40  ;;  %v1646_v17 = vsel %vm1622_vm10, %v3048_v32, 0.0  ;;  %vm1849_vm10 = vcmp.gt.f32.partialorder %v4496_v58, 0.0 }
 0x3db   :  { %2249 = vrot.lane.b32.xlu0 %v1062_v31, %s3169_s8  ;;  %v4524_v11 = vpop.f32.mrb[35].mxu0  ;;  %v1290_v31 = vmul.f32 %v1273_v41, %v1195_v39  ;;  %3059 = vrcp.f32 %v1407_v4  ;;  %v1634_v39 = vsel %vm1626_vm4, %v4447_v14, 1.0  ;;  %v1857_v45 = vsel %vm1849_vm10, %v4496_v58, 1.0 }
 0x3dc   :  { %v2807_v1 = vpop.f32.mrb[24].mxu1  ;;  %3061 = vrcp.f32 %v1408_v0 }
 0x3dd   :  { %v4534_v5 = vpop.f32.mrb[25].mxu1  ;;  %2251 = vrot.lane.b32.xlu1 %v1063_v57, %s3169_s8  ;;  %v1741_v27 = vmul.f32 %v2807_v1, %v1646_v17  ;;  %3063 = vrcp.f32 %v1634_v39  ;;  %v1405_v1 = vsel %vm1397_vm6, %v4368_v25, 1.0 }
 0x3de   :  { %v2808_v37 = vpop.f32.mrb[26].mxu1 }
 0x3df   :  { %v4545_v24 = vpop.f32.mrb[27].mxu1  ;;  %2281 = vrot.lane.b32.xlu0 %v1289_v30, %s3170_s6  ;;  %v3050_v30 = vpop.eup %3049 }
 0x3e0   :  { %v3052_v4 = vpop.eup %3051  ;;  %v1647_v40 = vsel %vm1623_vm11, %v3050_v30, 0.0  ;;  %vm1850_vm11 = vcmp.gt.f32.partialorder %v4505_v28, 0.0 }
 0x3e1   :  { %v4553_v57 = vpop.f32.mrb[36].mxu0  ;;  %2283 = vrot.lane.b32.xlu1 %v1290_v31, %s3170_s6  ;;  %v4577_v31 = vpop.xlane.xlu1 %1845  ;;  %v1742_v47 = vmul.f32 %v2808_v37, %v1647_v40  ;;  %v1417_v20 = vsel %vm1393_vm12, %v3052_v4, 0.0  ;;  %v1406_v37 = vsel %vm1398_vm7, %v4376_v49, 1.0  ;;  %vm489_vm12 = vcmp.gt.f32.partialorder %v4214_v29, 0.0 }
 0x3e2   :  { %v4558_v41 = vpop.f32.mrb[37].mxu0  ;;  %v3054_v32 = vpop.eup %3053  ;;  %v1512_v39 = vmul.f32 %v4475_v23, %v1417_v20 }
 0x3e3   :  { %v4567_v61 = vpop.f32.mrb[38].mxu0  ;;  %2309 = vrot.lane.b32.xlu0 %v1514_v33, %s3168_s28  ;;  %v1635_v33 = vsel %vm1627_vm5, %v4456_v38, 1.0  ;;  %v3056_v30 = vpop.eup %3055 }
 0x3e4   :  { %v4572_v42 = vpop.f32.mrb[39].mxu0  ;;  %v4581_v51 = vpop.f32.mrb[28].mxu1  ;;  %3065 = vrcp.f32 %v1635_v33  ;;  %v1644_v23 = vsel %vm1620_vm14, %v3056_v30, 0.0  ;;  %vm491_vm14 = vcmp.gt.f32.partialorder %v4217_v3, 0.0 }
 0x3e5   :  { %v4584_v2 = vpop.f32.mrb[29].mxu1  ;;  %2311 = vrot.lane.b32.xlu1 %v1515_v19, %s3168_s28  ;;  %v4601_v19 = vpop.xlane.xlu0 %2051  ;;  %3067 = vrcp.f32 %v1405_v1  ;;  %v1739_v53 = vmul.f32 %v4534_v5, %v1644_v23 }
 0x3e6   :  { %v4592_v13 = vpop.f32.mrb[30].mxu1  ;;  %v4611_v17 = vpop.xlane.xlu1 %2054  ;;  %3069 = vrcp.f32 %v1406_v37 }
 0x3e7   :  { %v4595_v0 = vpop.f32.mrb[31].mxu1  ;;  %2341 = vrot.lane.b32.xlu0 %v1741_v27, %s3167_s27  ;;  %v1418_v27 = vsel %vm1394_vm13, %v3054_v32, 0.0  ;;  %v3058_v40 = vpop.eup %3057 }
 0x3e8   :  { %v1513_v48 = vmul.f32 %v4485_v55, %v1418_v27  ;;  %v3060_v33 = vpop.eup %3059  ;;  %v1633_v55 = vsel %vm1625_vm9, %v4438_v34, 1.0  ;;  %v1645_v18 = vsel %vm1621_vm15, %v3058_v40, 0.0 }
 0x3e9   :  { %2343 = vrot.lane.b32.xlu1 %v1742_v47, %s3167_s27  ;;  %v1632_v47 = vsel %vm1624_vm8, %v4431_v7, 1.0  ;;  %v4633_v1 = vpop.xlane.xlu0 %2057  ;;  %v3062_v30 = vpop.eup %3061  ;;  %v1740_v5 = vmul.f32 %v4545_v24, %v1645_v18  ;;  %v1423_v40 = vsel %vm1399_vm1, %v3060_v33, 0.0  ;;  %vm1847_vm1 = vcmp.gt.f32.partialorder %v4470_v59, 0.0 }
 0x3ea   :  { %3071 = vrcp.f32 %v1632_v47  ;;  %v4650_v27 = vpop.xlane.xlu1 %2060  ;;  %v3064_v24 = vpop.eup %3063  ;;  %vm2076_vm13 = vcmp.gt.f32.partialorder %v4633_v1, 0.0  ;;  %v1518_v47 = vmul.f32 %v4509_v35, %v1423_v40  ;;  %v1424_v50 = vsel %vm1400_vm3, %v3062_v30, 0.0 }
 0x3eb   :  { %2305 = vrot.lane.b32.xlu0 %v1512_v39, %s3168_s28  ;;  %3073 = vrcp.f32 %v1633_v55  ;;  %v497_v35 = vsel %vm489_vm12, %v4214_v29, 1.0  ;;  %vm2077_vm15 = vcmp.gt.f32.partialorder %v4650_v27, 0.0  ;;  %v1519_v18 = vmul.f32 %v4520_v22, %v1424_v50 }
 0x3ec   :  { %v4623_v4 = vpop.f32.mrb[32].mxu1  ;;  %3075 = vrcp.f32 %v1857_v45  ;;  %v1650_v36 = vsel %vm1626_vm4, %v3064_v24, 0.0  ;;  %v499_v40 = vsel %vm491_vm14, %v4217_v3, 1.0  ;;  %vm492_vm3 = vcmp.gt.f32.partialorder %v4225_v54, 0.0 }
 0x3ed   :  { %v4627_v32 = vpop.f32.mrb[33].mxu1  ;;  %2307 = vrot.lane.b32.xlu1 %v1513_v48, %s3168_s28  ;;  %v1745_v45 = vmul.f32 %v4581_v51, %v1650_v36  ;;  %v2085_v14 = vsel %vm2077_vm15, %v4650_v27, 1.0  ;;  %vm5065_vm4 = vcmp.gt.f32.partialorder %v4480_v21, 0.0 }
 0x3ee   :  { %v4637_v20 = vpop.f32.mrb[34].mxu1  ;;  %v3066_v55 = vpop.eup %3065  ;;  %v1856_v25 = vsel %vm5065_vm4, %v4480_v21, 1.0  ;;  %vm5067_vm4 = vcmp.gt.f32.partialorder %v4219_v10, 0.0 }
 0x3ef   :  { %v4641_v39 = vpop.f32.mrb[35].mxu1  ;;  %2337 = vrot.lane.b32.xlu0 %v1739_v53, %s3167_s27  ;;  %v1858_v53 = vsel %vm1850_vm11, %v4505_v28, 1.0  ;;  %v3068_v30 = vpop.eup %3067  ;;  %v1651_v22 = vsel %vm1627_vm5, %v3066_v55, 0.0  ;;  %vm2074_vm5 = vcmp.gt.f32.partialorder %v4601_v19, 0.0 }
 0x3f0   :  { %v4644_v37 = vpop.f32.mrb[40].mxu0  ;;  %3077 = vrcp.f32 %v1858_v53  ;;  %v3070_v24 = vpop.eup %3069  ;;  %v1855_v53 = vsel %vm1847_vm1, %v4470_v59, 1.0  ;;  %v1421_v38 = vsel %vm1397_vm6, %v3068_v30, 0.0  ;;  %vm2075_vm6 = vcmp.gt.f32.partialorder %v4611_v17, 0.0 }
 0x3f1   :  { %v4654_v48 = vpop.f32.mrb[41].mxu0  ;;  %2339 = vrot.lane.b32.xlu1 %v1740_v5, %s3167_s27  ;;  %v2084_v5 = vsel %vm2076_vm13, %v4633_v1, 1.0  ;;  %3079 = vrcp.f32 %v497_v35  ;;  %v1516_v35 = vmul.f32 %v4513_v52, %v1421_v38  ;;  %v498_v52 = vsel %vm5066_vm2, %v4221_v12, 1.0 }
 0x3f2   :  { %v4659_v23 = vpop.f32.mrb[42].mxu0  ;;  %3081 = vrcp.f32 %v2084_v5  ;;  %v1422_v5 = vsel %vm1398_vm7, %v3070_v24, 0.0  ;;  %v2082_v49 = vsel %vm2074_vm5, %v4601_v19, 1.0  ;;  %vm1853_vm7 = vcmp.gt.f32.partialorder %v4563_v26, 0.0  ;;  %v4743_v24 = vpop.xlane.xlu1 %2066 }
 0x3f3   :  { %v4667_v33 = vpop.f32.mrb[43].mxu0  ;;  %2317 = vrot.lane.b32.xlu0 %v1518_v47, %s3168_s28  ;;  %v1746_v47 = vmul.f32 %v4592_v13, %v1651_v22  ;;  %3083 = vrcp.f32 %v499_v40  ;;  %v500_v13 = vsel %vm492_vm3, %v4225_v54, 1.0  ;;  %v1517_v40 = vmul.f32 %v4524_v11, %v1422_v5 }
 0x3f4   :  { %v3072_v55 = vpop.eup %3071  ;;  %3085 = vrcp.f32 %v2085_v14  ;;  %v503_v22 = vsel %vm495_vm0, %v4223_v62, 1.0  ;;  %vm496_vm2 = vcmp.gt.f32.partialorder %v4229_v46, 0.0  ;;  %v2083_v7 = vsel %vm2075_vm6, %v4611_v17, 1.0 }
 0x3f5   :  { %2319 = vrot.lane.b32.xlu1 %v1519_v18, %s3168_s28  ;;  %v3074_v30 = vpop.eup %3073  ;;  %3087 = vrcp.f32 %v1855_v53  ;;  %v501_v38 = vsel %vm5067_vm4, %v4219_v10, 1.0  ;;  %v1861_v34 = vsel %vm1853_vm7, %v4563_v26, 1.0  ;;  %v504_v5 = vsel %vm496_vm2, %v4229_v46, 1.0 }
 0x3f6   :  { %3089 = vrcp.f32 %v500_v13  ;;  %v3076_v14 = vpop.eup %3075  ;;  %vm494_vm4 = vcmp.gt.f32.partialorder %v4227_v56, 0.0 }
 0x3f7   :  { %2349 = vrot.lane.b32.xlu0 %v1745_v45, %s3167_s27  ;;  %v1648_v45 = vsel %vm1624_vm8, %v3072_v55, 0.0  ;;  %3091 = vrcp.f32 %v1856_v25  ;;  %vm1854_vm8 = vcmp.gt.f32.partialorder %v4577_v31, 0.0 }
 0x3f8   :  { %v4695_v51 = vpop.f32.mrb[36].mxu1  ;;  %v1743_v11 = vmul.f32 %v4584_v2, %v1648_v45  ;;  %3093 = vrcp.f32 %v498_v52  ;;  %v4751_v2 = vpop.xlane.xlu0 %2063  ;;  %v1862_v58 = vsel %vm1854_vm8, %v4577_v31, 1.0 }
 0x3f9   :  { %v4703_v50 = vpop.f32.mrb[37].mxu1  ;;  %2351 = vrot.lane.b32.xlu1 %v1746_v47, %s3167_s27  ;;  %v1649_v47 = vsel %vm1625_vm9, %v3074_v30, 0.0  ;;  %3095 = vrcp.f32 %v2082_v49  ;;  %vm1851_vm9 = vcmp.gt.f32.partialorder %v4529_v16, 0.0 }
 0x3fa   :  { %v4711_v18 = vpop.f32.mrb[38].mxu1  ;;  %v3078_v53 = vpop.eup %3077  ;;  %v1744_v55 = vmul.f32 %v4595_v0, %v1649_v47  ;;  %3097 = vrcp.f32 %v503_v22  ;;  %v1859_v45 = vsel %vm1851_vm9, %v4529_v16, 1.0 }
 0x3fb   :  { %v4719_v36 = vpop.f32.mrb[39].mxu1  ;;  %2313 = vrot.lane.b32.xlu0 %v1516_v35, %s3168_s28  ;;  %v3080_v13 = vpop.eup %3079  ;;  %v1873_v35 = vsel %vm1849_vm10, %v3076_v14, 0.0  ;;  %3099 = vrcp.f32 %v2083_v7  ;;  %v1874_v52 = vsel %vm1850_vm11, %v3078_v53, 0.0  ;;  %vm1852_vm10 = vcmp.gt.f32.partialorder %v4540_v44, 0.0 }
 0x3fc   :  { %v3082_v25 = vpop.eup %3081  ;;  %v1968_v0 = vmul.f32 %v4553_v57, %v1873_v35  ;;  %3101 = vrcp.f32 %v501_v38  ;;  %v1969_v49 = vmul.f32 %v4567_v61, %v1874_v52  ;;  %v513_v57 = vsel %vm489_vm12, %v3080_v13, 0.0  ;;  %v4780_v14 = vpop.xlane.xlu1 %2072 }
 0x3fd   :  { %2315 = vrot.lane.b32.xlu1 %v1517_v40, %s3168_s28  ;;  %v3084_v30 = vpop.eup %3083  ;;  %3103 = vrcp.f32 %v1861_v34  ;;  %v2100_v28 = vsel %vm2076_vm13, %v3082_v25, 0.0  ;;  %v502_v61 = vsel %vm494_vm4, %v4227_v56, 1.0  ;;  %vm2078_vm11 = vcmp.gt.f32.partialorder %v4751_v2, 0.0  ;;  %v4788_v29 = vpop.xlane.xlu0 %2069 }
 0x3fe   :  { %v3086_v40 = vpop.eup %3085  ;;  %3105 = vrcp.f32 %v504_v5  ;;  %v515_v47 = vsel %vm491_vm14, %v3084_v30, 0.0  ;;  %v1860_v1 = vsel %vm1852_vm10, %v4540_v44, 1.0  ;;  %vm2425_vm12 = vcmask 130048  }
 0x3ff   :  { %2345 = vrot.lane.b32.xlu0 %v1743_v11, %s3167_s27  ;;  %v3088_v22 = vpop.eup %3087  ;;  %3107 = vrcp.f32 %v1862_v58  ;;  %v2195_v11 = vmul.f32 %v4623_v4, %v2100_v28  ;;  %v2101_v53 = vsel %vm2077_vm15, %v3086_v40, 0.0  ;;  %vm2079_vm13 = vcmp.gt.f32.partialorder %v4743_v24, 0.0 }
 0x400   :  { %v3090_v7 = vpop.eup %3089  ;;  %3109 = vrcp.f32 %v1859_v45  ;;  %v2196_v4 = vmul.f32 %v4637_v20, %v2101_v53  ;;  %v602_v13 = vmul.f32 %v4264_v8, %v513_v57  ;;  %v2086_v27 = vsel %vm2078_vm11, %v4751_v2, 1.0 }
 0x401   :  { %2347 = vrot.lane.b32.xlu1 %v1744_v55, %s3167_s27  ;;  %v3092_v38 = vpop.eup %3091  ;;  %v604_v55 = vmul.f32 %v4257_v6, %v515_v47  ;;  %3111 = vrcp.f32 %v502_v61  ;;  %v1871_v34 = vsel %vm1847_vm1, %v3088_v22, 0.0  ;;  %vm2080_vm14 = vcmp.gt.f32.partialorder %v4788_v29, 0.0 }
 0x402   :  { %v3094_v3 = vpop.eup %3093  ;;  %3113 = vrcp.f32 %v1860_v1  ;;  %v1966_v20 = vmul.f32 %v4558_v41, %v1871_v34  ;;  %v2087_v59 = vsel %vm2079_vm13, %v4743_v24, 1.0  ;;  %vm5069_vm15 = vcmp.gt.f32.partialorder %v4480_v21, 0.0 }
 0x403   :  { %2373 = vrot.lane.b32.xlu0 %v1968_v0, %s3166_s4  ;;  %v3096_v6 = vpop.eup %3095  ;;  %v516_v0 = vsel %vm492_vm3, %v3090_v7, 0.0  ;;  %v1872_v30 = vsel %vm5069_vm15, %v3092_v38, 0.0  ;;  %3115 = vrcp.f32 %v2086_v27  ;;  %vm2081_vm1 = vcmp.gt.f32.partialorder %v4780_v14, 0.0 }
 0x404   :  { %v3098_v5 = vpop.eup %3097  ;;  %v605_v52 = vmul.f32 %v4266_v9, %v516_v0  ;;  %v1967_v40 = vmul.f32 %v4572_v42, %v1872_v30  ;;  %v2098_v21 = vsel %vm2074_vm5, %v3096_v6, 0.0  ;;  %3117 = vrcp.f32 %v2087_v59 }
 0x405   :  { %2375 = vrot.lane.b32.xlu1 %v1969_v49, %s3166_s4  ;;  %v3100_v41 = vpop.eup %3099  ;;  %v2088_v49 = vsel %vm2080_vm14, %v4788_v29, 1.0  ;;  %v2193_v9 = vmul.f32 %v4627_v32, %v2098_v21  ;;  %vm5070_vm3 = vcmp.gt.f32.partialorder %v4221_v12, 0.0  ;;  %v519_v61 = vsel %vm495_vm0, %v3098_v5, 0.0 }
 0x406   :  { %v3102_v54 = vpop.eup %3101  ;;  %v514_v22 = vsel %vm5070_vm3, %v3094_v3, 0.0  ;;  %v2089_v19 = vsel %vm2081_vm1, %v4780_v14, 1.0  ;;  %v608_v47 = vmul.f32 %v4282_v15, %v519_v61  ;;  %3119 = vrcp.f32 %v2088_v49 }
 0x407   :  { %2405 = vrot.lane.b32.xlu0 %v2195_v11, %s3165_s26  ;;  %v3104_v45 = vpop.eup %3103  ;;  %v2099_v11 = vsel %vm2075_vm6, %v3100_v41, 0.0  ;;  %v603_v7 = vmul.f32 %v4268_v63, %v514_v22  ;;  %3121 = vrcp.f32 %v2089_v19  ;;  %vm5071_vm0 = vcmp.gt.f32.partialorder %v4219_v10, 0.0 }
 0x408   :  { %v3106_v42 = vpop.eup %3105  ;;  %v2194_v1 = vmul.f32 %v4641_v39, %v2099_v11  ;;  %v1877_v12 = vsel %vm1853_vm7, %v3104_v45, 0.0  ;;  %v517_v39 = vsel %vm5071_vm0, %v3102_v54, 0.0 }
 0x409   :  { %v2214_v35 = vpop.permute.xlu1 %2213  ;;  %2407 = vrot.lane.b32.xlu1 %v2196_v4, %s3165_s26  ;;  %v3108_v32 = vpop.eup %3107  ;;  %v1972_v17 = vmul.f32 %v4644_v37, %v1877_v12  ;;  %v520_v26 = vsel %vm496_vm2, %v3106_v42, 0.0  ;;  %v606_v37 = vmul.f32 %v4289_v43, %v517_v39  ;;  %vm5073_vm2 = vcmask 261120  }
 0x40a   :  { %v4812_v25 = vsel %vm2425_vm12, %v604_v55, %v2214_v35  ;;  %v2210_v8 = vpop.permute.xlu0 %2209  ;;  %v3110_v38 = vpop.eup %3109  ;;  %v1878_v4 = vsel %vm1854_vm8, %v3108_v32, 0.0  ;;  %vm5074_vm5 = vmmov %vm5073_vm2  ;;  %vm2459_vm8 = vcmask 654336  }
 0x40b   :  { %v4823_v58 = vsel %vm2425_vm12, %v602_v13, %v2210_v8  ;;  %2369 = vrot.lane.b32.xlu0 %v1966_v20, %s3166_s4  ;;  %v3112_v15 = vpop.eup %3111  ;;  %v609_v13 = vmul.f32 %v4293_v60, %v520_v26  ;;  %v1973_v27 = vmul.f32 %v4659_v23, %v1878_v4  ;;  %v1875_v34 = vsel %vm1851_vm9, %v3110_v38, 0.0  ;;  %v5072_v23 = vld [vmem:[#allocation5_spill] sm:$0xff]  ;;  %vm5075_vm6 = vmmov %vm5073_vm2 }
 0x40c   :  { %v3114_v3 = vpop.eup %3113  ;;  %v1970_v46 = vmul.f32 %v4654_v48, %v1875_v34  ;;  %v518_v43 = vsel %vm494_vm4, %v3112_v15, 0.0  ;;  %vm2442_vm4 = vcmask 392192   ;;  %vm5076_vm7 = vmmov %vm5073_vm2  ;;  %vm2468_vm9 = vcmask 785408  }
 0x40d   :  { %v2216_v57 = vpop.permute.xlu1 %2215  ;;  %2371 = vrot.lane.b32.xlu1 %v1967_v40, %s3166_s4  ;;  %v3116_v6 = vpop.eup %3115  ;;  %v1876_v60 = vsel %vm1852_vm10, %v3114_v3, 0.0  ;;  %v607_v8 = vmul.f32 %v5072_v23, %v518_v43  ;;  %vm5077_vm10 = vcmask 523264   ;;  %vm5083_vm3 = vmmov %vm5073_vm2 }
 0x40e   :  { %v4836_v28 = vsel %vm2425_vm12, %v605_v52, %v2216_v57  ;;  %v3118_v16 = vpop.eup %3117  ;;  %v1971_v5 = vmul.f32 %v4667_v33, %v1876_v60  ;;  %v2102_v48 = vsel %vm2078_vm11, %v3116_v6, 0.0  ;;  %vm2477_vm11 = vcmask 916480   ;;  %vm5081_vm15 = vmmov %vm5077_vm10 }
 0x40f   :  { %2401 = vrot.lane.b32.xlu0 %v2193_v9, %s3165_s26  ;;  %v2197_v30 = vmul.f32 %v4703_v50, %v2102_v48  ;;  %v2103_v44 = vsel %vm2079_vm13, %v3118_v16, 0.0  ;;  %vm5079_vm13 = vmmov %vm5073_vm2 }
 0x410   :  { %v3120_v59 = vpop.eup %3119  ;;  %v2198_v33 = vmul.f32 %v4719_v36, %v2103_v44  ;;  %vm5084_vm0 = vmmov %vm5073_vm2 }
 0x411   :  { %v2212_v62 = vpop.permute.xlu1 %2211  ;;  %v2222_v53 = vpop.permute.xlu0 %2221  ;;  %2403 = vrot.lane.b32.xlu1 %v2194_v1, %s3165_s26  ;;  %v2104_v2 = vsel %vm2080_vm14, %v3120_v59, 0.0  ;;  %vm5080_vm14 = vmmov %vm5077_vm10 }
 0x412   :  { %v4856_v55 = vsel %vm2425_vm12, %v603_v7, %v2212_v62  ;;  %v2432_v63 = vsel %vm2425_vm12, %v608_v47, %v2222_v53  ;;  %v3122_v41 = vpop.eup %3121  ;;  %v2199_v52 = vmul.f32 %v4695_v51, %v2104_v2 }
 0x413   :  { %2381 = vrot.lane.b32.xlu0 %v1972_v17, %s3166_s4  ;;  %v2105_v50 = vsel %vm2081_vm1, %v3122_v41, 0.0  ;;  %vm5082_vm1 = vmmov %vm5077_vm10 }
 0x414   :  { %v2200_v40 = vmul.f32 %v4711_v18, %v2105_v50 }
 0x415   :  { %v2224_v10 = vpop.permute.xlu1 %2223  ;;  %v2218_v35 = vpop.permute.xlu0 %2217  ;;  %2383 = vrot.lane.b32.xlu1 %v1973_v27, %s3166_s4 }
 0x416   :  { %v2433_v31 = vsel %vm2425_vm12, %v609_v13, %v2224_v10  ;;  %v4875_v20 = vsel %vm2425_vm12, %v606_v37, %v2218_v35 }
 0x417   :  { %2377 = vrot.lane.b32.xlu0 %v1970_v46, %s3166_s4 }
 0x419   :  { %v2220_v0 = vpop.permute.xlu1 %2219  ;;  %2379 = vrot.lane.b32.xlu1 %v1971_v5, %s3166_s4 }
 0x41a   :  { %v4889_v56 = vsel %vm2425_vm12, %v607_v8, %v2220_v0  ;;  %vm5078_vm12 = vmmov %vm5073_vm2 }
 0x41b   :  { %2409 = vrot.lane.b32.xlu0 %v2197_v30, %s3165_s26 }
 0x41d   :  { %2411 = vrot.lane.b32.xlu1 %v2198_v33, %s3165_s26 }
 0x41f   :  { %2413 = vrot.lane.b32.xlu0 %v2199_v52, %s3165_s26 }
 0x421   :  { %2415 = vrot.lane.b32.xlu1 %v2200_v40, %s3165_s26  ;;  %v2246_v54 = vpop.permute.xlu0 %2245 }
 0x422   :  { %v2436_v35 = vsel %vm5076_vm7, %v4812_v25, %v2246_v54 }
 0x423   :  { %v2248_v24 = vpop.permute.xlu1 %2247 }
 0x424   :  { %v2437_v36 = vsel %vm5073_vm2, %v4836_v28, %v2248_v24  ;;  %vm5085_vm2 = vmmov %vm5082_vm1 }
 0x42d   :  { %v2278_v29 = vpop.permute.xlu0 %2277 }
 0x42e   :  { %v2445_v46 = vsel %vm2442_vm4, %v2436_v35, %v2278_v29 }
 0x42f   :  { %v2280_v49 = vpop.permute.xlu1 %2279 }
 0x430   :  { %v2446_v51 = vsel %vm2442_vm4, %v2437_v36, %v2280_v49 }
 0x431   :  { %v2242_v21 = vpop.permute.xlu0 %2241 }
 0x432   :  { %v2434_v48 = vsel %vm5078_vm12, %v4823_v58, %v2242_v21 }
 0x433   :  { %v2244_v57 = vpop.permute.xlu1 %2243 }
 0x434   :  { %v2435_v30 = vsel %vm5079_vm13, %v4856_v55, %v2244_v57 }
 0x435   :  { %v2274_v14 = vpop.permute.xlu0 %2273 }
 0x436   :  { %v2443_v59 = vsel %vm2442_vm4, %v2434_v48, %v2274_v14 }
 0x437   :  { %v2276_v45 = vpop.permute.xlu1 %2275 }
 0x438   :  { %v2444_v33 = vsel %vm2442_vm4, %v2435_v30, %v2276_v45 }
 0x43d   :  { %v2254_v9 = vpop.permute.xlu0 %2253 }
 0x43e   :  { %v2440_v18 = vsel %vm5074_vm5, %v2432_v63, %v2254_v9  ;;  %vm5086_vm5 = vmmov %vm5082_vm1 }
 0x43f   :  { %v2256_v42 = vpop.permute.xlu1 %2255 }
 0x440   :  { %v2441_v22 = vsel %vm5075_vm6, %v2433_v31, %v2256_v42  ;;  %vm5087_vm6 = vmmov %vm5082_vm1 }
 0x449   :  { %v2286_v61 = vpop.permute.xlu0 %2285 }
 0x44a   :  { %v4911_v19 = vsel %vm2442_vm4, %v2440_v18, %v2286_v61 }
 0x44b   :  { %v2288_v28 = vpop.permute.xlu1 %2287 }
 0x44c   :  { %v4914_v11 = vsel %vm2442_vm4, %v2441_v22, %v2288_v28 }
 0x44d   :  { %v4916_v32 = vpop.permute.xlu0 %2249 }
 0x44e   :  { %v2438_v42 = vsel %vm5083_vm3, %v4875_v20, %v4916_v32 }
 0x44f   :  { %v4918_v7 = vpop.permute.xlu1 %2251 }
 0x450   :  { %v2439_v28 = vsel %vm5084_vm0, %v4889_v56, %v4918_v7 }
 0x451   :  { %v4920_v47 = vpop.permute.xlu0 %2281 }
 0x452   :  { %v2447_v61 = vsel %vm2442_vm4, %v2438_v42, %v4920_v47 }
 0x453   :  { %v4922_v1 = vpop.permute.xlu1 %2283 }
 0x455   :  { %v2310_v12 = vpop.permute.xlu0 %2309 }
 0x456   :  { %v2453_v31 = vsel %vm5077_vm10, %v2445_v46, %v2310_v12 }
 0x457   :  { %v2312_v62 = vpop.permute.xlu1 %2311 }
 0x458   :  { %v2454_v52 = vsel %vm5081_vm15, %v2446_v51, %v2312_v62 }
 0x459   :  { %v2342_v53 = vpop.permute.xlu0 %2341 }
 0x45a   :  { %v2462_v60 = vsel %vm2459_vm8, %v2453_v31, %v2342_v53  ;;  %v2448_v53 = vsel %vm2442_vm4, %v2439_v28, %v4922_v1  ;;  %vm5088_vm4 = vmmov %vm5082_vm1 }
 0x45b   :  { %v2344_v38 = vpop.permute.xlu1 %2343 }
 0x45c   :  { %v2463_v24 = vsel %vm2459_vm8, %v2454_v52, %v2344_v38 }
 0x45d   :  { %v2306_v17 = vpop.permute.xlu0 %2305 }
 0x45e   :  { %v2451_v44 = vsel %vm5080_vm14, %v2443_v59, %v2306_v17 }
 0x45f   :  { %v2308_v63 = vpop.permute.xlu1 %2307 }
 0x460   :  { %v2452_v50 = vsel %vm5082_vm1, %v2444_v33, %v2308_v63 }
 0x461   :  { %v2338_v15 = vpop.permute.xlu0 %2337 }
 0x462   :  { %v2460_v2 = vsel %vm2459_vm8, %v2451_v44, %v2338_v15 }
 0x463   :  { %v2340_v39 = vpop.permute.xlu1 %2339 }
 0x464   :  { %v2461_v36 = vsel %vm2459_vm8, %v2452_v50, %v2340_v39 }
 0x465   :  { %v4924_v26 = vpop.permute.xlu0 %2317 }
 0x466   :  { %v2457_v56 = vsel %vm5087_vm6, %v4911_v19, %v4924_v26 }
 0x467   :  { %v4926_v4 = vpop.permute.xlu1 %2319 }
 0x469   :  { %v4928_v3 = vpop.permute.xlu0 %2349 }
 0x46a   :  { %v2466_v39 = vsel %vm2459_vm8, %v2457_v56, %v4928_v3 }
 0x46b   :  { %v4930_v37 = vpop.permute.xlu1 %2351 }
 0x46d   :  { %v2314_v13 = vpop.permute.xlu0 %2313 }
 0x46e   :  { %v2455_v12 = vsel %vm5085_vm2, %v2447_v61, %v2314_v13 }
 0x46f   :  { %v2316_v27 = vpop.permute.xlu1 %2315 }
 0x470   :  { %v2456_v17 = vsel %vm5086_vm5, %v2448_v53, %v2316_v27  ;;  %v2458_v27 = vsel %vm5088_vm4, %v4914_v11, %v4926_v4 }
 0x471   :  { %v2346_v34 = vpop.permute.xlu0 %2345 }
 0x472   :  { %v2464_v38 = vsel %vm2459_vm8, %v2455_v12, %v2346_v34 }
 0x473   :  { %v2348_v10 = vpop.permute.xlu1 %2347 }
 0x474   :  { %v2465_v63 = vsel %vm2459_vm8, %v2456_v17, %v2348_v10  ;;  %v2467_v10 = vsel %vm2459_vm8, %v2458_v27, %v4930_v37 }
 0x475   :  { %v2374_v6 = vpop.permute.xlu0 %2373 }
 0x476   :  { %v2471_v16 = vsel %vm2468_vm9, %v2462_v60, %v2374_v6 }
 0x477   :  { %v2376_v43 = vpop.permute.xlu1 %2375 }
 0x478   :  { %v2472_v54 = vsel %vm2468_vm9, %v2463_v24, %v2376_v43 }
 0x479   :  { %v2406_v23 = vpop.permute.xlu0 %2405 }
 0x47a   :  { %v4939_v8 = vsel %vm2477_vm11, %v2471_v16, %v2406_v23 }
 0x47b   :  { %v2488_v25 = vmul.f32 %v4939_v8, %v4939_v8  ;;  %v2408_v5 = vpop.permute.xlu1 %2407 }
 0x47c   :  { %v4964_v21 = vsel %vm2477_vm11, %v2472_v54, %v2408_v5 }
 0x47d   :  { %v2370_v0 = vpop.permute.xlu0 %2369  ;;  %2498 = vadd.xlane.f32.xlu0 %v2488_v25  ;;  %v2489_v9 = vmul.f32 %v4964_v21, %v4964_v21 }
 0x47e   :  { %v2469_v58 = vsel %vm2468_vm9, %v2460_v2, %v2370_v0 }
 0x47f   :  { %v2372_v41 = vpop.permute.xlu1 %2371 }
 0x480   :  { %v2470_v29 = vsel %vm2468_vm9, %v2461_v36, %v2372_v41 }
 0x481   :  { %v2402_v40 = vpop.permute.xlu0 %2401 }
 0x482   :  { %v4957_v55 = vsel %vm2477_vm11, %v2469_v58, %v2402_v40 }
 0x483   :  { %v2486_v49 = vmul.f32 %v4957_v55, %v4957_v55  ;;  %v2404_v51 = vpop.permute.xlu1 %2403 }
 0x484   :  { %v4967_v57 = vsel %vm2477_vm11, %v2470_v29, %v2404_v51 }
 0x485   :  { %v2487_v14 = vmul.f32 %v4967_v57, %v4967_v57  ;;  %v2382_v45 = vpop.permute.xlu0 %2381  ;;  %2494 = vadd.xlane.f32.xlu0 %v2486_v49 }
 0x486   :  { %v2475_v34 = vsel %vm2468_vm9, %v2466_v39, %v2382_v45 }
 0x487   :  { %2496 = vadd.xlane.f32.xlu1 %v2487_v14  ;;  %v2384_v18 = vpop.permute.xlu1 %2383 }
 0x488   :  { %v2476_v3 = vsel %vm2468_vm9, %v2467_v10, %v2384_v18 }
 0x489   :  { %v2378_v22 = vpop.permute.xlu0 %2377  ;;  %2500 = vadd.xlane.f32.xlu0 %v2489_v9 }
 0x48a   :  { %v2473_v20 = vsel %vm2468_vm9, %v2464_v38, %v2378_v22 }
 0x48b   :  { %v2380_v62 = vpop.permute.xlu1 %2379 }
 0x48c   :  { %v2474_v7 = vsel %vm2468_vm9, %v2465_v63, %v2380_v62 }
 0x48d   :  { %v2410_v32 = vpop.permute.xlu0 %2409 }
 0x48e   :  { %v4989_v47 = vsel %vm2477_vm11, %v2473_v20, %v2410_v32 }
 0x48f   :  { %v2490_v1 = vmul.f32 %v4989_v47, %v4989_v47  ;;  %v2412_v15 = vpop.permute.xlu1 %2411 }
 0x490   :  { %v5000_v13 = vsel %vm2477_vm11, %v2474_v7, %v2412_v15 }
 0x491   :  { %v2491_v19 = vmul.f32 %v5000_v13, %v5000_v13  ;;  %v2414_v26 = vpop.permute.xlu0 %2413  ;;  %2502 = vadd.xlane.f32.xlu0 %v2490_v1 }
 0x492   :  { %v5011_v35 = vsel %vm2477_vm11, %v2475_v34, %v2414_v26 }
 0x493   :  { %v2492_v6 = vmul.f32 %v5011_v35, %v5011_v35  ;;  %v2416_v46 = vpop.permute.xlu1 %2415  ;;  %2504 = vadd.xlane.f32.xlu1 %v2491_v19 }
 0x494   :  { %v5017_v11 = vsel %vm2477_vm11, %v2476_v3, %v2416_v46 }
 0x495   :  { %v2493_v4 = vmul.f32 %v5017_v11, %v5017_v11  ;;  %2506 = vadd.xlane.f32.xlu0 %v2492_v6 }
 0x497   :  { %2508 = vadd.xlane.f32.xlu1 %v2493_v4 }
 0x50a   :  { %v2499_v31 = vpop.xlane.xlu0 %2498 }
 0x50b   :  { %vm2512_vm7 = vcmp.gt.f32.partialorder %v2499_v31, 0.0 }
 0x50c   :  { %v2520_v37 = vsel %vm2512_vm7, %v2499_v31, 1.0 }
 0x50d   :  { %3123 = vrsqrt.f32 %v2520_v37 }
 0x512   :  { %v2495_v43 = vpop.xlane.xlu0 %2494 }
 0x513   :  { %vm2510_vm8 = vcmp.gt.f32.partialorder %v2495_v43, 0.0 }
 0x514   :  { %v2518_v60 = vsel %vm2510_vm8, %v2495_v43, 1.0  ;;  %v2497_v16 = vpop.xlane.xlu1 %2496 }
 0x515   :  { %3125 = vrsqrt.f32 %v2518_v60  ;;  %vm2511_vm9 = vcmp.gt.f32.partialorder %v2497_v16, 0.0 }
 0x516   :  { %v2519_v23 = vsel %vm2511_vm9, %v2497_v16, 1.0  ;;  %v2501_v25 = vpop.xlane.xlu0 %2500 }
 0x517   :  { %v3124_v5 = vpop.eup %3123  ;;  %3127 = vrsqrt.f32 %v2519_v23  ;;  %vm2513_vm10 = vcmp.gt.f32.partialorder %v2501_v25, 0.0 }
 0x518   :  { %v2536_v48 = vsel %vm2512_vm7, %v3124_v5, 0.0  ;;  %v2521_v0 = vsel %vm2513_vm10, %v2501_v25, 1.0 }
 0x519   :  { %v2544_v59 = vmul.f32 %v2536_v48, %v4939_v8  ;;  %3129 = vrsqrt.f32 %v2521_v0 }
 0x51b   :  { %2552 = vst [vmem:[#allocation2 + $0x10] sm:$0xff] %v2544_v59 }
 0x51e   :  { %v2503_v30 = vpop.xlane.xlu0 %2502 }
 0x51f   :  { %v3126_v44 = vpop.eup %3125  ;;  %vm2514_vm11 = vcmp.gt.f32.partialorder %v2503_v30, 0.0 }
 0x520   :  { %v2534_v41 = vsel %vm2510_vm8, %v3126_v44, 0.0  ;;  %v2522_v33 = vsel %vm2514_vm11, %v2503_v30, 1.0  ;;  %v2505_v2 = vpop.xlane.xlu1 %2504 }
 0x521   :  { %v3128_v52 = vpop.eup %3127  ;;  %v2542_v50 = vmul.f32 %v2534_v41, %v4957_v55  ;;  %3131 = vrsqrt.f32 %v2522_v33  ;;  %vm2515_vm12 = vcmp.gt.f32.partialorder %v2505_v2, 0.0 }
 0x522   :  { %v2535_v58 = vsel %vm2511_vm9, %v3128_v52, 0.0  ;;  %v2523_v40 = vsel %vm2515_vm12, %v2505_v2, 1.0  ;;  %v2507_v8 = vpop.xlane.xlu0 %2506 }
 0x523   :  { %v3130_v24 = vpop.eup %3129  ;;  %2550 = vst [vmem:[#allocation2] sm:$0xff] %v2542_v50  ;;  %v2543_v36 = vmul.f32 %v2535_v58, %v4967_v57  ;;  %3133 = vrsqrt.f32 %v2523_v40  ;;  %vm2516_vm13 = vcmp.gt.f32.partialorder %v2507_v8, 0.0 }
 0x524   :  { %v2537_v54 = vsel %vm2513_vm10, %v3130_v24, 0.0  ;;  %v2524_v29 = vsel %vm2516_vm13, %v2507_v8, 1.0  ;;  %v2509_v49 = vpop.xlane.xlu1 %2508 }
 0x525   :  { %2551 = vst [vmem:[#allocation2 + $0x8] sm:$0xff] %v2543_v36  ;;  %v2545_v55 = vmul.f32 %v2537_v54, %v4964_v21  ;;  %3135 = vrsqrt.f32 %v2524_v29  ;;  %vm2517_vm14 = vcmp.gt.f32.partialorder %v2509_v49, 0.0 }
 0x526   :  { %v2525_v51 = vsel %vm2517_vm14, %v2509_v49, 1.0 }
 0x527   :  { %2553 = vst [vmem:[#allocation2 + $0x18] sm:$0xff] %v2545_v55  ;;  %3137 = vrsqrt.f32 %v2525_v51 }
 0x52b   :  { %v3132_v14 = vpop.eup %3131 }
 0x52c   :  { %v2538_v45 = vsel %vm2514_vm11, %v3132_v14, 0.0 }
 0x52d   :  { %v3134_v57 = vpop.eup %3133  ;;  %v2546_v9 = vmul.f32 %v2538_v45, %v4989_v47 }
 0x52e   :  { %v2539_v18 = vsel %vm2515_vm12, %v3134_v57, 0.0 }
 0x52f   :  { %v3136_v42 = vpop.eup %3135  ;;  %2554 = vst [vmem:[#allocation2 + $0x20] sm:$0xff] %v2546_v9  ;;  %v2547_v22 = vmul.f32 %v2539_v18, %v5000_v13 }
 0x530   :  { %v2540_v21 = vsel %vm2516_vm13, %v3136_v42, 0.0 }
 0x531   :  { %v3138_v61 = vpop.eup %3137  ;;  %2555 = vst [vmem:[#allocation2 + $0x28] sm:$0xff] %v2547_v22  ;;  %v2548_v28 = vmul.f32 %v2540_v21, %v5011_v35 }
 0x532   :  { %v2541_v12 = vsel %vm2517_vm14, %v3138_v61, 0.0 }
 0x533   :  { %2556 = vst [vmem:[#allocation2 + $0x30] sm:$0xff] %v2548_v28  ;;  %v2549_v62 = vmul.f32 %v2541_v12, %v5017_v11 }
 0x535   :  { %2557 = vst [vmem:[#allocation2 + $0x38] sm:$0xff] %v2549_v62 }
 0x536   :  { %3150 = shalt.err (!%p3147_p4)
}
 0x537   :  { %s3151_s14 = scalar_lea.hbm %s5062_s7, 1024 }
 0x538   :  { %p3152_p5 = scmp.ne.s32.totalorder %s5062_s7, %s3151_s14  ;;  %p3155_p6 = scmp.lt.u32.totalorder %s3151_s14, %s5062_s7 }
 0x53a   :  { %p3157_p7 = pnand %p3155_p6, %p3152_p5 }
 0x53c   :  { %3160 = shalt.err (!%p3157_p7)
}
 0x53d   :  { %s3173_s19 = smov 128   ;;  %s3174_s0 = smov 8  }
 0x53e   :  { %2569 = dma.vmem_to_hbm [thread:$0]  %s2564_s2, 1024, %s5062_s7, [#allocation3], %s3173_s19, %s3173_s19, %s3174_s0  }
 0x53f   :  { %3161 = dma.done.wait [#allocation3], 1024  }
 0x540   :  { %3162 = vsyncadd [#allocation3], 4294966272 }
 0x541   :  { %2573 = vsyncpa [#allocation3], 1 }

</bundles_post_ra>
